<compile_context>
chip_gen: v7x
topology: tpu7x:2x2x1
jax: 0.10.0
libtpu: 0.0.40
codegen_flags: <defaults>
</compile_context>

<pallas_src>
import functools

import jax
import jax.numpy as jnp
from jax.experimental import pallas as pl
from jax.experimental.pallas import tpu as pltpu

LN_EPS = 1e-5


def _layernorm(x, gamma, beta):
    mu = jnp.mean(x, axis=-1, keepdims=True)
    var = jnp.mean((x - mu) ** 2, axis=-1, keepdims=True)
    return (x - mu) * jax.lax.rsqrt(var + LN_EPS) * gamma + beta


# ----------------------------------------------------------------------------
# in-kernel fused multi-head self-attention (head-batched einsums)
# ----------------------------------------------------------------------------
def _mhsa(xn, wqkv_ref, wproj_ref, bproj_ref, num_heads, scale, G, N, C):
    """MHSA over G sequences of length N; xn is the (G*N, C) normed tokens."""
    hd = C // num_heads
    qkv = jnp.dot(xn.astype(jnp.bfloat16), wqkv_ref[...],
                  preferred_element_type=jnp.float32)            # (G*N, 3C) f32
    qkv = qkv.reshape(G, N, 3 * C).astype(jnp.bfloat16)

    # Merge (head, sequence) into ONE leading batch dim -> single batched
    # contractions for scores and A@V (no per-head MXU push/drain cycles).
    q = jnp.concatenate(
        [qkv[:, :, h * hd:(h + 1) * hd] for h in range(num_heads)], axis=0)
    k = jnp.concatenate(
        [qkv[:, :, C + h * hd:C + (h + 1) * hd] for h in range(num_heads)], axis=0)
    v = jnp.concatenate(
        [qkv[:, :, 2 * C + h * hd:2 * C + (h + 1) * hd] for h in range(num_heads)],
        axis=0)                                                  # (H*G, N, hd)

    s = jnp.einsum("bnd,bmd->bnm", q, k,
                   preferred_element_type=jnp.float32) * scale   # (H*G, N, N)
    s = s - jnp.max(s, axis=-1, keepdims=True)
    p = jnp.exp(s)
    p = p * pl.reciprocal(jnp.sum(p, axis=-1, keepdims=True), approx=True)
    o = jnp.einsum("bnm,bmd->bnd", p.astype(jnp.bfloat16), v,
                   preferred_element_type=jnp.float32)           # (H*G, N, hd)

    # regroup heads back onto the channel axis (head-major, matches wproj)
    o = jnp.concatenate([o[h * G:(h + 1) * G] for h in range(num_heads)],
                        axis=-1)                                 # (G, N, C)
    out = jnp.dot(o.reshape(G * N, C).astype(jnp.bfloat16), wproj_ref[...],
                  preferred_element_type=jnp.float32)
    return out + bproj_ref[...].astype(jnp.float32)              # (G*N, C)


# ----------------------------------------------------------------------------
# kernels
# ----------------------------------------------------------------------------
def temporal_kernel(x_ref, g_ref, b_ref, wqkv_ref, wproj_ref, bproj_ref, o_ref,
                    *, num_heads, scale):
    """LayerNorm + temporal MHSA + (proj folded with temporal_fc)."""
    x = x_ref[...].astype(jnp.float32)                           # (G, N, C)
    G, N, C = x.shape
    gamma = g_ref[...].astype(jnp.float32)
    beta = b_ref[...].astype(jnp.float32)
    xn = _layernorm(x.reshape(G * N, C), gamma, beta)
    out = _mhsa(xn, wqkv_ref, wproj_ref, bproj_ref, num_heads, scale, G, N, C)
    o_ref[...] = out.reshape(G, N, C).astype(o_ref.dtype)


def spatial_mlp_kernel(x_ref, g1_ref, b1_ref, wqkv_ref, wproj_ref, bproj_ref,
                       g2_ref, b2_ref, w1_ref, fb1_ref, w2_ref, fb2_ref, o_ref,
                       *, num_heads, scale):
    """LN1 + spatial MHSA + proj + residual, then LN2 + MLP + residual (fused)."""
    x = x_ref[...].astype(jnp.float32)                           # (G, N, C)
    G, N, C = x.shape
    xf = x.reshape(G * N, C)

    xn = _layernorm(xf, g1_ref[...].astype(jnp.float32),
                    b1_ref[...].astype(jnp.float32))
    res_spatial = _mhsa(xn, wqkv_ref, wproj_ref, bproj_ref,
                        num_heads, scale, G, N, C)
    x2 = xf + res_spatial                                        # x = xt + res_spatial

    xn2 = _layernorm(x2, g2_ref[...].astype(jnp.float32),
                     b2_ref[...].astype(jnp.float32))
    h = jnp.dot(xn2.astype(jnp.bfloat16), w1_ref[...],
                preferred_element_type=jnp.float32) + fb1_ref[...].astype(jnp.float32)
    h = jax.nn.gelu(h, approximate=False)                        # exact erf GELU
    y = jnp.dot(h.astype(jnp.bfloat16), w2_ref[...],
                preferred_element_type=jnp.float32) + fb2_ref[...].astype(jnp.float32)

    o_ref[...] = (x2 + y).reshape(G, N, C).astype(o_ref.dtype)


# ----------------------------------------------------------------------------
# generation-aware sizing
# ----------------------------------------------------------------------------
@functools.lru_cache(maxsize=None)
def _hw_budget():
    """(target_block_bytes, vmem_limit_bytes, multi_core) from the TPU generation."""
    vmem = 128 * 1024 * 1024
    try:
        info = pltpu.get_tpu_info()
        v = int(getattr(info, "vmem_capacity_bytes", 0))
        if v > 0:
            vmem = v
    except Exception:
        pass
    target = max(2 << 20, min(16 << 20, vmem // 8))     # per-step intermediate budget
    limit = max(32 << 20, min(64 << 20, vmem // 2))     # mosaic scoped-VMEM limit
    multi_core = vmem <= 96 * 1024 * 1024               # v7x-class: 64 MiB/TC, 2 TCs
    return target, limit, multi_core


def _choose_group(num_seq, N, C, num_heads, hidden, target_bytes, multi_core):
    """Largest divisor G of num_seq whose in-kernel f32 intermediates fit the
    budget; on 2-TensorCore chips prefer an even (>=2) parallel step count."""
    def blk_bytes(g):
        toks = g * N
        b = toks * C * 4 * 6                    # x / xn / res / attn-out / x2 / out
        b += toks * 3 * C * 6                   # qkv (f32 + bf16 copies)
        b += g * num_heads * N * N * 4 * 2      # scores + probs
        b += toks * hidden * 6                  # mlp hidden (f32 + bf16)
        return 2 * b                            # headroom for I/O double buffering

    divisors = [g for g in range(1, num_seq + 1) if num_seq % g == 0]
    ok = [g for g in divisors if blk_bytes(g) <= target_bytes] or [1]
    if multi_core:
        even = [g for g in ok if (num_seq // g) >= 2 and (num_seq // g) % 2 == 0]
        if even:
            return max(even)
    return max(ok)


def _rep_spec(shape):
    # Replicated (constant-index) operand: DMA'd once, reused every grid step.
    return pl.BlockSpec(shape, lambda i: (0,) * len(shape))


# ----------------------------------------------------------------------------
# pallas_call wrappers
# ----------------------------------------------------------------------------
def temporal_attention_pallas(x, gamma, beta, wqkv, wproj, bproj, num_heads,
                              out_dtype):
    S, N, C = x.shape
    scale = (C // num_heads) ** -0.5
    target, limit, multi = _hw_budget()
    G = _choose_group(S, N, C, num_heads, 0, target, multi)
    kern = functools.partial(temporal_kernel, num_heads=num_heads, scale=scale)
    return pl.pallas_call(
        kern,
        out_shape=jax.ShapeDtypeStruct((S, N, C), out_dtype),
        grid=(S // G,),
        in_specs=[
            pl.BlockSpec((G, N, C), lambda i: (i, 0, 0)),
            _rep_spec((1, C)), _rep_spec((1, C)),
            _rep_spec((C, 3 * C)), _rep_spec((C, C)), _rep_spec((1, C)),
        ],
        out_specs=pl.BlockSpec((G, N, C), lambda i: (i, 0, 0)),
        compiler_params=pltpu.CompilerParams(
            dimension_semantics=("parallel",), vmem_limit_bytes=limit),
    )(x, gamma, beta, wqkv, wproj, bproj)


def spatial_mlp_pallas(x, p, num_heads, out_dtype):
    S, N, C = x.shape
    hidden = p["fc1_w"].shape[1]
    scale = (C // num_heads) ** -0.5
    target, limit, multi = _hw_budget()
    G = _choose_group(S, N, C, num_heads, hidden, target, multi)
    bf16 = jnp.bfloat16
    kern = functools.partial(spatial_mlp_kernel, num_heads=num_heads, scale=scale)
    return pl.pallas_call(
        kern,
        out_shape=jax.ShapeDtypeStruct((S, N, C), out_dtype),
        grid=(S // G,),
        in_specs=[
            pl.BlockSpec((G, N, C), lambda i: (i, 0, 0)),
            _rep_spec((1, C)), _rep_spec((1, C)),
            _rep_spec((C, 3 * C)), _rep_spec((C, C)), _rep_spec((1, C)),
            _rep_spec((1, C)), _rep_spec((1, C)),
            _rep_spec((C, hidden)), _rep_spec((1, hidden)),
            _rep_spec((hidden, C)), _rep_spec((1, C)),
        ],
        out_specs=pl.BlockSpec((G, N, C), lambda i: (i, 0, 0)),
        compiler_params=pltpu.CompilerParams(
            dimension_semantics=("parallel",), vmem_limit_bytes=limit),
    )(x,
      p["s_ln_g"], p["s_ln_b"],
      p["s_wqkv"].astype(bf16), p["s_wproj"].astype(bf16), p["s_bproj"],
      p["n2_g"], p["n2_b"],
      p["fc1_w"].astype(bf16), p["fc1_b"],
      p["fc2_w"].astype(bf16), p["fc2_b"])


# ----------------------------------------------------------------------------
# Block forward (divided_space_time), matching the PyTorch reference
# ----------------------------------------------------------------------------
def block_forward(x, p, B, T, W, num_heads):
    _, Ntot, C = x.shape
    HW = Ntot // T
    bf16 = jnp.bfloat16

    # Fold temporal_fc into the temporal attention projection:
    #   (a @ Wp + bp) @ Wfc + bfc  ==  a @ (Wp @ Wfc) + (bp @ Wfc + bfc)
    t_wproj = jnp.dot(p["t_wproj"], p["tfc_w"], precision="highest")
    t_bproj = jnp.dot(p["t_bproj"], p["tfc_w"], precision="highest") + p["tfc_b"]

    # --- temporal attention:  'b (h w t) m -> (b h w) t m'
    xt = x.reshape(B * HW, T, C)
    xt2 = temporal_attention_pallas(
        xt, p["t_ln_g"], p["t_ln_b"],
        p["t_wqkv"].astype(bf16), t_wproj.astype(bf16), t_bproj,
        num_heads, out_dtype=bf16)
    # matches reference: xt = res_temporal (no residual on this branch)

    # regroup to spatial order (bf16 -> half the HBM traffic for the transpose)
    xs = xt2.reshape(B, HW, T, C).transpose(0, 2, 1, 3).reshape(B * T, HW, C)

    # --- fused: LN1 + spatial MHSA + proj + residual + LN2 + MLP + residual
    out = spatial_mlp_pallas(xs, p, num_heads, out_dtype=x.dtype)

    # regroup back: '(b t) (h w) m -> b (h w t) m'
    return out.reshape(B, T, HW, C).transpose(0, 2, 1, 3).reshape(B, Ntot, C)


# ----------------------------------------------------------------------------
# pure-JAX f32 reference (for correctness check)
# ----------------------------------------------------------------------------
def _ref_attention(x, g, b, wqkv, wproj, bproj, num_heads):
    S, N, C = x.shape
    hd = C // num_heads
    scale = hd ** -0.5
    xn = _layernorm(x, g, b)
    qkv = xn @ wqkv
    q = qkv[..., :C].reshape(S, N, num_heads, hd).transpose(0, 2, 1, 3)
    k = qkv[..., C:2 * C].reshape(S, N, num_heads, hd).transpose(0, 2, 1, 3)
    v = qkv[..., 2 * C:].reshape(S, N, num_heads, hd).transpose(0, 2, 1, 3)
    a = jnp.einsum("shnd,shmd->shnm", q, k) * scale
    a = jax.nn.softmax(a, axis=-1)
    o = jnp.einsum("shnm,shmd->shnd", a, v).transpose(0, 2, 1, 3).reshape(S, N, C)
    return o @ wproj + bproj


def reference_block(x, p, B, T, W, num_heads):
    _, Ntot, C = x.shape
    HW = Ntot // T
    xt = x.reshape(B, HW, T, C).reshape(B * HW, T, C)
    rt = _ref_attention(xt, p["t_ln_g"], p["t_ln_b"], p["t_wqkv"],
                        p["t_wproj"], p["t_bproj"], num_heads)
    rt = rt.reshape(B, HW * T, C) @ p["tfc_w"] + p["tfc_b"]
    xt2 = rt
    xs = xt2.reshape(B, HW, T, C).transpose(0, 2, 1, 3).reshape(B * T, HW, C)
    rs = _ref_attention(xs, p["s_ln_g"], p["s_ln_b"], p["s_wqkv"],
                        p["s_wproj"], p["s_bproj"], num_heads)
    rs = rs.reshape(B, T, HW, C).transpose(0, 2, 1, 3).reshape(B, HW * T, C)
    x2 = xt2 + rs
    xn = _layernorm(x2, p["n2_g"], p["n2_b"])
    h = jax.nn.gelu(xn @ p["fc1_w"] + p["fc1_b"], approximate=False)
    return x2 + (h @ p["fc2_w"] + p["fc2_b"])


# ----------------------------------------------------------------------------
def init_params(key, C, hidden):
    ks = jax.random.split(key, 12)
    s = 0.02
    f32 = jnp.float32
    return {
        # temporal branch
        "t_ln_g": jnp.ones((1, C), f32), "t_ln_b": jnp.zeros((1, C), f32),
        "t_wqkv": (jax.random.normal(ks[0], (C, 3 * C)) * s).astype(f32),
        "t_wproj": (jax.random.normal(ks[1], (C, C)) * s).astype(f32),
        "t_bproj": (jax.random.normal(ks[2], (1, C)) * s).astype(f32),
        "tfc_w": (jax.random.normal(ks[3], (C, C)) * s).astype(f32),
        "tfc_b": (jax.random.normal(ks[4], (1, C)) * s).astype(f32),
        # spatial branch
        "s_ln_g": jnp.ones((1, C), f32), "s_ln_b": jnp.zeros((1, C), f32),
        "s_wqkv": (jax.random.normal(ks[5], (C, 3 * C)) * s).astype(f32),
        "s_wproj": (jax.random.normal(ks[6], (C, C)) * s).astype(f32),
        "s_bproj": (jax.random.normal(ks[7], (1, C)) * s).astype(f32),
        # mlp branch
        "n2_g": jnp.ones((1, C), f32), "n2_b": jnp.zeros((1, C), f32),
        "fc1_w": (jax.random.normal(ks[8], (C, hidden)) * s).astype(f32),
        "fc1_b": (jax.random.normal(ks[9], (1, hidden)) * s).astype(f32),
        "fc2_w": (jax.random.normal(ks[10], (hidden, C)) * s).astype(f32),
        "fc2_b": (jax.random.normal(ks[11], (1, C)) * s).astype(f32),
    }


if __name__ == "__main__":
    B, T, H, W = 2, 8, 4, 2          # tokens N = H*W*T = 64 (temporal N=8, spatial N=8)
    C, num_heads = 32, 4             # head_dim = 8
    hidden = int(C * 4.0)

    key = jax.random.PRNGKey(0)
    kx, kp = jax.random.split(key)
    x = jax.random.normal(kx, (B, H * W * T, C), dtype=jnp.float32)
    params = init_params(kp, C, hidden)

    out = jax.block_until_ready(block_forward(x, params, B, T, W, num_heads))
    ref = jax.block_until_ready(reference_block(x, params, B, T, W, num_heads))

    assert out.shape == (B, H * W * T, C)
    err = float(jnp.max(jnp.abs(out - ref)))
    # bf16 matmul operands / intermediates + approx reciprocal => loose tolerance
    assert err < 2e-2, err
    print("KERNEL_OK")
</pallas_src>

<mosaic_0001>
module attributes {stable_mosaic.version = 11 : i64} {
  func.func @temporal_kernel(%arg0: i32, %arg1: memref<16x8x32xf32, #tpu.memory_space<vmem>>, %arg2: memref<1x32xf32, #tpu.memory_space<vmem>>, %arg3: memref<1x32xf32, #tpu.memory_space<vmem>>, %arg4: memref<32x96xbf16, #tpu.memory_space<vmem>>, %arg5: memref<32x32xbf16, #tpu.memory_space<vmem>>, %arg6: memref<1x32xf32, #tpu.memory_space<vmem>>, %arg7: memref<16x8x32xbf16, #tpu.memory_space<vmem>>) attributes {dimension_semantics = [#tpu.dimension_semantics<parallel>], iteration_bounds = array<i64: 1>, scalar_prefetch = 0 : i64, scratch_operands = 0 : i64, tpu.core_type = #tpu.core_type<tc>, window_params = [{transform_indices = @transform_0, window_bounds = array<i64: 16, 8, 32>}, {pipeline_mode = #tpu.pipeline_mode<synchronous>, transform_indices = @transform_1, window_bounds = array<i64: 1, 32>}, {pipeline_mode = #tpu.pipeline_mode<synchronous>, transform_indices = @transform_2, window_bounds = array<i64: 1, 32>}, {pipeline_mode = #tpu.pipeline_mode<synchronous>, transform_indices = @transform_3, window_bounds = array<i64: 32, 96>}, {pipeline_mode = #tpu.pipeline_mode<synchronous>, transform_indices = @transform_4, window_bounds = array<i64: 32, 32>}, {pipeline_mode = #tpu.pipeline_mode<synchronous>, transform_indices = @transform_5, window_bounds = array<i64: 1, 32>}, {transform_indices = @transform_6, window_bounds = array<i64: 16, 8, 32>}]} {
    %c0 = arith.constant 0 : index
    %c0_0 = arith.constant 0 : index
    %c0_1 = arith.constant 0 : index
    %0 = vector.load %arg1[%c0, %c0_0, %c0_1] : memref<16x8x32xf32, #tpu.memory_space<vmem>>, vector<16x8x32xf32>
    %c0_2 = arith.constant 0 : index
    %c0_3 = arith.constant 0 : index
    %1 = vector.load %arg2[%c0_2, %c0_3] : memref<1x32xf32, #tpu.memory_space<vmem>>, vector<1x32xf32>
    %c0_4 = arith.constant 0 : index
    %c0_5 = arith.constant 0 : index
    %2 = vector.load %arg3[%c0_4, %c0_5] : memref<1x32xf32, #tpu.memory_space<vmem>>, vector<1x32xf32>
    %3 = vector.shape_cast %0 : vector<16x8x32xf32> to vector<128x32xf32>
    %cst = arith.constant dense<0.000000e+00> : vector<128xf32>
    %4 = vector.multi_reduction <add>, %3, %cst [1] : vector<128x32xf32> to vector<128xf32>
    %5 = vector.shape_cast %4 : vector<128xf32> to vector<128x1xf32>
    %cst_6 = arith.constant 3.200000e+01 : f32
    %6 = vector.broadcast %cst_6 : f32 to vector<128x1xf32>
    %7 = arith.divf %5, %6 : vector<128x1xf32>
    %8 = vector.broadcast %7 : vector<128x1xf32> to vector<128x32xf32>
    %9 = arith.subf %3, %8 : vector<128x32xf32>
    %10 = arith.mulf %9, %9 : vector<128x32xf32>
    %cst_7 = arith.constant dense<0.000000e+00> : vector<128xf32>
    %11 = vector.multi_reduction <add>, %10, %cst_7 [1] : vector<128x32xf32> to vector<128xf32>
    %12 = vector.shape_cast %11 : vector<128xf32> to vector<128x1xf32>
    %cst_8 = arith.constant 3.200000e+01 : f32
    %13 = vector.broadcast %cst_8 : f32 to vector<128x1xf32>
    %14 = arith.divf %12, %13 : vector<128x1xf32>
    %15 = vector.broadcast %7 : vector<128x1xf32> to vector<128x32xf32>
    %16 = arith.subf %3, %15 : vector<128x32xf32>
    %cst_9 = arith.constant 9.99999974E-6 : f32
    %17 = vector.broadcast %cst_9 : f32 to vector<128x1xf32>
    %18 = arith.addf %14, %17 : vector<128x1xf32>
    %19 = math.rsqrt %18 : vector<128x1xf32>
    %20 = vector.broadcast %19 : vector<128x1xf32> to vector<128x32xf32>
    %21 = arith.mulf %16, %20 : vector<128x32xf32>
    %22 = vector.broadcast %1 : vector<1x32xf32> to vector<128x32xf32>
    %23 = arith.mulf %21, %22 : vector<128x32xf32>
    %24 = vector.broadcast %2 : vector<1x32xf32> to vector<128x32xf32>
    %25 = arith.addf %23, %24 : vector<128x32xf32>
    %26 = arith.truncf %25 : vector<128x32xf32> to vector<128x32xbf16>
    %c0_10 = arith.constant 0 : index
    %c0_11 = arith.constant 0 : index
    %27 = vector.load %arg4[%c0_10, %c0_11] : memref<32x96xbf16, #tpu.memory_space<vmem>>, vector<32x96xbf16>
    %cst_12 = arith.constant dense<0.000000e+00> : vector<128x96xf32>
    %28 = tpu.matmul %26, %27, %cst_12 {dimension_numbers = #tpu.dot_dimension_numbers<[1], [0], [0], [1], [0, 0, 1, 1], [], []>} : vector<128x32xbf16>, vector<32x96xbf16>, vector<128x96xf32> -> vector<128x96xf32>
    %29 = vector.shape_cast %28 : vector<128x96xf32> to vector<16x8x96xf32>
    %30 = arith.truncf %29 : vector<16x8x96xf32> to vector<16x8x96xbf16>
    %31 = vector.extract_strided_slice %30 {offsets = [0, 0, 0], sizes = [16, 8, 8], strides = [1, 1, 1]} : vector<16x8x96xbf16> to vector<16x8x8xbf16>
    %32 = vector.extract_strided_slice %30 {offsets = [0, 0, 8], sizes = [16, 8, 8], strides = [1, 1, 1]} : vector<16x8x96xbf16> to vector<16x8x8xbf16>
    %33 = vector.extract_strided_slice %30 {offsets = [0, 0, 16], sizes = [16, 8, 8], strides = [1, 1, 1]} : vector<16x8x96xbf16> to vector<16x8x8xbf16>
    %34 = vector.extract_strided_slice %30 {offsets = [0, 0, 24], sizes = [16, 8, 8], strides = [1, 1, 1]} : vector<16x8x96xbf16> to vector<16x8x8xbf16>
    %35 = tpu.concatenate %31, %32, %33, %34 in 0 : vector<16x8x8xbf16>, vector<16x8x8xbf16>, vector<16x8x8xbf16>, vector<16x8x8xbf16> -> vector<64x8x8xbf16>
    %36 = vector.extract_strided_slice %30 {offsets = [0, 0, 32], sizes = [16, 8, 8], strides = [1, 1, 1]} : vector<16x8x96xbf16> to vector<16x8x8xbf16>
    %37 = vector.extract_strided_slice %30 {offsets = [0, 0, 40], sizes = [16, 8, 8], strides = [1, 1, 1]} : vector<16x8x96xbf16> to vector<16x8x8xbf16>
    %38 = vector.extract_strided_slice %30 {offsets = [0, 0, 48], sizes = [16, 8, 8], strides = [1, 1, 1]} : vector<16x8x96xbf16> to vector<16x8x8xbf16>
    %39 = vector.extract_strided_slice %30 {offsets = [0, 0, 56], sizes = [16, 8, 8], strides = [1, 1, 1]} : vector<16x8x96xbf16> to vector<16x8x8xbf16>
    %40 = tpu.concatenate %36, %37, %38, %39 in 0 : vector<16x8x8xbf16>, vector<16x8x8xbf16>, vector<16x8x8xbf16>, vector<16x8x8xbf16> -> vector<64x8x8xbf16>
    %41 = vector.extract_strided_slice %30 {offsets = [0, 0, 64], sizes = [16, 8, 8], strides = [1, 1, 1]} : vector<16x8x96xbf16> to vector<16x8x8xbf16>
    %42 = vector.extract_strided_slice %30 {offsets = [0, 0, 72], sizes = [16, 8, 8], strides = [1, 1, 1]} : vector<16x8x96xbf16> to vector<16x8x8xbf16>
    %43 = vector.extract_strided_slice %30 {offsets = [0, 0, 80], sizes = [16, 8, 8], strides = [1, 1, 1]} : vector<16x8x96xbf16> to vector<16x8x8xbf16>
    %44 = vector.extract_strided_slice %30 {offsets = [0, 0, 88], sizes = [16, 8, 8], strides = [1, 1, 1]} : vector<16x8x96xbf16> to vector<16x8x8xbf16>
    %45 = tpu.concatenate %41, %42, %43, %44 in 0 : vector<16x8x8xbf16>, vector<16x8x8xbf16>, vector<16x8x8xbf16>, vector<16x8x8xbf16> -> vector<64x8x8xbf16>
    "tpu.trace_start"() <{level = 10 : i32, message = "bnd,bmd->bnm"}> : () -> ()
    %cst_13 = arith.constant dense<0.000000e+00> : vector<64x8x8xf32>
    %46 = tpu.matmul %35, %40, %cst_13 {dimension_numbers = #tpu.dot_dimension_numbers<[2], [2], [1], [1], [0, 0, 0, 1, 1, 1], [0], [0]>} : vector<64x8x8xbf16>, vector<64x8x8xbf16>, vector<64x8x8xf32> -> vector<64x8x8xf32>
    "tpu.trace_stop"() : () -> ()
    %cst_14 = arith.constant 0.353553385 : f32
    %47 = vector.broadcast %cst_14 : f32 to vector<64x8x8xf32>
    %48 = arith.mulf %46, %47 : vector<64x8x8xf32>
    %cst_15 = arith.constant dense<0xFF800000> : vector<64x8xf32>
    %49 = vector.multi_reduction <maximumf>, %48, %cst_15 [2] : vector<64x8x8xf32> to vector<64x8xf32>
    %50 = vector.shape_cast %49 : vector<64x8xf32> to vector<64x8x1xf32>
    %51 = vector.broadcast %50 : vector<64x8x1xf32> to vector<64x8x8xf32>
    %52 = arith.subf %48, %51 : vector<64x8x8xf32>
    %53 = math.exp %52 : vector<64x8x8xf32>
    %cst_16 = arith.constant dense<0.000000e+00> : vector<64x8xf32>
    %54 = vector.multi_reduction <add>, %53, %cst_16 [2] : vector<64x8x8xf32> to vector<64x8xf32>
    %55 = vector.shape_cast %54 : vector<64x8xf32> to vector<64x8x1xf32>
    %56 = tpu.reciprocal %55 {approx = true} : vector<64x8x1xf32> -> vector<64x8x1xf32>
    %57 = vector.broadcast %56 : vector<64x8x1xf32> to vector<64x8x8xf32>
    %58 = arith.mulf %53, %57 : vector<64x8x8xf32>
    %59 = arith.truncf %58 : vector<64x8x8xf32> to vector<64x8x8xbf16>
    "tpu.trace_start"() <{level = 10 : i32, message = "bnm,bmd->bnd"}> : () -> ()
    %cst_17 = arith.constant dense<0.000000e+00> : vector<64x8x8xf32>
    %60 = tpu.matmul %59, %45, %cst_17 {dimension_numbers = #tpu.dot_dimension_numbers<[2], [1], [1], [2], [0, 0, 0, 1, 1, 2], [0], [0]>} : vector<64x8x8xbf16>, vector<64x8x8xbf16>, vector<64x8x8xf32> -> vector<64x8x8xf32>
    "tpu.trace_stop"() : () -> ()
    %61 = vector.extract_strided_slice %60 {offsets = [0, 0, 0], sizes = [16, 8, 8], strides = [1, 1, 1]} : vector<64x8x8xf32> to vector<16x8x8xf32>
    %62 = vector.extract_strided_slice %60 {offsets = [16, 0, 0], sizes = [16, 8, 8], strides = [1, 1, 1]} : vector<64x8x8xf32> to vector<16x8x8xf32>
    %63 = vector.extract_strided_slice %60 {offsets = [32, 0, 0], sizes = [16, 8, 8], strides = [1, 1, 1]} : vector<64x8x8xf32> to vector<16x8x8xf32>
    %64 = vector.extract_strided_slice %60 {offsets = [48, 0, 0], sizes = [16, 8, 8], strides = [1, 1, 1]} : vector<64x8x8xf32> to vector<16x8x8xf32>
    %65 = tpu.concatenate %61, %62, %63, %64 in 2 : vector<16x8x8xf32>, vector<16x8x8xf32>, vector<16x8x8xf32>, vector<16x8x8xf32> -> vector<16x8x32xf32>
    %66 = vector.shape_cast %65 : vector<16x8x32xf32> to vector<128x32xf32>
    %67 = arith.truncf %66 : vector<128x32xf32> to vector<128x32xbf16>
    %c0_18 = arith.constant 0 : index
    %c0_19 = arith.constant 0 : index
    %68 = vector.load %arg5[%c0_18, %c0_19] : memref<32x32xbf16, #tpu.memory_space<vmem>>, vector<32x32xbf16>
    %cst_20 = arith.constant dense<0.000000e+00> : vector<128x32xf32>
    %69 = tpu.matmul %67, %68, %cst_20 {dimension_numbers = #tpu.dot_dimension_numbers<[1], [0], [0], [1], [0, 0, 1, 1], [], []>} : vector<128x32xbf16>, vector<32x32xbf16>, vector<128x32xf32> -> vector<128x32xf32>
    %c0_21 = arith.constant 0 : index
    %c0_22 = arith.constant 0 : index
    %70 = vector.load %arg6[%c0_21, %c0_22] : memref<1x32xf32, #tpu.memory_space<vmem>>, vector<1x32xf32>
    %71 = vector.broadcast %70 : vector<1x32xf32> to vector<128x32xf32>
    %72 = arith.addf %69, %71 : vector<128x32xf32>
    %73 = vector.shape_cast %72 : vector<128x32xf32> to vector<16x8x32xf32>
    %74 = arith.truncf %73 : vector<16x8x32xf32> to vector<16x8x32xbf16>
    %c0_23 = arith.constant 0 : index
    %c0_24 = arith.constant 0 : index
    %c0_25 = arith.constant 0 : index
    %75 = vector.load %arg7[%c0_23, %c0_24, %c0_25] : memref<16x8x32xbf16, #tpu.memory_space<vmem>>, vector<16x8x32xbf16>
    tpu.vector_store %arg7[%c0_23, %c0_24, %c0_25], %74 {strides = array<i32>} : memref<16x8x32xbf16, #tpu.memory_space<vmem>>, vector<16x8x32xbf16>,
    return
  }
  func.func @transform_0(%arg0: i32) -> (i32, i32, i32) {
    %c0_i32 = arith.constant 0 : i32
    %c0_i32_0 = arith.constant 0 : i32
    %c0_i32_1 = arith.constant 0 : i32
    return %arg0, %c0_i32, %c0_i32_0 : i32, i32, i32
  }
  func.func @transform_1(%arg0: i32) -> (i32, i32) {
    %c0_i32 = arith.constant 0 : i32
    %c0_i32_0 = arith.constant 0 : i32
    %c0_i32_1 = arith.constant 0 : i32
    return %c0_i32, %c0_i32_0 : i32, i32
  }
  func.func @transform_2(%arg0: i32) -> (i32, i32) {
    %c0_i32 = arith.constant 0 : i32
    %c0_i32_0 = arith.constant 0 : i32
    %c0_i32_1 = arith.constant 0 : i32
    return %c0_i32, %c0_i32_0 : i32, i32
  }
  func.func @transform_3(%arg0: i32) -> (i32, i32) {
    %c0_i32 = arith.constant 0 : i32
    %c0_i32_0 = arith.constant 0 : i32
    %c0_i32_1 = arith.constant 0 : i32
    return %c0_i32, %c0_i32_0 : i32, i32
  }
  func.func @transform_4(%arg0: i32) -> (i32, i32) {
    %c0_i32 = arith.constant 0 : i32
    %c0_i32_0 = arith.constant 0 : i32
    %c0_i32_1 = arith.constant 0 : i32
    return %c0_i32, %c0_i32_0 : i32, i32
  }
  func.func @transform_5(%arg0: i32) -> (i32, i32) {
    %c0_i32 = arith.constant 0 : i32
    %c0_i32_0 = arith.constant 0 : i32
    %c0_i32_1 = arith.constant 0 : i32
    return %c0_i32, %c0_i32_0 : i32, i32
  }
  func.func @transform_6(%arg0: i32) -> (i32, i32, i32) {
    %c0_i32 = arith.constant 0 : i32
    %c0_i32_0 = arith.constant 0 : i32
    %c0_i32_1 = arith.constant 0 : i32
    return %arg0, %c0_i32, %c0_i32_0 : i32, i32, i32
  }
}

</mosaic_0001>

<bundles_post_ra>
// kernel: tpu_custom_call.1
= control target key start
LH: loop header
LB: loop body
LE: loop exit
PB: predicated region body
PF: predicated region fallthrough
CT: control target
= control target key end

     0   :  { %11 = vsyncpa [#allocation3], 0  ;;  %s12785_s0 = inlined_call_operand.hbm [shape: f32[16,8,32], index: 0, kind: input, shape index: {}]   ;;  %s12786_s1 = inlined_call_operand.hbm [shape: f32[1,32], index: 1, kind: input, shape index: {}]   ;;  %s12787_s2 = inlined_call_operand.hbm [shape: f32[1,32], index: 2, kind: input, shape index: {}]   ;;  %s12788_s3 = inlined_call_operand.hbm [shape: bf16[32,96], index: 3, kind: input, shape index: {}]   ;;  %s12789_s4 = inlined_call_operand.hbm [shape: bf16[32,32], index: 4, kind: input, shape index: {}]   ;;  %s12790_s5 = inlined_call_operand.hbm [shape: f32[1,32], index: 5, kind: input, shape index: {}]   ;;  %s12791_s6 = inlined_call_operand.hbm [shape: bf16[16,8,32], index: 6, kind: output, shape index: {}]  }
   0x1   :  { %12 = vsyncpa [#allocation6], 0 }
   0x2   :  { %13 = vsyncpa [#allocation9], 0 }
   0x3   :  { %14 = vsyncpa [#allocation12], 0 }
   0x4   :  { %15 = vsyncpa [#allocation4], 0  ;;  %s9905_s21 = smov [#allocation5]   ;;  %s9906_s23 = smov [#allocation8]  }
   0x5   :  { %s34_s22 = sshll.u32 %s9905_s21, 4  ;;  %s53_s24 = sshll.u32 %s9906_s23, 4  ;;  %s35_s22 = int_to_ptr.vmem [resolvable:$true] %s34_s22  ;;  %s9959_s24 = int_to_ptr.vmem [resolvable:$true] %s53_s24 }
   0x6   :  { %s9741_s27 = scalar_lea.hbm %s12786_s1, 16 }
   0x7   :  { %p9742_p0 = scmp.ne.s32.totalorder %s12786_s1, %s9741_s27  ;;  %p9745_p1 = scmp.lt.u32.totalorder %s9741_s27, %s12786_s1 }
   0x9   :  { %p9747_p2 = pnand %p9745_p1, %p9742_p0 }
   0xb   :  { %9750 = shalt.err (!%p9747_p2)
}
   0xc   :  { %s9751_s8 = scalar_lea.vmem %s35_s22, 16  ;;  %s9755_s9 = scalar_lea.vmem %s35_s22, 32 }
   0xd   :  { %p9752_p3 = scmp.ne.s32.totalorder %s35_s22, %s9751_s8  ;;  %p9756_p4 = scmp.lt.s32.totalorder %s35_s22, %s35_s22 }
   0xe   :  { %p9757_p5 = scmp.lt.s32.totalorder %s9755_s9, %s9751_s8 }
  0x10   :  { %p9758_p6 = por %p9757_p5, %p9756_p4 }
  0x12   :  { %p9759_p7 = pnand %p9758_p6, %p9752_p3 }
  0x14   :  { %9762 = shalt.err (!%p9759_p7)
}
  0x15   :  { %37 = dma.hbm_to_vmem [thread:$0]  %s12786_s1, 16, %s35_s22, [#allocation6]  }
  0x16   :  { %s9763_s14 = scalar_lea.hbm %s12788_s3, 256 }
  0x17   :  { %p9764_p8 = scmp.ne.s32.totalorder %s12788_s3, %s9763_s14  ;;  %p9767_p9 = scmp.lt.u32.totalorder %s9763_s14, %s12788_s3 }
  0x19   :  { %p9769_p10 = pnand %p9767_p9, %p9764_p8 }
  0x1b   :  { %9772 = shalt.err (!%p9769_p10)
}
  0x1c   :  { %s9773_s19 = scalar_lea.vmem %s9959_s24, 256  ;;  %p9778_p12 = scmp.lt.s32.totalorder %s9959_s24, %s9959_s24 }
  0x1d   :  { %p9774_p11 = scmp.ne.s32.totalorder %s9959_s24, %s9773_s19  ;;  %p9779_p13 = scmp.lt.s32.totalorder %s9773_s19, %s9773_s19 }
  0x1f   :  { %p9780_p0 = por %p9779_p13, %p9778_p12 }
  0x21   :  { %p9781_p1 = pnand %p9780_p0, %p9774_p11 }
  0x23   :  { %9784 = shalt.err (!%p9781_p1)
}
  0x24   :  { %s9907_s1 = smov 64   ;;  %s9908_s20 = smov 4  }
  0x25   :  { %59 = dma.hbm_to_vmem [thread:$0]  %s12788_s3, 256, %s9959_s24, [#allocation9], %s9907_s1, %s9907_s1, %s9908_s20  }
  0x26   :  { %s9909_s23 = smov [#allocation2]   ;;  %s9785_s28 = scalar_lea.hbm %s12785_s0, 2048 }
  0x27   :  { %s21_s25 = sshll.u32 %s9909_s23, 4  ;;  %p9786_p2 = scmp.ne.s32.totalorder %s12785_s0, %s9785_s28  ;;  %s22_s25 = int_to_ptr.vmem [resolvable:$true] %s21_s25 }
  0x28   :  { %p9789_p3 = scmp.lt.u32.totalorder %s9785_s28, %s12785_s0 }
  0x2a   :  { %p9791_p4 = pnand %p9789_p3, %p9786_p2 }
  0x2c   :  { %9794 = shalt.err (!%p9791_p4)
}
  0x2d   :  { %s9795_s9 = scalar_lea.vmem %s22_s25, 2048  ;;  %p9800_p6 = scmp.lt.s32.totalorder %s22_s25, %s22_s25 }
  0x2e   :  { %p9796_p5 = scmp.ne.s32.totalorder %s22_s25, %s9795_s9  ;;  %p9801_p7 = scmp.lt.s32.totalorder %s9795_s9, %s9795_s9 }
  0x30   :  { %p9802_p8 = por %p9801_p7, %p9800_p6 }
  0x32   :  { %p9803_p9 = pnand %p9802_p8, %p9796_p5 }
  0x34   :  { %9806 = shalt.err (!%p9803_p9)
}
  0x35   :  { %s9910_s3 = smov 128   ;;  %s9911_s24 = smov 8  }
  0x36   :  { %27 = dma.hbm_to_vmem [thread:$0]  %s12785_s0, 2048, %s22_s25, [#allocation3], %s9910_s3, %s9910_s3, %s9911_s24  }
  0x37   :  { %s9912_s12 = smov [#allocation7]   ;;  %s9913_s14 = smov [#allocation10]  }
  0x38   :  { %s44_s13 = sshll.u32 %s9912_s12, 4  ;;  %s65_s15 = sshll.u32 %s9913_s14, 4  ;;  %s45_s13 = int_to_ptr.vmem [resolvable:$true] %s44_s13  ;;  %s66_s15 = int_to_ptr.vmem [resolvable:$true] %s65_s15 }
  0x39   :  { %s9807_s18 = scalar_lea.hbm %s12787_s2, 16 }
  0x3a   :  { %p9808_p10 = scmp.ne.s32.totalorder %s12787_s2, %s9807_s18  ;;  %p9811_p11 = scmp.lt.u32.totalorder %s9807_s18, %s12787_s2 }
  0x3c   :  { %p9813_p12 = pnand %p9811_p11, %p9808_p10 }
  0x3e   :  { %9816 = shalt.err (!%p9813_p12)
}
  0x3f   :  { %s9817_s0 = scalar_lea.vmem %s45_s13, 16  ;;  %s9821_s25 = scalar_lea.vmem %s45_s13, 32 }
  0x40   :  { %p9818_p13 = scmp.ne.s32.totalorder %s45_s13, %s9817_s0  ;;  %p9822_p0 = scmp.lt.s32.totalorder %s45_s13, %s45_s13 }
  0x41   :  { %p9823_p1 = scmp.lt.s32.totalorder %s9821_s25, %s9817_s0 }
  0x43   :  { %p9824_p2 = por %p9823_p1, %p9822_p0 }
  0x45   :  { %p9825_p3 = pnand %p9824_p2, %p9818_p13 }
  0x47   :  { %9828 = shalt.err (!%p9825_p3)
}
  0x48   :  { %47 = dma.hbm_to_vmem [thread:$0]  %s12787_s2, 16, %s45_s13, [#allocation6]  }
  0x49   :  { %s9829_s30 = scalar_lea.hbm %s12789_s4, 256 }
  0x4a   :  { %p9830_p4 = scmp.ne.s32.totalorder %s12789_s4, %s9829_s30  ;;  %p9833_p5 = scmp.lt.u32.totalorder %s9829_s30, %s12789_s4 }
  0x4c   :  { %p9835_p6 = pnand %p9833_p5, %p9830_p4 }
  0x4e   :  { %9838 = shalt.err (!%p9835_p6)
}
  0x4f   :  { %s9839_s10 = scalar_lea.vmem %s66_s15, 256  ;;  %p9844_p8 = scmp.lt.s32.totalorder %s66_s15, %s66_s15 }
  0x50   :  { %p9840_p7 = scmp.ne.s32.totalorder %s66_s15, %s9839_s10  ;;  %p9845_p9 = scmp.lt.s32.totalorder %s9839_s10, %s9839_s10 }
  0x52   :  { %p9846_p10 = por %p9845_p9, %p9844_p8 }
  0x54   :  { %p9847_p11 = pnand %p9846_p10, %p9840_p7 }
  0x56   :  { %9850 = shalt.err (!%p9847_p11)
}
  0x57   :  { %71 = dma.hbm_to_vmem [thread:$0]  %s12789_s4, 256, %s66_s15, [#allocation9], %s9907_s1, %s9907_s1, %s9908_s20  }
  0x58   :  { %s9914_s12 = smov [#allocation11]   ;;  %s9851_s17 = scalar_lea.hbm %s12790_s5, 16 }
  0x59   :  { %s78_s13 = sshll.u32 %s9914_s12, 4  ;;  %p9852_p12 = scmp.ne.s32.totalorder %s12790_s5, %s9851_s17  ;;  %s79_s13 = int_to_ptr.vmem [resolvable:$true] %s78_s13 }
  0x5a   :  { %p9855_p13 = scmp.lt.u32.totalorder %s9851_s17, %s12790_s5 }
  0x5c   :  { %p9857_p0 = pnand %p9855_p13, %p9852_p12 }
  0x5e   :  { %9860 = shalt.err (!%p9857_p0)
}
  0x5f   :  { %s9861_s23 = scalar_lea.vmem %s79_s13, 16  ;;  %s9865_s4 = scalar_lea.vmem %s79_s13, 32 }
  0x60   :  { %p9862_p1 = scmp.ne.s32.totalorder %s79_s13, %s9861_s23  ;;  %p9866_p2 = scmp.lt.s32.totalorder %s79_s13, %s79_s13 }
  0x61   :  { %p9867_p3 = scmp.lt.s32.totalorder %s9865_s4, %s9861_s23 }
  0x63   :  { %p9868_p4 = por %p9867_p3, %p9866_p2 }
  0x65   :  { %p9869_p5 = pnand %p9868_p4, %p9862_p1 }
  0x67   :  { %9872 = shalt.err (!%p9869_p5)
}
  0x68   :  { %81 = dma.hbm_to_vmem [thread:$0]  %s12790_s5, 16, %s79_s13, [#allocation12]  }
  0x69   :  { %9895 = dma.done.wait [#allocation3], 2048  }
  0x6a   :  { %9896 = vsyncadd [#allocation3], 4294965248 }
  0x6b   :  { %9897 = dma.done.wait [#allocation6], 32  }
  0x6c   :  { %9898 = vsyncadd [#allocation6], 4294967264 }
  0x6d   :  { %9899 = dma.done.wait [#allocation9], 512  }
  0x6e   :  { %9900 = vsyncadd [#allocation9], 4294966784 }
  0x6f   :  { %9901 = dma.done.wait [#allocation12], 16  }
  0x70   :  { %9902 = vsyncadd [#allocation12], 4294967280  ;;  %vm119_vm0 = vcmask 261120   ;;  %v101_v0 = vld [vmem:[#allocation2] sm:$0xff]  ;;  %v103_v1 = vld [vmem:[#allocation2 + $0x10] sm:$0xff]  ;;  %s9915_s5 = smov 120  }
  0x71   :  { %v102_v2 = vld [vmem:[#allocation2 + $0x8] sm:$0xff]  ;;  %v120_v3 = vsel %vm119_vm0, %v101_v0, 0.0  ;;  %v126_v4 = vsel %vm119_vm0, %v103_v1, 0.0  ;;  %v104_v5 = vld [vmem:[#allocation2 + $0x18] sm:$0xff]  ;;  %v10047_v6 = vld [vmem:[#allocation2 + $0x20] sm:$0xff]  ;;  %s9916_s25 = smov 96  }
  0x72   :  { %121 = vadd.xlane.f32.xlu0 %v120_v3  ;;  %127 = vadd.xlane.f32.xlu1 %v126_v4  ;;  %v123_v7 = vsel %vm119_vm0, %v102_v2, 0.0  ;;  %v129_v8 = vsel %vm119_vm0, %v104_v5, 0.0  ;;  %v106_v9 = vld [vmem:[#allocation2 + $0x28] sm:$0xff]  ;;  %v132_v10 = vsel %vm119_vm0, %v10047_v6, 0.0  ;;  %v10054_v12 = vld [vmem:[#allocation2 + $0x30] sm:$0xff]  ;;  %v10056_v13 = vld [vmem:[#allocation2 + $0x38] sm:$0xff] }
  0x73   :  { %v135_v11 = vsel %vm119_vm0, %v106_v9, 0.0  ;;  %v138_v14 = vsel %vm119_vm0, %v10054_v12, 0.0  ;;  %v141_v15 = vsel %vm119_vm0, %v10056_v13, 0.0  ;;  %v10062_v16 = vld [vmem:[#allocation2 + $0x40] sm:$0xff]  ;;  %v10064_v17 = vld [vmem:[#allocation2 + $0x48] sm:$0xff]  ;;  %v10070_v20 = vld [vmem:[#allocation2 + $0x50] sm:$0xff] }
  0x74   :  { %v144_v18 = vsel %vm119_vm0, %v10062_v16, 0.0  ;;  %v147_v19 = vsel %vm119_vm0, %v10064_v17, 0.0  ;;  %v10072_v21 = vld [vmem:[#allocation2 + $0x58] sm:$0xff]  ;;  %v150_v22 = vsel %vm119_vm0, %v10070_v20, 0.0  ;;  %v10078_v24 = vld [vmem:[#allocation2 + $0x60] sm:$0xff]  ;;  %v10080_v25 = vld [vmem:[#allocation2 + $0x68] sm:$0xff] }
  0x75   :  { %v153_v23 = vsel %vm119_vm0, %v10072_v21, 0.0  ;;  %v156_v26 = vsel %vm119_vm0, %v10078_v24, 0.0  ;;  %v159_v27 = vsel %vm119_vm0, %v10080_v25, 0.0  ;;  %v10086_v28 = vld [vmem:[#allocation2 + $0x70] sm:$0xff]  ;;  %v10088_v29 = vld [vmem:[#allocation2 + $0x78] sm:$0xff]  ;;  %s9917_s26 = smov 112  }
  0x76   :  { %124 = vadd.xlane.f32.xlu0 %v123_v7  ;;  %130 = vadd.xlane.f32.xlu1 %v129_v8  ;;  %v162_v30 = vsel %vm119_vm0, %v10086_v28, 0.0  ;;  %v165_v31 = vsel %vm119_vm0, %v10088_v29, 0.0  ;;  %s9918_s27 = smov 104   ;;  %vm9920_vm1 = vmmov 0   ;;  %vm648_vm2 = vcmask 64512   ;;  %s9921_s28 = smov 16  }
  0x77   :  { %vm4556_vm3 = vcmask 1043456   ;;  %s9922_s29 = smov 24   ;;  %vm7832_vm4 = vcmask 130048   ;;  %vm7849_vm5 = vcmask 195584   ;;  %vm8034_vm6 = vcmask 257024  }
  0x7a   :  { %133 = vadd.xlane.f32.xlu0 %v132_v10  ;;  %136 = vadd.xlane.f32.xlu1 %v135_v11 }
  0x7e   :  { %139 = vadd.xlane.f32.xlu0 %v138_v14  ;;  %142 = vadd.xlane.f32.xlu1 %v141_v15 }
  0x82   :  { %145 = vadd.xlane.f32.xlu0 %v144_v18  ;;  %148 = vadd.xlane.f32.xlu1 %v147_v19 }
  0x86   :  { %151 = vadd.xlane.f32.xlu0 %v150_v22  ;;  %154 = vadd.xlane.f32.xlu1 %v153_v23 }
  0x8a   :  { %157 = vadd.xlane.f32.xlu0 %v156_v26  ;;  %160 = vadd.xlane.f32.xlu1 %v159_v27 }
  0x8e   :  { %163 = vadd.xlane.f32.xlu0 %v162_v30  ;;  %166 = vadd.xlane.f32.xlu1 %v165_v31 }
  0xff   :  { %v122_v32 = vpop.xlane.xlu0 %121  ;;  %v128_v33 = vpop.xlane.xlu1 %127 }
 0x100   :  { %v169_v34 = vmul.f32 0.03125, %v122_v32  ;;  %v171_v35 = vmul.f32 0.03125, %v128_v33 }
 0x102   :  { %v10094_v36 = vsub.f32 %v101_v0, %v169_v34  ;;  %v10096_v37 = vsub.f32 %v103_v1, %v171_v35 }
 0x103   :  { %v125_v38 = vpop.xlane.xlu0 %124  ;;  %v131_v39 = vpop.xlane.xlu1 %130 }
 0x104   :  { %v170_v40 = vmul.f32 0.03125, %v125_v38  ;;  %v172_v41 = vmul.f32 0.03125, %v131_v39  ;;  %v201_v42 = vmul.f32 %v10094_v36, %v10094_v36  ;;  %v203_v43 = vmul.f32 %v10096_v37, %v10096_v37 }
 0x106   :  { %v10102_v44 = vsub.f32 %v102_v2, %v170_v40  ;;  %v10104_v45 = vsub.f32 %v104_v5, %v172_v41  ;;  %v217_v46 = vsel %vm119_vm0, %v201_v42, 0.0  ;;  %v223_v49 = vsel %vm119_vm0, %v203_v43, 0.0 }
 0x107   :  { %218 = vadd.xlane.f32.xlu0 %v217_v46  ;;  %v134_v47 = vpop.xlane.xlu0 %133  ;;  %v137_v48 = vpop.xlane.xlu1 %136 }
 0x108   :  { %v173_v50 = vmul.f32 0.03125, %v134_v47  ;;  %v174_v51 = vmul.f32 0.03125, %v137_v48  ;;  %v202_v52 = vmul.f32 %v10102_v44, %v10102_v44  ;;  %v204_v53 = vmul.f32 %v10104_v45, %v10104_v45 }
 0x10a   :  { %v10113_v54 = vsub.f32 %v10047_v6, %v173_v50  ;;  %v10115_v55 = vsub.f32 %v106_v9, %v174_v51  ;;  %v220_v56 = vsel %vm119_vm0, %v202_v52, 0.0  ;;  %v226_v59 = vsel %vm119_vm0, %v204_v53, 0.0  ;;  %v9450_v53 = vld [vmem:[#allocation8 + $0x8] sm:$0xff]  }
 0x10b   :  { %224 = vadd.xlane.f32.xlu0 %v223_v49  ;;  %221 = vadd.xlane.f32.xlu1 %v220_v56  ;;  %v140_v57 = vpop.xlane.xlu0 %139  ;;  %v143_v58 = vpop.xlane.xlu1 %142 }
 0x10c   :  { %v175_v60 = vmul.f32 0.03125, %v140_v57  ;;  %v176_v61 = vmul.f32 0.03125, %v143_v58  ;;  %v205_v62 = vmul.f32 %v10113_v54, %v10113_v54  ;;  %v206_v63 = vmul.f32 %v10115_v55, %v10115_v55 }
 0x10e   :  { %v10124_v0 = vsub.f32 %v10054_v12, %v175_v60  ;;  %v10127_v1 = vsub.f32 %v10056_v13, %v176_v61  ;;  %v229_v2 = vsel %vm119_vm0, %v205_v62, 0.0  ;;  %v232_v5 = vsel %vm119_vm0, %v206_v63, 0.0 }
 0x10f   :  { %227 = vadd.xlane.f32.xlu1 %v226_v59  ;;  %230 = vadd.xlane.f32.xlu0 %v229_v2  ;;  %v146_v3 = vpop.xlane.xlu0 %145  ;;  %v149_v4 = vpop.xlane.xlu1 %148 }
 0x110   :  { %v177_v6 = vmul.f32 0.03125, %v146_v3  ;;  %v178_v7 = vmul.f32 0.03125, %v149_v4  ;;  %v207_v8 = vmul.f32 %v10124_v0, %v10124_v0  ;;  %v208_v9 = vmul.f32 %v10127_v1, %v10127_v1 }
 0x112   :  { %v10136_v10 = vsub.f32 %v10062_v16, %v177_v6  ;;  %v10139_v11 = vsub.f32 %v10064_v17, %v178_v7  ;;  %v235_v12 = vsel %vm119_vm0, %v207_v8, 0.0  ;;  %v238_v15 = vsel %vm119_vm0, %v208_v9, 0.0 }
 0x113   :  { %233 = vadd.xlane.f32.xlu1 %v232_v5  ;;  %236 = vadd.xlane.f32.xlu0 %v235_v12  ;;  %v152_v13 = vpop.xlane.xlu0 %151  ;;  %v155_v14 = vpop.xlane.xlu1 %154 }
 0x114   :  { %v179_v18 = vmul.f32 0.03125, %v152_v13  ;;  %v180_v19 = vmul.f32 0.03125, %v155_v14  ;;  %v209_v22 = vmul.f32 %v10136_v10, %v10136_v10  ;;  %v210_v16 = vmul.f32 %v10139_v11, %v10139_v11 }
 0x116   :  { %v10148_v23 = vsub.f32 %v10070_v20, %v179_v18  ;;  %v10151_v17 = vsub.f32 %v10072_v21, %v180_v19  ;;  %v241_v26 = vsel %vm119_vm0, %v209_v22, 0.0  ;;  %v244_v31 = vsel %vm119_vm0, %v210_v16, 0.0 }
 0x117   :  { %239 = vadd.xlane.f32.xlu1 %v238_v15  ;;  %242 = vadd.xlane.f32.xlu0 %v241_v26  ;;  %v158_v27 = vpop.xlane.xlu0 %157  ;;  %v161_v30 = vpop.xlane.xlu1 %160 }
 0x118   :  { %v181_v32 = vmul.f32 0.03125, %v158_v27  ;;  %v182_v33 = vmul.f32 0.03125, %v161_v30  ;;  %v211_v34 = vmul.f32 %v10148_v23, %v10148_v23  ;;  %v212_v20 = vmul.f32 %v10151_v17, %v10151_v17 }
 0x11a   :  { %v10160_v35 = vsub.f32 %v10078_v24, %v181_v32  ;;  %v10163_v21 = vsub.f32 %v10080_v25, %v182_v33  ;;  %v247_v38 = vsel %vm119_vm0, %v211_v34, 0.0  ;;  %v250_v41 = vsel %vm119_vm0, %v212_v20, 0.0 }
 0x11b   :  { %245 = vadd.xlane.f32.xlu1 %v244_v31  ;;  %248 = vadd.xlane.f32.xlu0 %v247_v38  ;;  %v164_v39 = vpop.xlane.xlu0 %163  ;;  %v167_v40 = vpop.xlane.xlu1 %166  ;;  %v10186_v31 = vld [vmem:[#allocation5] ss:$0 sm:$0xff] }
 0x11c   :  { %v183_v42 = vmul.f32 0.03125, %v164_v39  ;;  %v184_v43 = vmul.f32 0.03125, %v167_v40  ;;  %v213_v46 = vmul.f32 %v10160_v35, %v10160_v35  ;;  %v214_v24 = vmul.f32 %v10163_v21, %v10163_v21 }
 0x11e   :  { %v10172_v47 = vsub.f32 %v10086_v28, %v183_v42  ;;  %v10175_v25 = vsub.f32 %v10088_v29, %v184_v43  ;;  %v253_v48 = vsel %vm119_vm0, %v213_v46, 0.0  ;;  %v256_v49 = vsel %vm119_vm0, %v214_v24, 0.0  ;;  %v9449_v29 = vld [vmem:[#allocation8] sm:$0xff]  }
 0x11f   :  { %251 = vadd.xlane.f32.xlu1 %v250_v41  ;;  %254 = vadd.xlane.f32.xlu0 %v253_v48 }
 0x120   :  { %v215_v50 = vmul.f32 %v10172_v47, %v10172_v47  ;;  %v216_v51 = vmul.f32 %v10175_v25, %v10175_v25  ;;  %8498 = vmatprep.subr.bf16.mxu0 %v9449_v29  ;;  %9306 = vmatprep.subr.bf16.mxu1 %v9449_v29 }
 0x121   :  { %8499 = vmatpush3.bf16.msra.mxu0 %v9449_v29  ;;  %9308 = vmatpush3.bf16.msra.mxu1 %v9449_v29 }
 0x122   :  { %v259_v52 = vsel %vm119_vm0, %v215_v50, 0.0  ;;  %v262_v28 = vsel %vm119_vm0, %v216_v51, 0.0  ;;  %8500 = vmatprep.subr.bf16.mxu0 %v9450_v53  ;;  %9307 = vmatprep.subr.bf16.mxu1 %v9450_v53 }
 0x123   :  { %257 = vadd.xlane.f32.xlu1 %v256_v49  ;;  %260 = vadd.xlane.f32.xlu0 %v259_v52 }
 0x125   :  { %8501 = vmatpush3.bf16.msra.mxu0 %v9450_v53  ;;  %9309 = vmatpush3.bf16.msra.mxu1 %v9450_v53 }
 0x127   :  { %263 = vadd.xlane.f32.xlu1 %v262_v28 }
 0x194   :  { %v219_v56 = vpop.xlane.xlu0 %218 }
 0x195   :  { %v265_v57 = vmul.f32 0.03125, %v219_v56 }
 0x197   :  { %v281_v58 = vadd.f32 1e-05, %v265_v57 }
 0x198   :  { %v222_v59 = vpop.xlane.xlu1 %221  ;;  %v225_v60 = vpop.xlane.xlu0 %224 }
 0x199   :  { %9453 = vrsqrt.f32 %v281_v58  ;;  %v266_v61 = vmul.f32 0.03125, %v222_v59  ;;  %v267_v62 = vmul.f32 0.03125, %v225_v60 }
 0x19b   :  { %v282_v63 = vadd.f32 1e-05, %v266_v61  ;;  %v283_v2 = vadd.f32 1e-05, %v267_v62 }
 0x19c   :  { %v228_v3 = vpop.xlane.xlu1 %227  ;;  %v231_v4 = vpop.xlane.xlu0 %230 }
 0x19d   :  { %9455 = vrsqrt.f32 %v282_v63  ;;  %v268_v5 = vmul.f32 0.03125, %v228_v3  ;;  %v269_v6 = vmul.f32 0.03125, %v231_v4 }
 0x19e   :  { %9457 = vrsqrt.f32 %v283_v2 }
 0x19f   :  { %v284_v7 = vadd.f32 1e-05, %v268_v5  ;;  %v285_v8 = vadd.f32 1e-05, %v269_v6 }
 0x1a0   :  { %v234_v9 = vpop.xlane.xlu1 %233  ;;  %v237_v12 = vpop.xlane.xlu0 %236 }
 0x1a1   :  { %9459 = vrsqrt.f32 %v284_v7  ;;  %v270_v13 = vmul.f32 0.03125, %v234_v9  ;;  %v271_v14 = vmul.f32 0.03125, %v237_v12 }
 0x1a2   :  { %9461 = vrsqrt.f32 %v285_v8 }
 0x1a3   :  { %v9454_v15 = vpop.eup %9453  ;;  %v286_v18 = vadd.f32 1e-05, %v270_v13  ;;  %v287_v19 = vadd.f32 1e-05, %v271_v14 }
 0x1a4   :  { %v240_v22 = vpop.xlane.xlu1 %239  ;;  %v243_v16 = vpop.xlane.xlu0 %242  ;;  %v313_v26 = vmul.f32 %v9454_v15, %v10094_v36  ;;  %v10190_v36 = vld [vmem:[#allocation7] ss:$0 sm:$0xff] }
 0x1a5   :  { %9463 = vrsqrt.f32 %v286_v18  ;;  %v272_v27 = vmul.f32 0.03125, %v240_v22  ;;  %v273_v30 = vmul.f32 0.03125, %v243_v16 }
 0x1a6   :  { %9465 = vrsqrt.f32 %v287_v19  ;;  %v335_v41 = vmul.f32 %v10186_v31, %v313_v26 }
 0x1a7   :  { %v9456_v32 = vpop.eup %9455  ;;  %v288_v33 = vadd.f32 1e-05, %v272_v27  ;;  %v289_v34 = vadd.f32 1e-05, %v273_v30 }
 0x1a8   :  { %v9458_v20 = vpop.eup %9457  ;;  %v246_v38 = vpop.xlane.xlu1 %245  ;;  %v314_v40 = vmul.f32 %v9456_v32, %v10102_v44  ;;  %v357_v44 = vadd.f32 %v10190_v36, %v335_v41 }
 0x1a9   :  { %v249_v39 = vpop.xlane.xlu0 %248  ;;  %9467 = vrsqrt.f32 %v288_v33  ;;  %v274_v42 = vmul.f32 0.03125, %v246_v38  ;;  %v315_v46 = vmul.f32 %v9458_v20, %v10096_v37 }
 0x1aa   :  { %v275_v43 = vmul.f32 0.03125, %v249_v39  ;;  %9469 = vrsqrt.f32 %v289_v34  ;;  %v336_v24 = vmul.f32 %v10186_v31, %v314_v40 }
 0x1ab   :  { %v9460_v48 = vpop.eup %9459  ;;  %v290_v49 = vadd.f32 1e-05, %v274_v42  ;;  %v337_v56 = vmul.f32 %v10186_v31, %v315_v46 }
 0x1ac   :  { %v291_v50 = vadd.f32 1e-05, %v275_v43  ;;  %v9462_v51 = vpop.eup %9461  ;;  %v252_v52 = vpop.xlane.xlu1 %251  ;;  %v358_v29 = vadd.f32 %v10190_v36, %v336_v24  ;;  %v316_v53 = vmul.f32 %v9460_v48, %v10104_v45 }
 0x1ad   :  { %v255_v28 = vpop.xlane.xlu0 %254  ;;  %9471 = vrsqrt.f32 %v290_v49  ;;  %v276_v57 = vmul.f32 0.03125, %v252_v52  ;;  %v317_v60 = vmul.f32 %v9462_v51, %v10113_v54  ;;  %v359_v45 = vadd.f32 %v10190_v36, %v337_v56 }
 0x1ae   :  { %v277_v37 = vmul.f32 0.03125, %v255_v28  ;;  %9473 = vrsqrt.f32 %v291_v50  ;;  %v373_v58 = vpack.c.bf16 %v358_v29, %v357_v44  ;;  %v338_v59 = vmul.f32 %v10186_v31, %v316_v53 }
 0x1af   :  { %v9464_v61 = vpop.eup %9463  ;;  %v292_v62 = vadd.f32 1e-05, %v276_v57  ;;  %v339_v7 = vmul.f32 %v10186_v31, %v317_v60 }
 0x1b0   :  { %v293_v63 = vadd.f32 1e-05, %v277_v37  ;;  %v9466_v2 = vpop.eup %9465  ;;  %v258_v3 = vpop.xlane.xlu1 %257  ;;  %8502 = vmatprep.mubr.msk.bf16.mxu0 %vm119_vm0, %v373_v58  ;;  %v360_v5 = vadd.f32 %v10190_v36, %v338_v59  ;;  %v318_v6 = vmul.f32 %v9464_v61, %v10115_v55 }
 0x1b1   :  { %v261_v4 = vpop.xlane.xlu0 %260  ;;  %9475 = vrsqrt.f32 %v292_v62  ;;  %v278_v8 = vmul.f32 0.03125, %v258_v3  ;;  %v319_v54 = vmul.f32 %v9466_v2, %v10124_v0  ;;  %v361_v55 = vadd.f32 %v10190_v36, %v339_v7 }
 0x1b2   :  { %v279_v9 = vmul.f32 0.03125, %v261_v4  ;;  %9477 = vrsqrt.f32 %v293_v63  ;;  %v374_v12 = vpack.c.bf16 %v360_v5, %v359_v45  ;;  %v340_v13 = vmul.f32 %v10186_v31, %v318_v6 }
 0x1b3   :  { %v9468_v14 = vpop.eup %9467  ;;  %v294_v15 = vadd.f32 1e-05, %v278_v8  ;;  %v341_v27 = vmul.f32 %v10186_v31, %v319_v54 }
 0x1b4   :  { %v295_v18 = vadd.f32 1e-05, %v279_v9  ;;  %v9470_v19 = vpop.eup %9469  ;;  %v264_v22 = vpop.xlane.xlu1 %263  ;;  %8503 = vmatmul.mubr.msk.bf16.vlgmr.msra.gmra.mrb[0].mxu0 %vm119_vm0, %v374_v12  ;;  %v362_v16 = vadd.f32 %v10190_v36, %v340_v13  ;;  %v320_v26 = vmul.f32 %v9468_v14, %v10127_v1 }
 0x1b5   :  { %9479 = vrsqrt.f32 %v294_v15  ;;  %v280_v0 = vmul.f32 0.03125, %v264_v22  ;;  %v321_v30 = vmul.f32 %v9470_v19, %v10136_v10  ;;  %v363_v39 = vadd.f32 %v10190_v36, %v341_v27 }
 0x1b6   :  { %9481 = vrsqrt.f32 %v295_v18  ;;  %v375_v32 = vpack.c.bf16 %v362_v16, %v361_v55  ;;  %v342_v33 = vmul.f32 %v10186_v31, %v320_v26  ;;  %v12792_v27 = vmov 0.0  }
 0x1b7   :  { %v9472_v34 = vpop.eup %9471  ;;  %v296_v20 = vadd.f32 1e-05, %v280_v0  ;;  %v343_v41 = vmul.f32 %v10186_v31, %v321_v30  ;;  %8518 = vmatprep.subr.bf16.mxu1 %v12792_v27  ;;  %8542 = vmatprep.subr.bf16.mxu0 %v12792_v27 }
 0x1b8   :  { %v9474_v38 = vpop.eup %9473  ;;  %8506 = vmatprep.mubr.msk.bf16.mxu0 %vm119_vm0, %v375_v32  ;;  %v364_v40 = vadd.f32 %v10190_v36, %v342_v33  ;;  %v322_v1 = vmul.f32 %v9472_v34, %v10139_v11 }
 0x1b9   :  { %9483 = vrsqrt.f32 %v296_v20  ;;  %v323_v10 = vmul.f32 %v9474_v38, %v10148_v23  ;;  %v365_v48 = vadd.f32 %v10190_v36, %v343_v41 }
 0x1ba   :  { %v376_v42 = vpack.c.bf16 %v364_v40, %v363_v39  ;;  %v344_v43 = vmul.f32 %v10186_v31, %v322_v1 }
 0x1bb   :  { %v9476_v46 = vpop.eup %9475  ;;  %v345_v11 = vmul.f32 %v10186_v31, %v323_v10 }
 0x1bc   :  { %v9478_v24 = vpop.eup %9477  ;;  %8507 = vmatmul.mubr.msk.bf16.gmra.mrb[4].mxu0 %vm119_vm0, %v376_v42  ;;  %v366_v49 = vadd.f32 %v10190_v36, %v344_v43  ;;  %v324_v50 = vmul.f32 %v9476_v46, %v10151_v17 }
 0x1bd   :  { %v325_v51 = vmul.f32 %v9478_v24, %v10160_v35  ;;  %v367_v29 = vadd.f32 %v10190_v36, %v345_v11  ;;  %8544 = vmatprep.mubr.msk.bf16.mxu0 %vm9920_vm1, %v12792_v27 }
 0x1be   :  { %v377_v52 = vpack.c.bf16 %v366_v49, %v365_v48  ;;  %v346_v23 = vmul.f32 %v10186_v31, %v324_v50 }
 0x1bf   :  { %v9480_v28 = vpop.eup %9479  ;;  %v347_v57 = vmul.f32 %v10186_v31, %v325_v51 }
 0x1c0   :  { %v9482_v44 = vpop.eup %9481  ;;  %8510 = vmatprep.mubr.msk.bf16.mxu1 %vm119_vm0, %v377_v52  ;;  %v368_v53 = vadd.f32 %v10190_v36, %v346_v23  ;;  %v326_v56 = vmul.f32 %v9480_v28, %v10163_v21 }
 0x1c1   :  { %v327_v17 = vmul.f32 %v9482_v44, %v10172_v47  ;;  %v369_v59 = vadd.f32 %v10190_v36, %v347_v57 }
 0x1c2   :  { %v378_v37 = vpack.c.bf16 %v368_v53, %v367_v29  ;;  %v348_v35 = vmul.f32 %v10186_v31, %v326_v56 }
 0x1c3   :  { %v9484_v58 = vpop.eup %9483  ;;  %v349_v62 = vmul.f32 %v10186_v31, %v327_v17 }
 0x1c4   :  { %8511 = vmatmul.mubr.msk.bf16.vlgmr.msra.gmra.mrb[0].mxu1 %vm119_vm0, %v378_v37  ;;  %v370_v60 = vadd.f32 %v10190_v36, %v348_v35  ;;  %v328_v61 = vmul.f32 %v9484_v58, %v10175_v25 }
 0x1c5   :  { %v371_v47 = vadd.f32 %v10190_v36, %v349_v62 }
 0x1c6   :  { %v379_v63 = vpack.c.bf16 %v370_v60, %v369_v59  ;;  %v350_v21 = vmul.f32 %v10186_v31, %v328_v61 }
 0x1c8   :  { %8514 = vmatprep.mubr.msk.bf16.mxu1 %vm119_vm0, %v379_v63  ;;  %v372_v2 = vadd.f32 %v10190_v36, %v350_v21 }
 0x1ca   :  { %v380_v3 = vpack.c.bf16 %v372_v2, %v371_v47 }
 0x1cc   :  { %8515 = vmatmul.mubr.msk.bf16.gmra.mrb[4].mxu1 %vm119_vm0, %v380_v3 }
 0x1cd   :  { %8520 = vmatprep.mubr.msk.bf16.mxu1 %vm9920_vm1, %v12792_v27 }
 0x287   :  { %v8504_v4 = vpop.f32.mrb[0].mxu0 }
 0x288   :  { %v10245_v45 = vpack.c.bf16 %v8504_v4, %v8504_v4  ;;  %v455_v5 = vpop.f32.mrb[1].mxu0 }
 0x289   :  { %v8505_v6 = vpop.f32.mrb[2].mxu0  ;;  %v10251_v31 = vpack.c.bf16 %v455_v5, %v455_v5 }
 0x28a   :  { %554 = vrot.lane.b32.xlu0 %v10245_v45, %s9915_s5  ;;  %743 = vrot.lane.b32.xlu1 %v10245_v45, %s9916_s25  ;;  %v458_v25 = vpop.f32.mrb[3].mxu0  ;;  %v10257_v7 = vpack.c.bf16 %v8505_v6, %v8505_v6 }
 0x28b   :  { %v10313_v0 = vpack.c.bf16 %v458_v25, %v458_v25 }
 0x28e   :  { %550 = vrot.lane.b32.xlu1 %v10251_v31, %s9915_s5 }
 0x28f   :  { %v10255_v36 = vpop.f32.mrb[4].mxu0 }
 0x290   :  { %v10259_v8 = vpop.f32.mrb[5].mxu0  ;;  %v10361_v34 = vpack.c.bf16 %v10255_v36, %v10255_v36 }
 0x291   :  { %v8509_v9 = vpop.f32.mrb[6].mxu0  ;;  %v10419_v10 = vpack.c.bf16 %v10259_v8, %v10259_v8 }
 0x292   :  { %791 = vrot.lane.b32.xlu1 %v10257_v7, %s9916_s25  ;;  %v10263_v54 = vpop.f32.mrb[7].mxu0  ;;  %v10355_v33 = vpack.c.bf16 %v8509_v9, %v8509_v9 }
 0x293   :  { %v10413_v41 = vpack.c.bf16 %v10263_v54, %v10263_v54 }
 0x296   :  { %556 = vrot.lane.b32.xlu1 %v10257_v7, %s9915_s5 }
 0x297   :  { %v8512_v12 = vpop.f32.mrb[0].mxu1 }
 0x298   :  { %v10267_v13 = vpack.c.bf16 %v8512_v12, %v8512_v12  ;;  %v487_v14 = vpop.f32.mrb[1].mxu1 }
 0x299   :  { %v8513_v15 = vpop.f32.mrb[2].mxu1  ;;  %v10317_v30 = vpack.c.bf16 %v487_v14, %v487_v14 }
 0x29a   :  { %v10269_v18 = vpack.c.bf16 %v8513_v15, %v8513_v15  ;;  %1127 = vrot.lane.b32.xlu0 %v10267_v13, %s9916_s25  ;;  %v490_v19 = vpop.f32.mrb[3].mxu1 }
 0x29b   :  { %v10321_v32 = vpack.c.bf16 %v490_v19, %v490_v19 }
 0x29c   :  { %1175 = vrot.lane.b32.xlu1 %v10269_v18, %s9916_s25 }
 0x29e   :  { %570 = vrot.lane.b32.xlu0 %v10267_v13, %s9915_s5 }
 0x29f   :  { %v8516_v22 = vpop.f32.mrb[4].mxu1 }
 0x2a0   :  { %572 = vrot.lane.b32.xlu1 %v10269_v18, %s9915_s5  ;;  %v10279_v55 = vpop.f32.mrb[5].mxu1  ;;  %v10373_v38 = vpack.c.bf16 %v8516_v22, %v8516_v22 }
 0x2a1   :  { %v8517_v16 = vpop.f32.mrb[6].mxu1  ;;  %v10443_v49 = vpack.c.bf16 %v10279_v55, %v10279_v55 }
 0x2a2   :  { %586 = vrot.lane.b32.xlu0 %v10245_v45, %s9917_s26  ;;  %v10283_v26 = vpop.f32.mrb[7].mxu1  ;;  %v10369_v20 = vpack.c.bf16 %v8517_v16, %v8517_v16 }
 0x2a3   :  { %v10435_v24 = vpack.c.bf16 %v10283_v26, %v10283_v26 }
 0x2a4   :  { %588 = vrot.lane.b32.xlu1 %v10257_v7, %s9917_s26 }
 0x2a6   :  { %602 = vrot.lane.b32.xlu0 %v10267_v13, %s9917_s26 }
 0x2a8   :  { %604 = vrot.lane.b32.xlu1 %v10269_v18, %s9917_s26 }
 0x2aa   :  { %618 = vrot.lane.b32.xlu0 %v10245_v45, %s9918_s27 }
 0x2ac   :  { %620 = vrot.lane.b32.xlu1 %v10257_v7, %s9918_s27 }
 0x2ae   :  { %634 = vrot.lane.b32.xlu0 %v10267_v13, %s9918_s27 }
 0x2b0   :  { %636 = vrot.lane.b32.xlu1 %v10269_v18, %s9918_s27 }
 0x2b2   :  { %4648 = vrot.lane.b32.xlu0 %v10245_v45, %s9907_s1 }
 0x2b4   :  { %4696 = vrot.lane.b32.xlu1 %v10257_v7, %s9907_s1 }
 0x2b6   :  { %5032 = vrot.lane.b32.xlu0 %v10267_v13, %s9907_s1 }
 0x2b8   :  { %5080 = vrot.lane.b32.xlu1 %v10269_v18, %s9907_s1 }
 0x2ba   :  { %646 = vrot.lane.b32.xlu0 %v10251_v31, %s9916_s25 }
 0x2bc   :  { %695 = vrot.lane.b32.xlu1 %v10313_v0, %s9916_s25 }
 0x2be   :  { %1031 = vrot.lane.b32.xlu0 %v10317_v30, %s9916_s25 }
 0x2c0   :  { %1079 = vrot.lane.b32.xlu1 %v10321_v32, %s9916_s25 }
 0x2c2   :  { %566 = vrot.lane.b32.xlu0 %v10317_v30, %s9915_s5 }
 0x2c4   :  { %568 = vrot.lane.b32.xlu1 %v10321_v32, %s9915_s5 }
 0x2c6   :  { %582 = vrot.lane.b32.xlu0 %v10251_v31, %s9917_s26 }
 0x2c8   :  { %584 = vrot.lane.b32.xlu1 %v10313_v0, %s9917_s26 }
 0x2ca   :  { %598 = vrot.lane.b32.xlu0 %v10317_v30, %s9917_s26 }
 0x2cc   :  { %600 = vrot.lane.b32.xlu1 %v10321_v32, %s9917_s26 }
 0x2ce   :  { %614 = vrot.lane.b32.xlu0 %v10251_v31, %s9918_s27 }
 0x2d0   :  { %616 = vrot.lane.b32.xlu1 %v10313_v0, %s9918_s27 }
 0x2d2   :  { %630 = vrot.lane.b32.xlu0 %v10317_v30, %s9918_s27 }
 0x2d4   :  { %632 = vrot.lane.b32.xlu1 %v10321_v32, %s9918_s27 }
 0x2d6   :  { %4551 = vrot.lane.b32.xlu0 %v10251_v31, %s9907_s1 }
 0x2d8   :  { %4600 = vrot.lane.b32.xlu1 %v10313_v0, %s9907_s1 }
 0x2da   :  { %4936 = vrot.lane.b32.xlu0 %v10317_v30, %s9907_s1 }
 0x2dc   :  { %4984 = vrot.lane.b32.xlu1 %v10321_v32, %s9907_s1 }
 0x2de   :  { %552 = vrot.lane.b32.xlu0 %v10313_v0, %s9915_s5 }
 0x2e0   :  { %983 = vrot.lane.b32.xlu1 %v10355_v33, %s9916_s25 }
 0x2e2   :  { %935 = vrot.lane.b32.xlu0 %v10361_v34, %s9916_s25 }
 0x2e4   :  { %564 = vrot.lane.b32.xlu1 %v10355_v33, %s9915_s5 }
 0x2e6   :  { %562 = vrot.lane.b32.xlu0 %v10361_v34, %s9915_s5 }
 0x2e8   :  { %1367 = vrot.lane.b32.xlu1 %v10369_v20, %s9916_s25 }
 0x2ea   :  { %1319 = vrot.lane.b32.xlu0 %v10373_v38, %s9916_s25 }
 0x2ec   :  { %580 = vrot.lane.b32.xlu1 %v10369_v20, %s9915_s5 }
 0x2ee   :  { %578 = vrot.lane.b32.xlu0 %v10373_v38, %s9915_s5 }
 0x2f0   :  { %596 = vrot.lane.b32.xlu1 %v10355_v33, %s9917_s26 }
 0x2f2   :  { %594 = vrot.lane.b32.xlu0 %v10361_v34, %s9917_s26 }
 0x2f4   :  { %612 = vrot.lane.b32.xlu1 %v10369_v20, %s9917_s26 }
 0x2f6   :  { %610 = vrot.lane.b32.xlu0 %v10373_v38, %s9917_s26 }
 0x2f8   :  { %628 = vrot.lane.b32.xlu1 %v10355_v33, %s9918_s27 }
 0x2fa   :  { %626 = vrot.lane.b32.xlu0 %v10361_v34, %s9918_s27 }
 0x2fc   :  { %v10395_v39 = vpop.permute.xlu1 %743  ;;  %644 = vrot.lane.b32.xlu1 %v10369_v20, %s9918_s27  ;;  %v10421_v42 = vpop.permute.xlu0 %554 }
 0x2fd   :  { %v749_v5 = vsel %vm648_vm2, %v10395_v39, 0 }
 0x2fe   :  { %642 = vrot.lane.b32.xlu0 %v10373_v38, %s9918_s27 }
 0x300   :  { %v10401_v40 = vpop.permute.xlu1 %550  ;;  %4888 = vrot.lane.b32.xlu1 %v10355_v33, %s9907_s1 }
 0x302   :  { %4840 = vrot.lane.b32.xlu0 %v10361_v34, %s9907_s1 }
 0x304   :  { %v10407_v1 = vpop.permute.xlu1 %791  ;;  %5272 = vrot.lane.b32.xlu1 %v10369_v20, %s9907_s1 }
 0x305   :  { %v797_v8 = vsel %vm648_vm2, %v10407_v1, 0 }
 0x306   :  { %5224 = vrot.lane.b32.xlu0 %v10373_v38, %s9907_s1 }
 0x308   :  { %887 = vrot.lane.b32.xlu1 %v10413_v41, %s9916_s25  ;;  %v10425_v43 = vpop.permute.xlu1 %556 }
 0x30a   :  { %839 = vrot.lane.b32.xlu0 %v10419_v10, %s9916_s25 }
 0x30c   :  { %560 = vrot.lane.b32.xlu1 %v10413_v41, %s9915_s5  ;;  %v10431_v46 = vpop.permute.xlu0 %1127 }
 0x30e   :  { %v10437_v48 = vpop.permute.xlu1 %1175  ;;  %558 = vrot.lane.b32.xlu0 %v10419_v10, %s9915_s5 }
 0x310   :  { %1271 = vrot.lane.b32.xlu1 %v10435_v24, %s9916_s25  ;;  %v10447_v50 = vpop.permute.xlu0 %570 }
 0x312   :  { %v10449_v11 = vpop.permute.xlu1 %572  ;;  %1223 = vrot.lane.b32.xlu0 %v10443_v49, %s9916_s25 }
 0x314   :  { %576 = vrot.lane.b32.xlu1 %v10435_v24, %s9915_s5  ;;  %v10455_v51 = vpop.permute.xlu0 %586 }
 0x315   :  { %12864 = vst [vmem:[#allocation19_spill] sm:$0xff] %v10455_v51 }
 0x316   :  { %v10457_v52 = vpop.permute.xlu1 %588  ;;  %574 = vrot.lane.b32.xlu0 %v10443_v49, %s9915_s5 }
 0x317   :  { %12865 = vst [vmem:[#allocation20_spill] sm:$0xff] %v10457_v52 }
 0x318   :  { %592 = vrot.lane.b32.xlu1 %v10413_v41, %s9917_s26  ;;  %v10463_v23 = vpop.permute.xlu0 %602 }
 0x319   :  { %12866 = vst [vmem:[#allocation21_spill] sm:$0xff] %v10463_v23 }
 0x31a   :  { %v10465_v28 = vpop.permute.xlu1 %604  ;;  %590 = vrot.lane.b32.xlu0 %v10419_v10, %s9917_s26 }
 0x31b   :  { %12867 = vst [vmem:[#allocation22_spill] sm:$0xff] %v10465_v28 }
 0x31c   :  { %608 = vrot.lane.b32.xlu1 %v10435_v24, %s9917_s26  ;;  %v10471_v44 = vpop.permute.xlu0 %618 }
 0x31d   :  { %12868 = vst [vmem:[#allocation23_spill] sm:$0xff] %v10471_v44 }
 0x31e   :  { %v10473_v29 = vpop.permute.xlu1 %620  ;;  %606 = vrot.lane.b32.xlu0 %v10443_v49, %s9917_s26 }
 0x31f   :  { %12869 = vst [vmem:[#allocation24_spill] sm:$0xff] %v10473_v29 }
 0x320   :  { %624 = vrot.lane.b32.xlu1 %v10413_v41, %s9918_s27  ;;  %v10479_v53 = vpop.permute.xlu0 %634 }
 0x321   :  { %12870 = vst [vmem:[#allocation25_spill] sm:$0xff] %v10479_v53 }
 0x322   :  { %v10481_v56 = vpop.permute.xlu1 %636  ;;  %622 = vrot.lane.b32.xlu0 %v10419_v10, %s9918_s27 }
 0x323   :  { %12871 = vst [vmem:[#allocation26_spill] sm:$0xff] %v10481_v56 }
 0x324   :  { %640 = vrot.lane.b32.xlu1 %v10435_v24, %s9918_s27  ;;  %v10487_v57 = vpop.permute.xlu0 %4648 }
 0x325   :  { %12872 = vst [vmem:[#allocation27_spill] sm:$0xff] %v10487_v57 }
 0x326   :  { %v10489_v17 = vpop.permute.xlu1 %4696  ;;  %638 = vrot.lane.b32.xlu0 %v10443_v49, %s9918_s27 }
 0x327   :  { %12873 = vst [vmem:[#allocation28_spill] sm:$0xff] %v10489_v17 }
 0x328   :  { %4792 = vrot.lane.b32.xlu1 %v10413_v41, %s9907_s1  ;;  %v10495_v37 = vpop.permute.xlu0 %5032 }
 0x329   :  { %12874 = vst [vmem:[#allocation29_spill] sm:$0xff] %v10495_v37 }
 0x32a   :  { %v10497_v35 = vpop.permute.xlu1 %5080  ;;  %4744 = vrot.lane.b32.xlu0 %v10419_v10, %s9907_s1 }
 0x32b   :  { %12875 = vst [vmem:[#allocation30_spill] sm:$0xff] %v10497_v35 }
 0x32c   :  { %5176 = vrot.lane.b32.xlu1 %v10435_v24, %s9907_s1  ;;  %v647_v58 = vpop.permute.xlu0 %646 }
 0x32d   :  { %v653_v59 = vsel %vm648_vm2, %v647_v58, 0 }
 0x32e   :  { %v696_v60 = vpop.permute.xlu1 %695  ;;  %5128 = vrot.lane.b32.xlu0 %v10443_v49, %s9907_s1  ;;  %8519 = vmatpush3.bf16.xpose.msra.mxu1 %v653_v59 }
 0x32f   :  { %8524 = vmatprep.subr.bf16.mxu1 %v12792_v27  ;;  %v701_v21 = vsel %vm648_vm2, %v696_v60, 0 }
 0x330   :  { %1559 = vrot.lane.b32.xlu1 %v10425_v43, %s9916_s25  ;;  %v10509_v61 = vpop.permute.xlu0 %1031 }
 0x332   :  { %v10511_v62 = vpop.permute.xlu1 %1079  ;;  %1511 = vrot.lane.b32.xlu0 %v10421_v42, %s9916_s25 }
 0x334   :  { %1943 = vrot.lane.b32.xlu1 %v10449_v11, %s9916_s25  ;;  %v10517_v63 = vpop.permute.xlu0 %566 }
 0x335   :  { %8521 = vmatmul.mubr.msk.bf16.vlgmr.msra.gmra.mrb[8].mxu1 %vm648_vm2, %v10251_v31 }
 0x336   :  { %v10522_v47 = vpop.permute.xlu1 %568  ;;  %1895 = vrot.lane.b32.xlu0 %v10447_v50, %s9916_s25  ;;  %8525 = vmatpush3.bf16.xpose.msra.mxu1 %v701_v21 }
 0x337   :  { %8526 = vmatprep.mubr.msk.bf16.mxu1 %vm9920_vm1, %v12792_v27  ;;  %8530 = vmatprep.subr.bf16.mxu1 %v12792_v27 }
 0x338   :  { %2327 = vrot.lane.b32.xlu1 %v10457_v52, %s9916_s25  ;;  %v10531_v2 = vpop.permute.xlu0 %582 }
 0x339   :  { %12876 = vst [vmem:[#allocation31_spill] sm:$0xff] %v10531_v2 }
 0x33a   :  { %v10533_v3 = vpop.permute.xlu1 %584  ;;  %2279 = vrot.lane.b32.xlu0 %v10455_v51, %s9916_s25 }
 0x33b   :  { %12877 = vst [vmem:[#allocation32_spill] sm:$0xff] %v10533_v3 }
 0x33c   :  { %2711 = vrot.lane.b32.xlu1 %v10465_v28, %s9916_s25  ;;  %v10539_v4 = vpop.permute.xlu0 %598 }
 0x33d   :  { %12878 = vst [vmem:[#allocation33_spill] sm:$0xff] %v10539_v4  ;;  %8527 = vmatmul.mubr.msk.bf16.vlgmr.msra.gmra.mrb[12].mxu1 %vm648_vm2, %v10313_v0 }
 0x33e   :  { %v10545_v6 = vpop.permute.xlu1 %600  ;;  %2663 = vrot.lane.b32.xlu0 %v10463_v23, %s9916_s25  ;;  %8531 = vmatpush3.bf16.xpose.msra.mxu1 %v749_v5 }
 0x33f   :  { %12879 = vst [vmem:[#allocation34_spill] sm:$0xff] %v10545_v6  ;;  %8532 = vmatprep.mubr.msk.bf16.mxu1 %vm9920_vm1, %v12792_v27  ;;  %8536 = vmatprep.subr.bf16.mxu1 %v12792_v27 }
 0x340   :  { %3095 = vrot.lane.b32.xlu1 %v10473_v29, %s9916_s25  ;;  %v10554_v25 = vpop.permute.xlu0 %614 }
 0x341   :  { %12880 = vst [vmem:[#allocation35_spill] sm:$0xff] %v10554_v25 }
 0x342   :  { %v10556_v31 = vpop.permute.xlu1 %616  ;;  %3047 = vrot.lane.b32.xlu0 %v10471_v44, %s9916_s25 }
 0x343   :  { %12881 = vst [vmem:[#allocation36_spill] sm:$0xff] %v10556_v31 }
 0x344   :  { %3479 = vrot.lane.b32.xlu1 %v10481_v56, %s9916_s25  ;;  %v10562_v36 = vpop.permute.xlu0 %630 }
 0x345   :  { %12882 = vst [vmem:[#allocation37_spill] sm:$0xff] %v10562_v36  ;;  %8533 = vmatmul.mubr.msk.bf16.vlgmr.msra.gmra.mrb[16].mxu1 %vm648_vm2, %v10245_v45 }
 0x346   :  { %v10568_v9 = vpop.permute.xlu1 %632  ;;  %3431 = vrot.lane.b32.xlu0 %v10479_v53, %s9916_s25  ;;  %8537 = vmatpush3.bf16.xpose.msra.mxu1 %v797_v8 }
 0x347   :  { %12883 = vst [vmem:[#allocation38_spill] sm:$0xff] %v10568_v9  ;;  %8538 = vmatprep.mubr.msk.bf16.mxu1 %vm9920_vm1, %v12792_v27  ;;  %8548 = vmatprep.subr.bf16.mxu1 %v12792_v27 }
 0x348   :  { %5464 = vrot.lane.b32.xlu1 %v10425_v43, %s9907_s1  ;;  %v10577_v54 = vpop.permute.xlu0 %4551 }
 0x349   :  { %12884 = vst [vmem:[#allocation39_spill] sm:$0xff] %v10577_v54 }
 0x34a   :  { %v10579_v12 = vpop.permute.xlu1 %4600  ;;  %5416 = vrot.lane.b32.xlu0 %v10421_v42, %s9907_s1 }
 0x34b   :  { %12885 = vst [vmem:[#allocation40_spill] sm:$0xff] %v10579_v12 }
 0x34c   :  { %5848 = vrot.lane.b32.xlu1 %v10449_v11, %s9907_s1  ;;  %v10585_v45 = vpop.permute.xlu0 %4936 }
 0x34d   :  { %12886 = vst [vmem:[#allocation41_spill] sm:$0xff] %v10585_v45  ;;  %8539 = vmatmul.mubr.msk.bf16.vlgmr.msra.gmra.mrb[20].mxu1 %vm648_vm2, %v10257_v7 }
 0x34e   :  { %v10589_v14 = vpop.permute.xlu1 %4984  ;;  %5800 = vrot.lane.b32.xlu0 %v10447_v50, %s9907_s1  ;;  %8550 = vmatprep.mubr.msk.bf16.mxu1 %vm9920_vm1, %v12792_v27 }
 0x34f   :  { %12887 = vst [vmem:[#allocation42_spill] sm:$0xff] %v10589_v14 }
 0x350   :  { %v10595_v15 = vpop.permute.xlu0 %552 }
 0x351   :  { %1463 = vrot.lane.b32.xlu1 %v10595_v15, %s9916_s25 }
 0x352   :  { %v984_v19 = vpop.permute.xlu1 %983  ;;  %1415 = vrot.lane.b32.xlu0 %v10401_v40, %s9916_s25 }
 0x354   :  { %v936_v22 = vpop.permute.xlu0 %935 }
 0x355   :  { %1847 = vrot.lane.b32.xlu1 %v10522_v47, %s9916_s25 }
 0x356   :  { %v10603_v7 = vpop.permute.xlu1 %564  ;;  %1799 = vrot.lane.b32.xlu0 %v10517_v63, %s9916_s25 }
 0x358   :  { %v10607_v55 = vpop.permute.xlu0 %562 }
 0x359   :  { %2231 = vrot.lane.b32.xlu1 %v10533_v3, %s9916_s25 }
 0x35a   :  { %v10611_v16 = vpop.permute.xlu1 %1367  ;;  %2183 = vrot.lane.b32.xlu0 %v10531_v2, %s9916_s25 }
 0x35c   :  { %v10615_v26 = vpop.permute.xlu0 %1319 }
 0x35d   :  { %2615 = vrot.lane.b32.xlu1 %v10545_v6, %s9916_s25 }
 0x35e   :  { %v10619_v0 = vpop.permute.xlu1 %580  ;;  %2567 = vrot.lane.b32.xlu0 %v10539_v4, %s9916_s25 }
 0x360   :  { %v10623_v39 = vpop.permute.xlu0 %578 }
 0x361   :  { %2999 = vrot.lane.b32.xlu1 %v10556_v31, %s9916_s25 }
 0x362   :  { %v10627_v1 = vpop.permute.xlu1 %596  ;;  %2951 = vrot.lane.b32.xlu0 %v10554_v25, %s9916_s25 }
 0x363   :  { %12888 = vst [vmem:[#allocation43_spill] sm:$0xff] %v10627_v1 }
 0x364   :  { %v10631_v58 = vpop.permute.xlu0 %594 }
 0x365   :  { %12889 = vst [vmem:[#allocation44_spill] sm:$0xff] %v10631_v58  ;;  %3383 = vrot.lane.b32.xlu1 %v10568_v9, %s9916_s25 }
 0x366   :  { %v10635_v59 = vpop.permute.xlu1 %612  ;;  %3335 = vrot.lane.b32.xlu0 %v10562_v36, %s9916_s25 }
 0x367   :  { %12890 = vst [vmem:[#allocation45_spill] sm:$0xff] %v10635_v59 }
 0x368   :  { %v10639_v60 = vpop.permute.xlu0 %610 }
 0x369   :  { %12891 = vst [vmem:[#allocation46_spill] sm:$0xff] %v10639_v60  ;;  %5368 = vrot.lane.b32.xlu1 %v10595_v15, %s9907_s1 }
 0x36a   :  { %v10643_v21 = vpop.permute.xlu1 %628  ;;  %5320 = vrot.lane.b32.xlu0 %v10401_v40, %s9907_s1 }
 0x36b   :  { %12892 = vst [vmem:[#allocation47_spill] sm:$0xff] %v10643_v21 }
 0x36c   :  { %v10647_v5 = vpop.permute.xlu0 %626 }
 0x36d   :  { %12893 = vst [vmem:[#allocation48_spill] sm:$0xff] %v10647_v5  ;;  %5752 = vrot.lane.b32.xlu1 %v10522_v47, %s9907_s1 }
 0x36e   :  { %v10651_v8 = vpop.permute.xlu1 %644  ;;  %5704 = vrot.lane.b32.xlu0 %v10517_v63, %s9907_s1 }
 0x36f   :  { %12894 = vst [vmem:[#allocation49_spill] sm:$0xff] %v10651_v8 }
 0x370   :  { %v10655_v27 = vpop.permute.xlu0 %642 }
 0x371   :  { %12895 = vst [vmem:[#allocation50_spill] sm:$0xff] %v10655_v27  ;;  %1751 = vrot.lane.b32.xlu1 %v10603_v7, %s9916_s25 }
 0x372   :  { %v10659_v35 = vpop.permute.xlu1 %4888  ;;  %1703 = vrot.lane.b32.xlu0 %v10607_v55, %s9916_s25 }
 0x373   :  { %12896 = vst [vmem:[#allocation51_spill] sm:$0xff] %v10659_v35 }
 0x374   :  { %v10663_v37 = vpop.permute.xlu0 %4840 }
 0x375   :  { %12897 = vst [vmem:[#allocation52_spill] sm:$0xff] %v10663_v37  ;;  %2135 = vrot.lane.b32.xlu1 %v10619_v0, %s9916_s25 }
 0x376   :  { %v10667_v14 = vpop.permute.xlu1 %5272  ;;  %2087 = vrot.lane.b32.xlu0 %v10623_v39, %s9916_s25 }
 0x377   :  { %12898 = vst [vmem:[#allocation53_spill] sm:$0xff] %v10667_v14  ;;  %v12900_v14 = vmov 0.0  }
 0x378   :  { %v10671_v45 = vpop.permute.xlu0 %5224 }
 0x379   :  { %12899 = vst [vmem:[#allocation54_spill] sm:$0xff] %v10671_v45  ;;  %2519 = vrot.lane.b32.xlu1 %v10627_v1, %s9916_s25 }
 0x37a   :  { %v888_v17 = vpop.permute.xlu1 %887  ;;  %2471 = vrot.lane.b32.xlu0 %v10631_v58, %s9916_s25 }
 0x37b   :  { %v893_v35 = vsel %vm648_vm2, %v888_v17, 0 }
 0x37c   :  { %8549 = vmatpush3.bf16.xpose.msra.mxu1 %v893_v35  ;;  %v840_v37 = vpop.permute.xlu0 %839 }
 0x37d   :  { %v845_v57 = vsel %vm648_vm2, %v840_v37, 0  ;;  %2903 = vrot.lane.b32.xlu1 %v10635_v59, %s9916_s25  ;;  %8560 = vmatprep.subr.bf16.mxu1 %v12900_v14  ;;  %v989_v37 = vsel %vm648_vm2, %v984_v19, 0 }
 0x37e   :  { %v10682_v54 = vpop.permute.xlu1 %560  ;;  %2855 = vrot.lane.b32.xlu0 %v10639_v60, %s9916_s25  ;;  %8543 = vmatpush3.bf16.xpose.msra.mxu0 %v845_v57  ;;  %v941_v57 = vsel %vm648_vm2, %v936_v22, 0 }
 0x37f   :  { %8554 = vmatprep.subr.bf16.mxu0 %v12900_v14 }
 0x380   :  { %v10687_v45 = vpop.permute.xlu0 %558 }
 0x381   :  { %3287 = vrot.lane.b32.xlu1 %v10643_v21, %s9916_s25 }
 0x382   :  { %v1272_v17 = vpop.permute.xlu1 %1271  ;;  %3239 = vrot.lane.b32.xlu0 %v10647_v5, %s9916_s25 }
 0x383   :  { %8551 = vmatmul.mubr.msk.bf16.vlgmr.msra.gmra.mrb[24].mxu1 %vm648_vm2, %v10413_v41 }
 0x384   :  { %8561 = vmatpush3.bf16.xpose.msra.mxu1 %v989_v37  ;;  %v1224_v35 = vpop.permute.xlu0 %1223  ;;  %8562 = vmatprep.mubr.msk.bf16.mxu1 %vm9920_vm1, %v12900_v14  ;;  %v1037_v37 = vsel %vm648_vm2, %v10509_v61, 0 }
 0x385   :  { %3671 = vrot.lane.b32.xlu1 %v10651_v8, %s9916_s25  ;;  %8545 = vmatmul.mubr.msk.bf16.vlgmr.msra.gmra.mrb[8].mxu0 %vm648_vm2, %v10419_v10  ;;  %v1085_v10 = vsel %vm648_vm2, %v10511_v62, 0 }
 0x386   :  { %v10703_v12 = vpop.permute.xlu1 %576  ;;  %3623 = vrot.lane.b32.xlu0 %v10655_v27, %s9916_s25  ;;  %8555 = vmatpush3.bf16.xpose.msra.mxu0 %v941_v57 }
 0x387   :  { %8572 = vmatprep.subr.bf16.mxu1 %v12900_v14  ;;  %8556 = vmatprep.mubr.msk.bf16.mxu0 %vm9920_vm1, %v12900_v14 }
 0x388   :  { %v10710_v41 = vpop.permute.xlu0 %574  ;;  %8566 = vmatprep.subr.bf16.mxu0 %v12900_v14 }
 0x389   :  { %5656 = vrot.lane.b32.xlu1 %v10603_v7, %s9907_s1 }
 0x38a   :  { %v10715_v19 = vpop.permute.xlu1 %592  ;;  %5608 = vrot.lane.b32.xlu0 %v10607_v55, %s9907_s1 }
 0x38b   :  { %12901 = vst [vmem:[#allocation55_spill] sm:$0xff] %v10715_v19  ;;  %8563 = vmatmul.mubr.msk.bf16.vlgmr.msra.gmra.mrb[28].mxu1 %vm648_vm2, %v10355_v33 }
 0x38c   :  { %8573 = vmatpush3.bf16.xpose.msra.mxu1 %v1085_v10  ;;  %v10723_v22 = vpop.permute.xlu0 %590  ;;  %8574 = vmatprep.mubr.msk.bf16.mxu1 %vm9920_vm1, %v12900_v14  ;;  %v1133_v10 = vsel %vm648_vm2, %v10431_v46, 0 }
 0x38d   :  { %12902 = vst [vmem:[#allocation56_spill] sm:$0xff] %v10723_v22  ;;  %1655 = vrot.lane.b32.xlu1 %v10682_v54, %s9916_s25  ;;  %8557 = vmatmul.mubr.msk.bf16.vlgmr.msra.gmra.mrb[12].mxu0 %vm648_vm2, %v10361_v34  ;;  %v1181_v34 = vsel %vm648_vm2, %v10437_v48, 0 }
 0x38e   :  { %v10733_v57 = vpop.permute.xlu1 %608  ;;  %8567 = vmatpush3.bf16.xpose.msra.mxu0 %v1037_v37  ;;  %1607 = vrot.lane.b32.xlu0 %v10687_v45, %s9916_s25 }
 0x38f   :  { %12903 = vst [vmem:[#allocation57_spill] sm:$0xff] %v10733_v57  ;;  %8584 = vmatprep.subr.bf16.mxu1 %v12900_v14  ;;  %8568 = vmatprep.mubr.msk.bf16.mxu0 %vm9920_vm1, %v12900_v14 }
 0x390   :  { %v10740_v33 = vpop.permute.xlu0 %606  ;;  %8578 = vmatprep.subr.bf16.mxu0 %v12900_v14 }
 0x391   :  { %12904 = vst [vmem:[#allocation58_spill] sm:$0xff] %v10740_v33  ;;  %2039 = vrot.lane.b32.xlu1 %v10703_v12, %s9916_s25 }
 0x392   :  { %v10745_v61 = vpop.permute.xlu1 %624  ;;  %1991 = vrot.lane.b32.xlu0 %v10710_v41, %s9916_s25 }
 0x393   :  { %12905 = vst [vmem:[#allocation59_spill] sm:$0xff] %v10745_v61  ;;  %8575 = vmatmul.mubr.msk.bf16.vlgmr.msra.gmra.mrb[32].mxu1 %vm648_vm2, %v10321_v32 }
 0x394   :  { %8585 = vmatpush3.bf16.xpose.msra.mxu1 %v1181_v34  ;;  %v10753_v62 = vpop.permute.xlu0 %622  ;;  %8586 = vmatprep.mubr.msk.bf16.mxu1 %vm9920_vm1, %v12900_v14  ;;  %v1229_v34 = vsel %vm648_vm2, %v1224_v35, 0 }
 0x395   :  { %12906 = vst [vmem:[#allocation60_spill] sm:$0xff] %v10753_v62  ;;  %2423 = vrot.lane.b32.xlu1 %v10715_v19, %s9916_s25  ;;  %8569 = vmatmul.mubr.msk.bf16.vlgmr.msra.gmra.mrb[16].mxu0 %vm648_vm2, %v10317_v30  ;;  %v1277_v30 = vsel %vm648_vm2, %v1272_v17, 0 }
 0x396   :  { %v10763_v37 = vpop.permute.xlu1 %640  ;;  %8579 = vmatpush3.bf16.xpose.msra.mxu0 %v1133_v10  ;;  %2375 = vrot.lane.b32.xlu0 %v10723_v22, %s9916_s25 }
 0x397   :  { %12907 = vst [vmem:[#allocation61_spill] sm:$0xff] %v10763_v37  ;;  %8596 = vmatprep.subr.bf16.mxu1 %v12900_v14  ;;  %8580 = vmatprep.mubr.msk.bf16.mxu0 %vm9920_vm1, %v12900_v14 }
 0x398   :  { %v10770_v32 = vpop.permute.xlu0 %638  ;;  %8590 = vmatprep.subr.bf16.mxu0 %v12900_v14 }
 0x399   :  { %12908 = vst [vmem:[#allocation62_spill] sm:$0xff] %v10770_v32  ;;  %2807 = vrot.lane.b32.xlu1 %v10733_v57, %s9916_s25 }
 0x39a   :  { %v10775_v46 = vpop.permute.xlu1 %4792  ;;  %2759 = vrot.lane.b32.xlu0 %v10740_v33, %s9916_s25 }
 0x39b   :  { %12909 = vst [vmem:[#allocation63_spill] sm:$0xff] %v10775_v46  ;;  %8587 = vmatmul.mubr.msk.bf16.vlgmr.msra.gmra.mrb[36].mxu1 %vm648_vm2, %v10269_v18 }
 0x39c   :  { %8597 = vmatpush3.bf16.xpose.msra.mxu1 %v1277_v30  ;;  %v10782_v48 = vpop.permute.xlu0 %4744  ;;  %8598 = vmatprep.mubr.msk.bf16.mxu1 %vm9920_vm1, %v12900_v14  ;;  %v1325_v30 = vsel %vm648_vm2, %v10615_v26, 0 }
 0x39d   :  { %12910 = vst [vmem:[#allocation64_spill] sm:$0xff] %v10782_v48  ;;  %3191 = vrot.lane.b32.xlu1 %v10745_v61, %s9916_s25  ;;  %8581 = vmatmul.mubr.msk.bf16.vlgmr.msra.gmra.mrb[20].mxu0 %vm648_vm2, %v10267_v13  ;;  %v1373_v13 = vsel %vm648_vm2, %v10611_v16, 0 }
 0x39e   :  { %v10791_v10 = vpop.permute.xlu1 %5176  ;;  %8591 = vmatpush3.bf16.xpose.msra.mxu0 %v1229_v34  ;;  %3143 = vrot.lane.b32.xlu0 %v10753_v62, %s9916_s25 }
 0x39f   :  { %12911 = vst [vmem:[#allocation65_spill] sm:$0xff] %v10791_v10  ;;  %8608 = vmatprep.subr.bf16.mxu1 %v12900_v14  ;;  %8592 = vmatprep.mubr.msk.bf16.mxu0 %vm9920_vm1, %v12900_v14 }
 0x3a0   :  { %v10798_v18 = vpop.permute.xlu0 %5128  ;;  %8602 = vmatprep.subr.bf16.mxu0 %v12900_v14 }
 0x3a1   :  { %12912 = vst [vmem:[#allocation66_spill] sm:$0xff] %v10798_v18  ;;  %3575 = vrot.lane.b32.xlu1 %v10763_v37, %s9916_s25 }
 0x3a2   :  { %v1560_v17 = vpop.permute.xlu1 %1559  ;;  %3527 = vrot.lane.b32.xlu0 %v10770_v32, %s9916_s25 }
 0x3a3   :  { %8599 = vmatmul.mubr.msk.bf16.vlgmr.msra.gmra.mrb[40].mxu1 %vm648_vm2, %v10435_v24 }
 0x3a4   :  { %8609 = vmatpush3.bf16.xpose.msra.mxu1 %v1373_v13  ;;  %v1512_v35 = vpop.permute.xlu0 %1511  ;;  %8610 = vmatprep.mubr.msk.bf16.mxu1 %vm9920_vm1, %v12900_v14 }
 0x3a5   :  { %5560 = vrot.lane.b32.xlu1 %v10682_v54, %s9907_s1  ;;  %8593 = vmatmul.mubr.msk.bf16.vlgmr.msra.gmra.mrb[24].mxu0 %vm648_vm2, %v10443_v49 }
 0x3a6   :  { %v10817_v34 = vpop.permute.xlu1 %1943  ;;  %8603 = vmatpush3.bf16.xpose.msra.mxu0 %v1325_v30  ;;  %5512 = vrot.lane.b32.xlu0 %v10687_v45, %s9907_s1 }
 0x3a7   :  { %8604 = vmatprep.mubr.msk.bf16.mxu0 %vm9920_vm1, %v12900_v14  ;;  %8620 = vmatprep.subr.bf16.mxu1 %v12900_v14 }
 0x3a8   :  { %v10824_v24 = vpop.permute.xlu0 %1895  ;;  %8614 = vmatprep.subr.bf16.mxu0 %v12900_v14 }
 0x3aa   :  { %v10827_v16 = vpop.permute.xlu1 %2327 }
 0x3ab   :  { %8611 = vmatmul.mubr.msk.bf16.vlgmr.msra.gmra.mrb[44].mxu1 %vm648_vm2, %v10369_v20 }
 0x3ac   :  { %v10831_v49 = vpop.permute.xlu0 %2279  ;;  %8622 = vmatprep.mubr.msk.bf16.mxu1 %vm9920_vm1, %v12900_v14 }
 0x3ad   :  { %8605 = vmatmul.mubr.msk.bf16.vlgmr.msra.gmra.mrb[28].mxu0 %vm648_vm2, %v10373_v38 }
 0x3ae   :  { %v10837_v26 = vpop.permute.xlu1 %2711  ;;  %8616 = vmatprep.mubr.msk.bf16.mxu0 %vm9920_vm1, %v12900_v14 }
 0x3b0   :  { %v10841_v13 = vpop.permute.xlu0 %2663 }
 0x3b2   :  { %v10843_v30 = vpop.permute.xlu1 %3095 }
 0x3b4   :  { %v10845_v10 = vpop.permute.xlu0 %3047 }
 0x3b6   :  { %v10847_v20 = vpop.permute.xlu1 %3479 }
 0x3b7   :  { %12913 = vst [vmem:[#allocation67_spill] sm:$0xff] %v10847_v20 }
 0x3b8   :  { %v10849_v18 = vpop.permute.xlu0 %3431 }
 0x3b9   :  { %12914 = vst [vmem:[#allocation68_spill] sm:$0xff] %v10849_v18 }
 0x3ba   :  { %v10851_v46 = vpop.permute.xlu1 %5464 }
 0x3bb   :  { %12915 = vst [vmem:[#allocation69_spill] sm:$0xff] %v10851_v46 }
 0x3bc   :  { %v10853_v48 = vpop.permute.xlu0 %5416 }
 0x3bd   :  { %12916 = vst [vmem:[#allocation70_spill] sm:$0xff] %v10853_v48 }
 0x3be   :  { %v10855_v38 = vpop.permute.xlu1 %5848 }
 0x3bf   :  { %12917 = vst [vmem:[#allocation71_spill] sm:$0xff] %v10855_v38 }
 0x3c0   :  { %v10857_v27 = vpop.permute.xlu0 %5800 }
 0x3c1   :  { %12918 = vst [vmem:[#allocation72_spill] sm:$0xff] %v10857_v27  ;;  %v1565_v27 = vsel %vm648_vm2, %v1560_v17, 0 }
 0x3c3   :  { %v1464_v8 = vpop.permute.xlu1 %1463 }
 0x3c4   :  { %v1469_v32 = vsel %vm648_vm2, %v1464_v8, 0  ;;  %v1416_v37 = vpop.permute.xlu0 %1415 }
 0x3c5   :  { %v1421_v53 = vsel %vm648_vm2, %v1416_v37, 0  ;;  %8621 = vmatpush3.bf16.xpose.msra.mxu1 %v1469_v32  ;;  %v1517_v37 = vsel %vm648_vm2, %v1512_v35, 0 }
 0x3c6   :  { %8615 = vmatpush3.bf16.xpose.msra.mxu0 %v1421_v53  ;;  %8632 = vmatprep.subr.bf16.mxu1 %v12900_v14 }
 0x3c7   :  { %v10862_v56 = vpop.permute.xlu1 %1847  ;;  %8626 = vmatprep.subr.bf16.mxu0 %v12900_v14 }
 0x3c8   :  { %v10865_v46 = vpop.permute.xlu0 %1799 }
 0x3cb   :  { %v10867_v48 = vpop.permute.xlu1 %2231 }
 0x3cc   :  { %8623 = vmatmul.mubr.msk.bf16.vlgmr.msra.gmra.mrb[48].mxu1 %vm648_vm2, %v10595_v15  ;;  %v10872_v8 = vpop.permute.xlu0 %2183 }
 0x3cd   :  { %8617 = vmatmul.mubr.msk.bf16.vlgmr.msra.gmra.mrb[32].mxu0 %vm648_vm2, %v10401_v40  ;;  %8633 = vmatpush3.bf16.xpose.msra.mxu1 %v1565_v27 }
 0x3ce   :  { %8627 = vmatpush3.bf16.xpose.msra.mxu0 %v1517_v37  ;;  %8634 = vmatprep.mubr.msk.bf16.mxu1 %vm9920_vm1, %v12900_v14 }
 0x3cf   :  { %v10879_v53 = vpop.permute.xlu1 %2615  ;;  %8628 = vmatprep.mubr.msk.bf16.mxu0 %vm9920_vm1, %v12900_v14  ;;  %8644 = vmatprep.subr.bf16.mxu1 %v12900_v14 }
 0x3d0   :  { %v10884_v15 = vpop.permute.xlu0 %2567  ;;  %8638 = vmatprep.subr.bf16.mxu0 %v12900_v14 }
 0x3d3   :  { %v10887_v32 = vpop.permute.xlu1 %2999 }
 0x3d4   :  { %8635 = vmatmul.mubr.msk.bf16.vlgmr.msra.gmra.mrb[52].mxu1 %vm648_vm2, %v10425_v43  ;;  %v10891_v27 = vpop.permute.xlu0 %2951 }
 0x3d5   :  { %8629 = vmatmul.mubr.msk.bf16.vlgmr.msra.gmra.mrb[36].mxu0 %vm648_vm2, %v10421_v42  ;;  %8646 = vmatprep.mubr.msk.bf16.mxu1 %vm9920_vm1, %v12900_v14 }
 0x3d6   :  { %8640 = vmatprep.mubr.msk.bf16.mxu0 %vm9920_vm1, %v12900_v14 }
 0x3d7   :  { %v10899_v40 = vpop.permute.xlu1 %3383 }
 0x3d8   :  { %12919 = vst [vmem:[#allocation73_spill] sm:$0xff] %v10899_v40  ;;  %v10901_v17 = vpop.permute.xlu0 %3335 }
 0x3d9   :  { %12920 = vst [vmem:[#allocation74_spill] sm:$0xff] %v10901_v17 }
 0x3db   :  { %v10903_v35 = vpop.permute.xlu1 %5368 }
 0x3dc   :  { %12921 = vst [vmem:[#allocation75_spill] sm:$0xff] %v10903_v35  ;;  %v10905_v37 = vpop.permute.xlu0 %5320 }
 0x3dd   :  { %12922 = vst [vmem:[#allocation76_spill] sm:$0xff] %v10905_v37 }
 0x3df   :  { %v10907_v43 = vpop.permute.xlu1 %5752 }
 0x3e0   :  { %12923 = vst [vmem:[#allocation77_spill] sm:$0xff] %v10907_v43  ;;  %v10909_v38 = vpop.permute.xlu0 %5704 }
 0x3e1   :  { %12924 = vst [vmem:[#allocation78_spill] sm:$0xff] %v10909_v38 }
 0x3e3   :  { %v1752_v36 = vpop.permute.xlu1 %1751 }
 0x3e4   :  { %v1704_v42 = vpop.permute.xlu0 %1703 }
 0x3e7   :  { %v10911_v18 = vpop.permute.xlu1 %2135 }
 0x3e8   :  { %v10913_v9 = vpop.permute.xlu0 %2087 }
 0x3eb   :  { %v10915_v20 = vpop.permute.xlu1 %2519 }
 0x3ec   :  { %v10917_v5 = vpop.permute.xlu0 %2471 }
 0x3ef   :  { %v10919_v21 = vpop.permute.xlu1 %2903 }
 0x3f0   :  { %v10921_v17 = vpop.permute.xlu0 %2855 }
 0x3f3   :  { %v10923_v35 = vpop.permute.xlu1 %3287 }
 0x3f4   :  { %v10925_v37 = vpop.permute.xlu0 %3239 }
 0x3f5   :  { %12925 = vst [vmem:[#allocation79_spill] sm:$0xff] %v10925_v37 }
 0x3f7   :  { %v10927_v43 = vpop.permute.xlu1 %3671 }
 0x3f8   :  { %12926 = vst [vmem:[#allocation80_spill] sm:$0xff] %v10927_v43  ;;  %v10929_v38 = vpop.permute.xlu0 %3623  ;;  %v1757_v43 = vsel %vm648_vm2, %v1752_v36, 0  ;;  %v1853_v36 = vsel %vm648_vm2, %v10862_v56, 0 }
 0x3fb   :  { %v10931_v40 = vpop.permute.xlu1 %5656 }
 0x3fc   :  { %12927 = vst [vmem:[#allocation81_spill] sm:$0xff] %v10931_v40  ;;  %v10933_v62 = vpop.permute.xlu0 %5608 }
 0x3fd   :  { %12928 = vst [vmem:[#allocation82_spill] sm:$0xff] %v10933_v62  ;;  %v1709_v62 = vsel %vm648_vm2, %v1704_v42, 0 }
 0x3ff   :  { %v1656_v61 = vpop.permute.xlu1 %1655 }
 0x400   :  { %v1661_v44 = vsel %vm648_vm2, %v1656_v61, 0  ;;  %v1608_v29 = vpop.permute.xlu0 %1607 }
 0x401   :  { %v1613_v25 = vsel %vm648_vm2, %v1608_v29, 0  ;;  %8645 = vmatpush3.bf16.xpose.msra.mxu1 %v1661_v44 }
 0x402   :  { %8639 = vmatpush3.bf16.xpose.msra.mxu0 %v1613_v25  ;;  %8656 = vmatprep.subr.bf16.mxu1 %v12900_v14 }
 0x403   :  { %8650 = vmatprep.subr.bf16.mxu0 %v12900_v14 }
 0x408   :  { %v689_v37 = vpop.f32.mrb[8].mxu1  ;;  %8647 = vmatmul.mubr.msk.bf16.vlgmr.msra.gmra.mrb[56].mxu1 %vm648_vm2, %v10682_v54 }
 0x409   :  { %v10943_v40 = vmul.f32 0.35355338, %v689_v37  ;;  %v8522_v61 = vpop.f32.mrb[9].mxu1  ;;  %8641 = vmatmul.mubr.msk.bf16.vlgmr.msra.gmra.mrb[40].mxu0 %vm648_vm2, %v10687_v45  ;;  %8657 = vmatpush3.bf16.xpose.msra.mxu1 %v1757_v43  ;;  %v1805_v45 = vsel %vm648_vm2, %v10865_v46, 0  ;;  %v1901_v46 = vsel %vm648_vm2, %v10824_v24, 0 }
 0x40a   :  { %v692_v44 = vpop.f32.mrb[10].mxu1  ;;  %8651 = vmatpush3.bf16.xpose.msra.mxu0 %v1709_v62  ;;  %8658 = vmatprep.mubr.msk.bf16.mxu1 %vm9920_vm1, %v12900_v14 }
 0x40b   :  { %v8523_v29 = vpop.f32.mrb[11].mxu1  ;;  %v3783_v25 = vsel %vm648_vm2, %v10943_v40, -inf  ;;  %8652 = vmatprep.mubr.msk.bf16.mxu0 %vm9920_vm1, %v12900_v14  ;;  %8668 = vmatprep.subr.bf16.mxu1 %v12900_v14 }
 0x40c   :  { %3784 = vmax.xlane.f32.xlu0 %v3783_v25  ;;  %8662 = vmatprep.subr.bf16.mxu0 %v12900_v14 }
 0x410   :  { %v737_v54 = vpop.f32.mrb[12].mxu1  ;;  %8659 = vmatmul.mubr.msk.bf16.vlgmr.msra.gmra.mrb[60].mxu1 %vm648_vm2, %v10603_v7  ;;  %v1949_v7 = vsel %vm648_vm2, %v10817_v34, 0  ;;  %v1992_v34 = vpop.permute.xlu0 %1991 }
 0x411   :  { %v10961_v62 = vmul.f32 0.35355338, %v737_v54  ;;  %v8528_v37 = vpop.f32.mrb[13].mxu1  ;;  %8653 = vmatmul.mubr.msk.bf16.vlgmr.msra.gmra.mrb[44].mxu0 %vm648_vm2, %v10607_v55  ;;  %8669 = vmatpush3.bf16.xpose.msra.mxu1 %v1853_v36 }
 0x412   :  { %v740_v43 = vpop.f32.mrb[14].mxu1  ;;  %8663 = vmatpush3.bf16.xpose.msra.mxu0 %v1805_v45  ;;  %8670 = vmatprep.mubr.msk.bf16.mxu1 %vm9920_vm1, %v12900_v14 }
 0x413   :  { %v8529_v56 = vpop.f32.mrb[15].mxu1  ;;  %v3786_v42 = vsel %vm648_vm2, %v10961_v62, -inf  ;;  %8664 = vmatprep.mubr.msk.bf16.mxu0 %vm9920_vm1, %v12900_v14  ;;  %8680 = vmatprep.subr.bf16.mxu1 %v12900_v14 }
 0x414   :  { %3787 = vmax.xlane.f32.xlu1 %v3786_v42  ;;  %8674 = vmatprep.subr.bf16.mxu0 %v12900_v14  ;;  %v2376_v37 = vpop.permute.xlu0 %2375  ;;  %v2525_v56 = vsel %vm648_vm2, %v10915_v20, 0  ;;  %v2477_v42 = vsel %vm648_vm2, %v10917_v5, 0  ;;  %v2621_v20 = vsel %vm648_vm2, %v10879_v53, 0  ;;  %v2573_v5 = vsel %vm648_vm2, %v10884_v15, 0 }
 0x415   :  { %v2717_v15 = vsel %vm648_vm2, %v10837_v26, 0 }
 0x418   :  { %v10975_v55 = vpop.f32.mrb[16].mxu1  ;;  %8671 = vmatmul.mubr.msk.bf16.vlgmr.msra.gmra.mrb[64].mxu1 %vm648_vm2, %v10522_v47  ;;  %v2040_v47 = vpop.permute.xlu1 %2039 }
 0x419   :  { %v8534_v61 = vpop.f32.mrb[17].mxu1  ;;  %8665 = vmatmul.mubr.msk.bf16.vlgmr.msra.gmra.mrb[48].mxu0 %vm648_vm2, %v10517_v63  ;;  %8681 = vmatpush3.bf16.xpose.msra.mxu1 %v1949_v7  ;;  %v2045_v24 = vsel %vm648_vm2, %v2040_v47, 0  ;;  %v1997_v63 = vsel %vm648_vm2, %v1992_v34, 0 }
 0x41a   :  { %v788_v44 = vpop.f32.mrb[18].mxu1  ;;  %8675 = vmatpush3.bf16.xpose.msra.mxu0 %v1901_v46  ;;  %8682 = vmatprep.mubr.msk.bf16.mxu1 %vm9920_vm1, %v12900_v14 }
 0x41b   :  { %v8535_v29 = vpop.f32.mrb[19].mxu1  ;;  %8676 = vmatprep.mubr.msk.bf16.mxu0 %vm9920_vm1, %v12900_v14  ;;  %8692 = vmatprep.subr.bf16.mxu1 %v12900_v14 }
 0x41c   :  { %8686 = vmatprep.subr.bf16.mxu0 %v12900_v14  ;;  %v2669_v29 = vsel %vm648_vm2, %v10841_v13, 0 }
 0x420   :  { %v10990_v25 = vpop.f32.mrb[20].mxu1  ;;  %8683 = vmatmul.mubr.msk.bf16.vlgmr.msra.gmra.mrb[68].mxu1 %vm648_vm2, %v10449_v11  ;;  %v2141_v11 = vsel %vm648_vm2, %v10911_v18, 0  ;;  %v2237_v18 = vsel %vm648_vm2, %v10867_v48, 0  ;;  %v2333_v48 = vsel %vm648_vm2, %v10827_v16, 0  ;;  %v2424_v16 = vpop.permute.xlu1 %2423 }
 0x421   :  { %v8540_v36 = vpop.f32.mrb[21].mxu1  ;;  %8677 = vmatmul.mubr.msk.bf16.vlgmr.msra.gmra.mrb[52].mxu0 %vm648_vm2, %v10447_v50  ;;  %8693 = vmatpush3.bf16.xpose.msra.mxu1 %v2045_v24  ;;  %v2093_v50 = vsel %vm648_vm2, %v10913_v9, 0  ;;  %v2189_v9 = vsel %vm648_vm2, %v10872_v8, 0  ;;  %v2285_v8 = vsel %vm648_vm2, %v10831_v49, 0  ;;  %v2429_v43 = vsel %vm648_vm2, %v2424_v16, 0 }
 0x422   :  { %v836_v54 = vpop.f32.mrb[22].mxu1  ;;  %8687 = vmatpush3.bf16.xpose.msra.mxu0 %v1997_v63  ;;  %8694 = vmatprep.mubr.msk.bf16.mxu1 %vm9920_vm1, %v12900_v14  ;;  %v2381_v49 = vsel %vm648_vm2, %v2376_v37, 0  ;;  %v11100_v36 = vmul.f32 0.35355338, %v10975_v55 }
 0x423   :  { %v8541_v45 = vpop.f32.mrb[23].mxu1  ;;  %8688 = vmatprep.mubr.msk.bf16.mxu0 %vm9920_vm1, %v12900_v14  ;;  %8704 = vmatprep.subr.bf16.mxu1 %v12900_v14 }
 0x424   :  { %8698 = vmatprep.subr.bf16.mxu0 %v12900_v14  ;;  %v2808_v45 = vpop.permute.xlu1 %2807 }
 0x428   :  { %8695 = vmatmul.mubr.msk.bf16.vlgmr.msra.gmra.mrb[72].mxu1 %vm648_vm2, %v10703_v12 }
 0x429   :  { %8689 = vmatmul.mubr.msk.bf16.vlgmr.msra.gmra.mrb[56].mxu0 %vm648_vm2, %v10710_v41  ;;  %8705 = vmatpush3.bf16.xpose.msra.mxu1 %v2141_v11  ;;  %v2760_v11 = vpop.permute.xlu0 %2759 }
 0x42a   :  { %8699 = vmatpush3.bf16.xpose.msra.mxu0 %v2093_v50  ;;  %8706 = vmatprep.mubr.msk.bf16.mxu1 %vm9920_vm1, %v12900_v14  ;;  %v2765_v37 = vsel %vm648_vm2, %v2760_v11, 0 }
 0x42b   :  { %8700 = vmatprep.mubr.msk.bf16.mxu0 %vm9920_vm1, %v12900_v14  ;;  %8716 = vmatprep.subr.bf16.mxu1 %v12900_v14 }
 0x42c   :  { %8710 = vmatprep.subr.bf16.mxu0 %v12900_v14 }
 0x430   :  { %8707 = vmatmul.mubr.msk.bf16.vlgmr.msra.gmra.mrb[76].mxu1 %vm648_vm2, %v10619_v0 }
 0x431   :  { %8701 = vmatmul.mubr.msk.bf16.vlgmr.msra.gmra.mrb[60].mxu0 %vm648_vm2, %v10623_v39  ;;  %8717 = vmatpush3.bf16.xpose.msra.mxu1 %v2237_v18 }
 0x432   :  { %8711 = vmatpush3.bf16.xpose.msra.mxu0 %v2189_v9  ;;  %8718 = vmatprep.mubr.msk.bf16.mxu1 %vm9920_vm1, %v12900_v14  ;;  %v3789_v9 = vsel %vm648_vm2, %v11100_v36, -inf }
 0x433   :  { %8712 = vmatprep.mubr.msk.bf16.mxu0 %vm9920_vm1, %v12900_v14  ;;  %8728 = vmatprep.subr.bf16.mxu1 %v12900_v14 }
 0x434   :  { %8722 = vmatprep.subr.bf16.mxu0 %v12900_v14 }
 0x438   :  { %8719 = vmatmul.mubr.msk.bf16.vlgmr.msra.gmra.mrb[80].mxu1 %vm648_vm2, %v10533_v3 }
 0x439   :  { %8713 = vmatmul.mubr.msk.bf16.vlgmr.msra.gmra.mrb[64].mxu0 %vm648_vm2, %v10531_v2  ;;  %8729 = vmatpush3.bf16.xpose.msra.mxu1 %v2333_v48  ;;  %v2813_v48 = vsel %vm648_vm2, %v2808_v45, 0 }
 0x43a   :  { %8723 = vmatpush3.bf16.xpose.msra.mxu0 %v2285_v8  ;;  %8730 = vmatprep.mubr.msk.bf16.mxu1 %vm9920_vm1, %v12900_v14 }
 0x43b   :  { %8724 = vmatprep.mubr.msk.bf16.mxu0 %vm9920_vm1, %v12900_v14  ;;  %8740 = vmatprep.subr.bf16.mxu1 %v12900_v14 }
 0x43c   :  { %8734 = vmatprep.subr.bf16.mxu0 %v12900_v14 }
 0x440   :  { %8731 = vmatmul.mubr.msk.bf16.vlgmr.msra.gmra.mrb[84].mxu1 %vm648_vm2, %v10457_v52 }
 0x441   :  { %8725 = vmatmul.mubr.msk.bf16.vlgmr.msra.gmra.mrb[68].mxu0 %vm648_vm2, %v10455_v51  ;;  %8741 = vmatpush3.bf16.xpose.msra.mxu1 %v2429_v43 }
 0x442   :  { %8735 = vmatpush3.bf16.xpose.msra.mxu0 %v2381_v49  ;;  %8742 = vmatprep.mubr.msk.bf16.mxu1 %vm9920_vm1, %v12900_v14 }
 0x443   :  { %8736 = vmatprep.mubr.msk.bf16.mxu0 %vm9920_vm1, %v12900_v14  ;;  %8752 = vmatprep.subr.bf16.mxu1 %v12900_v14 }
 0x444   :  { %8746 = vmatprep.subr.bf16.mxu0 %v12900_v14 }
 0x448   :  { %8743 = vmatmul.mubr.msk.bf16.vlgmr.msra.gmra.mrb[88].mxu1 %vm648_vm2, %v10715_v19 }
 0x449   :  { %8737 = vmatmul.mubr.msk.bf16.vlgmr.msra.gmra.mrb[72].mxu0 %vm648_vm2, %v10723_v22  ;;  %8753 = vmatpush3.bf16.xpose.msra.mxu1 %v2525_v56 }
 0x44a   :  { %8747 = vmatpush3.bf16.xpose.msra.mxu0 %v2477_v42  ;;  %8754 = vmatprep.mubr.msk.bf16.mxu1 %vm9920_vm1, %v12900_v14 }
 0x44b   :  { %8748 = vmatprep.mubr.msk.bf16.mxu0 %vm9920_vm1, %v12900_v14  ;;  %8764 = vmatprep.subr.bf16.mxu1 %v12900_v14 }
 0x44c   :  { %8758 = vmatprep.subr.bf16.mxu0 %v12900_v14 }
 0x450   :  { %8755 = vmatmul.mubr.msk.bf16.vlgmr.msra.gmra.mrb[92].mxu1 %vm648_vm2, %v10627_v1 }
 0x451   :  { %8749 = vmatmul.mubr.msk.bf16.vlgmr.msra.gmra.mrb[76].mxu0 %vm648_vm2, %v10631_v58  ;;  %8765 = vmatpush3.bf16.xpose.msra.mxu1 %v2621_v20 }
 0x452   :  { %8759 = vmatpush3.bf16.xpose.msra.mxu0 %v2573_v5  ;;  %8766 = vmatprep.mubr.msk.bf16.mxu1 %vm9920_vm1, %v12900_v14  ;;  %v11125_v5 = vmul.f32 0.35355338, %v10990_v25 }
 0x453   :  { %8760 = vmatprep.mubr.msk.bf16.mxu0 %vm9920_vm1, %v12900_v14  ;;  %8776 = vmatprep.subr.bf16.mxu1 %v12900_v14 }
 0x454   :  { %8770 = vmatprep.subr.bf16.mxu0 %v12900_v14 }
 0x456   :  { %v929_v53 = vpop.f32.mrb[24].mxu1 }
 0x457   :  { %v11085_v7 = vmul.f32 0.35355338, %v929_v53  ;;  %v8552_v46 = vpop.f32.mrb[25].mxu1 }
 0x458   :  { %v881_v61 = vpop.f32.mrb[8].mxu0  ;;  %v932_v44 = vpop.f32.mrb[26].mxu1  ;;  %8767 = vmatmul.mubr.msk.bf16.vlgmr.msra.gmra.mrb[96].mxu1 %vm648_vm2, %v10545_v6 }
 0x459   :  { %v11093_v47 = vmul.f32 0.35355338, %v881_v61  ;;  %v8546_v34 = vpop.f32.mrb[9].mxu0  ;;  %v8553_v24 = vpop.f32.mrb[27].mxu1  ;;  %8761 = vmatmul.mubr.msk.bf16.vlgmr.msra.gmra.mrb[80].mxu0 %vm648_vm2, %v10539_v4  ;;  %8777 = vmatpush3.bf16.xpose.msra.mxu1 %v2717_v15  ;;  %v3798_v63 = vsel %vm648_vm2, %v11085_v7, -inf  ;;  %v3792_v44 = vsel %vm648_vm2, %v11125_v5, -inf }
 0x45a   :  { %3799 = vmax.xlane.f32.xlu1 %v3798_v63  ;;  %v884_v26 = vpop.f32.mrb[10].mxu0  ;;  %8771 = vmatpush3.bf16.xpose.msra.mxu0 %v2669_v29  ;;  %v2909_v29 = vsel %vm648_vm2, %v10919_v21, 0  ;;  %v2861_v63 = vsel %vm648_vm2, %v10921_v17, 0 }
 0x45b   :  { %v8547_v54 = vpop.f32.mrb[11].mxu0  ;;  %v3795_v13 = vsel %vm648_vm2, %v11093_v47, -inf  ;;  %8778 = vmatprep.mubr.msk.bf16.mxu1 %vm9920_vm1, %v12900_v14  ;;  %8788 = vmatprep.subr.bf16.mxu1 %v12900_v14 }
 0x45c   :  { %3796 = vmax.xlane.f32.xlu0 %v3795_v13  ;;  %8772 = vmatprep.mubr.msk.bf16.mxu0 %vm9920_vm1, %v12900_v14 }
 0x45d   :  { %8782 = vmatprep.subr.bf16.mxu0 %v12900_v14 }
 0x45e   :  { %v1025_v50 = vpop.f32.mrb[28].mxu1 }
 0x45f   :  { %v11110_v55 = vmul.f32 0.35355338, %v1025_v50  ;;  %v8564_v18 = vpop.f32.mrb[29].mxu1 }
 0x460   :  { %v977_v8 = vpop.f32.mrb[12].mxu0  ;;  %v1028_v16 = vpop.f32.mrb[30].mxu1  ;;  %8779 = vmatmul.mubr.msk.bf16.vlgmr.msra.gmra.mrb[100].mxu1 %vm648_vm2, %v10465_v28  ;;  %3790 = vmax.xlane.f32.xlu0 %v3789_v9 }
 0x461   :  { %v11118_v43 = vmul.f32 0.35355338, %v977_v8  ;;  %v8558_v49 = vpop.f32.mrb[13].mxu0  ;;  %v8565_v56 = vpop.f32.mrb[31].mxu1  ;;  %8773 = vmatmul.mubr.msk.bf16.vlgmr.msra.gmra.mrb[84].mxu0 %vm648_vm2, %v10463_v23  ;;  %8789 = vmatpush3.bf16.xpose.msra.mxu1 %v2813_v48  ;;  %v3804_v42 = vsel %vm648_vm2, %v11110_v55, -inf  ;;  %v3005_v48 = vsel %vm648_vm2, %v10887_v32, 0 }
 0x462   :  { %3805 = vmax.xlane.f32.xlu1 %v3804_v42  ;;  %v980_v20 = vpop.f32.mrb[14].mxu0  ;;  %8783 = vmatpush3.bf16.xpose.msra.mxu0 %v2765_v37  ;;  %v2957_v37 = vsel %vm648_vm2, %v10891_v27, 0 }
 0x463   :  { %v8559_v53 = vpop.f32.mrb[15].mxu0  ;;  %v3801_v46 = vsel %vm648_vm2, %v11118_v43, -inf  ;;  %8790 = vmatprep.mubr.msk.bf16.mxu1 %vm9920_vm1, %v12900_v14  ;;  %8800 = vmatprep.subr.bf16.mxu1 %v12900_v14 }
 0x464   :  { %3802 = vmax.xlane.f32.xlu0 %v3801_v46  ;;  %8784 = vmatprep.mubr.msk.bf16.mxu0 %vm9920_vm1, %v12900_v14 }
 0x465   :  { %8794 = vmatprep.subr.bf16.mxu0 %v12900_v14 }
 0x466   :  { %v1121_v15 = vpop.f32.mrb[32].mxu1 }
 0x467   :  { %v11135_v61 = vmul.f32 0.35355338, %v1121_v15  ;;  %v8576_v25 = vpop.f32.mrb[33].mxu1 }
 0x468   :  { %v1073_v34 = vpop.f32.mrb[16].mxu0  ;;  %v1124_v24 = vpop.f32.mrb[34].mxu1  ;;  %8791 = vmatmul.mubr.msk.bf16.vlgmr.msra.gmra.mrb[104].mxu1 %vm648_vm2, %v10733_v57  ;;  %3793 = vmax.xlane.f32.xlu0 %v3792_v44  ;;  %v3101_v44 = vsel %vm648_vm2, %v10843_v30, 0 }
 0x469   :  { %v11145_v26 = vmul.f32 0.35355338, %v1073_v34  ;;  %v8570_v54 = vpop.f32.mrb[17].mxu0  ;;  %v8577_v13 = vpop.f32.mrb[35].mxu1  ;;  %8785 = vmatmul.mubr.msk.bf16.vlgmr.msra.gmra.mrb[88].mxu0 %vm648_vm2, %v10740_v33  ;;  %8801 = vmatpush3.bf16.xpose.msra.mxu1 %v2909_v29  ;;  %v3810_v21 = vsel %vm648_vm2, %v11135_v61, -inf  ;;  %v3053_v24 = vsel %vm648_vm2, %v10845_v10, 0 }
 0x46a   :  { %3811 = vmax.xlane.f32.xlu1 %v3810_v21  ;;  %v1076_v45 = vpop.f32.mrb[18].mxu0  ;;  %8795 = vmatpush3.bf16.xpose.msra.mxu0 %v2861_v63  ;;  %v12929_v21 = vld [vmem:[#allocation35_spill] sm:$0xff]  ;;  %v3192_v10 = vpop.permute.xlu1 %3191 }
 0x46b   :  { %v8571_v11 = vpop.f32.mrb[19].mxu0  ;;  %v3807_v50 = vsel %vm648_vm2, %v11145_v26, -inf  ;;  %8802 = vmatprep.mubr.msk.bf16.mxu1 %vm9920_vm1, %v12900_v14  ;;  %8796 = vmatprep.mubr.msk.bf16.mxu0 %vm9920_vm1, %v12900_v14 }
 0x46c   :  { %3808 = vmax.xlane.f32.xlu0 %v3807_v50  ;;  %8812 = vmatprep.subr.bf16.mxu1 %v12900_v14 }
 0x46d   :  { %8806 = vmatprep.subr.bf16.mxu0 %v12900_v14 }
 0x46e   :  { %v1217_v17 = vpop.f32.mrb[36].mxu1 }
 0x46f   :  { %v11159_v18 = vmul.f32 0.35355338, %v1217_v17  ;;  %v8588_v9 = vpop.f32.mrb[37].mxu1  ;;  %v3144_v17 = vpop.permute.xlu0 %3143 }
 0x470   :  { %v1169_v8 = vpop.f32.mrb[20].mxu0  ;;  %v1220_v16 = vpop.f32.mrb[38].mxu1  ;;  %8803 = vmatmul.mubr.msk.bf16.vlgmr.msra.gmra.mrb[108].mxu1 %vm648_vm2, %v10635_v59 }
 0x471   :  { %v11167_v49 = vmul.f32 0.35355338, %v1169_v8  ;;  %v8582_v56 = vpop.f32.mrb[21].mxu0  ;;  %v8589_v42 = vpop.f32.mrb[39].mxu1  ;;  %8797 = vmatmul.mubr.msk.bf16.vlgmr.msra.gmra.mrb[92].mxu0 %vm648_vm2, %v10639_v60  ;;  %8813 = vmatpush3.bf16.xpose.msra.mxu1 %v3005_v48  ;;  %v3816_v20 = vsel %vm648_vm2, %v11159_v18, -inf  ;;  %v3197_v16 = vsel %vm648_vm2, %v3192_v10, 0 }
 0x472   :  { %3817 = vmax.xlane.f32.xlu1 %v3816_v20  ;;  %v1172_v32 = vpop.f32.mrb[22].mxu0  ;;  %8807 = vmatpush3.bf16.xpose.msra.mxu0 %v2957_v37  ;;  %v12930_v42 = vld [vmem:[#allocation24_spill] sm:$0xff]  ;;  %v3149_v20 = vsel %vm648_vm2, %v3144_v17, 0  ;;  %v12937_v10 = vld [vmem:[#allocation74_spill] sm:$0xff] }
 0x473   :  { %v8583_v53 = vpop.f32.mrb[23].mxu0  ;;  %v3813_v46 = vsel %vm648_vm2, %v11167_v49, -inf  ;;  %8814 = vmatprep.mubr.msk.bf16.mxu1 %vm9920_vm1, %v12900_v14  ;;  %8808 = vmatprep.mubr.msk.bf16.mxu0 %vm9920_vm1, %v12900_v14  ;;  %v3341_v17 = vsel %vm648_vm2, %v12937_v10, 0 }
 0x474   :  { %3814 = vmax.xlane.f32.xlu0 %v3813_v46  ;;  %8824 = vmatprep.subr.bf16.mxu1 %v12900_v14 }
 0x475   :  { %8818 = vmatprep.subr.bf16.mxu0 %v12900_v14 }
 0x476   :  { %v1313_v27 = vpop.f32.mrb[40].mxu1 }
 0x477   :  { %v11181_v15 = vmul.f32 0.35355338, %v1313_v27  ;;  %v8600_v25 = vpop.f32.mrb[41].mxu1  ;;  %v12931_v27 = vld [vmem:[#allocation23_spill] sm:$0xff] }
 0x478   :  { %v1265_v29 = vpop.f32.mrb[24].mxu0  ;;  %v1316_v34 = vpop.f32.mrb[42].mxu1  ;;  %8815 = vmatmul.mubr.msk.bf16.vlgmr.msra.gmra.mrb[112].mxu1 %vm648_vm2, %v10556_v31 }
 0x479   :  { %v11189_v63 = vmul.f32 0.35355338, %v1265_v29  ;;  %v8594_v54 = vpop.f32.mrb[25].mxu0  ;;  %v8601_v13 = vpop.f32.mrb[43].mxu1  ;;  %8809 = vmatmul.mubr.msk.bf16.vlgmr.msra.gmra.mrb[96].mxu0 %vm648_vm2, %v12929_v21  ;;  %8825 = vmatpush3.bf16.xpose.msra.mxu1 %v3101_v44  ;;  %v3822_v45 = vsel %vm648_vm2, %v11181_v15, -inf }
 0x47a   :  { %3823 = vmax.xlane.f32.xlu1 %v3822_v45  ;;  %v1268_v30 = vpop.f32.mrb[26].mxu0  ;;  %8819 = vmatpush3.bf16.xpose.msra.mxu0 %v3053_v24  ;;  %v3293_v24 = vsel %vm648_vm2, %v10923_v35, 0  ;;  %v12932_v54 = vld [vmem:[#allocation59_spill] sm:$0xff]  ;;  %v12935_v35 = vld [vmem:[#allocation73_spill] sm:$0xff] }
 0x47b   :  { %v8595_v11 = vpop.f32.mrb[27].mxu0  ;;  %v3819_v50 = vsel %vm648_vm2, %v11189_v63, -inf  ;;  %8826 = vmatprep.mubr.msk.bf16.mxu1 %vm9920_vm1, %v12900_v14  ;;  %8820 = vmatprep.mubr.msk.bf16.mxu0 %vm9920_vm1, %v12900_v14  ;;  %v12933_v13 = vld [vmem:[#allocation79_spill] sm:$0xff]  ;;  %v12934_v30 = vld [vmem:[#allocation60_spill] sm:$0xff] }
 0x47c   :  { %3820 = vmax.xlane.f32.xlu0 %v3819_v50  ;;  %8836 = vmatprep.subr.bf16.mxu1 %v12900_v14  ;;  %v3245_v45 = vsel %vm648_vm2, %v12933_v13, 0  ;;  %v3389_v11 = vsel %vm648_vm2, %v12935_v35, 0  ;;  %v12936_v50 = vld [vmem:[#allocation47_spill] sm:$0xff] }
 0x47d   :  { %8830 = vmatprep.subr.bf16.mxu0 %v12900_v14 }
 0x47e   :  { %v1409_v9 = vpop.f32.mrb[44].mxu1 }
 0x47f   :  { %v11203_v48 = vmul.f32 0.35355338, %v1409_v9  ;;  %v8612_v8 = vpop.f32.mrb[45].mxu1  ;;  %v12938_v9 = vld [vmem:[#allocation48_spill] sm:$0xff] }
 0x480   :  { %v1361_v37 = vpop.f32.mrb[28].mxu0  ;;  %v1412_v56 = vpop.f32.mrb[46].mxu1  ;;  %8827 = vmatmul.mubr.msk.bf16.vlgmr.msra.gmra.mrb[116].mxu1 %vm648_vm2, %v12930_v42  ;;  %v12939_v8 = vld [vmem:[#allocation67_spill] sm:$0xff] }
 0x481   :  { %v11209_v32 = vmul.f32 0.35355338, %v1361_v37  ;;  %v8606_v53 = vpop.f32.mrb[29].mxu0  ;;  %v8613_v46 = vpop.f32.mrb[47].mxu1  ;;  %8821 = vmatmul.mubr.msk.bf16.vlgmr.msra.gmra.mrb[100].mxu0 %vm648_vm2, %v12931_v27  ;;  %8837 = vmatpush3.bf16.xpose.msra.mxu1 %v3197_v16  ;;  %v3828_v25 = vsel %vm648_vm2, %v11203_v48, -inf  ;;  %v3485_v16 = vsel %vm648_vm2, %v12939_v8, 0 }
 0x482   :  { %3829 = vmax.xlane.f32.xlu1 %v3828_v25  ;;  %v1364_v44 = vpop.f32.mrb[30].mxu0  ;;  %8831 = vmatpush3.bf16.xpose.msra.mxu0 %v3149_v20  ;;  %v12940_v37 = vld [vmem:[#allocation38_spill] sm:$0xff]  ;;  %v12941_v56 = vld [vmem:[#allocation68_spill] sm:$0xff]  ;;  %v12942_v53 = vld [vmem:[#allocation37_spill] sm:$0xff]  ;;  %v3576_v46 = vpop.permute.xlu1 %3575 }
 0x483   :  { %v8607_v29 = vpop.f32.mrb[31].mxu0  ;;  %v3825_v34 = vsel %vm648_vm2, %v11209_v32, -inf  ;;  %8838 = vmatprep.mubr.msk.bf16.mxu1 %vm9920_vm1, %v12900_v14  ;;  %8832 = vmatprep.mubr.msk.bf16.mxu0 %vm9920_vm1, %v12900_v14  ;;  %v3437_v20 = vsel %vm648_vm2, %v12941_v56, 0  ;;  %v3528_v25 = vpop.permute.xlu0 %3527 }
 0x484   :  { %3826 = vmax.xlane.f32.xlu0 %v3825_v34  ;;  %8848 = vmatprep.subr.bf16.mxu1 %v12900_v14  ;;  %v3581_v29 = vsel %vm648_vm2, %v3576_v46, 0  ;;  %v3533_v35 = vsel %vm648_vm2, %v3528_v25, 0 }
 0x485   :  { %8842 = vmatprep.subr.bf16.mxu0 %v12900_v14 }
 0x488   :  { %8839 = vmatmul.mubr.msk.bf16.vlgmr.msra.gmra.mrb[120].mxu1 %vm648_vm2, %v12932_v54 }
 0x489   :  { %8833 = vmatmul.mubr.msk.bf16.vlgmr.msra.gmra.mrb[104].mxu0 %vm648_vm2, %v12934_v30  ;;  %8849 = vmatpush3.bf16.xpose.msra.mxu1 %v3293_v24 }
 0x48a   :  { %8843 = vmatpush3.bf16.xpose.msra.mxu0 %v3245_v45  ;;  %8850 = vmatprep.mubr.msk.bf16.mxu1 %vm9920_vm1, %v12900_v14  ;;  %v12943_v45 = vld [vmem:[#allocation26_spill] sm:$0xff] }
 0x48b   :  { %8844 = vmatprep.mubr.msk.bf16.mxu0 %vm9920_vm1, %v12900_v14  ;;  %8860 = vmatprep.subr.bf16.mxu1 %v12900_v14 }
 0x48c   :  { %8854 = vmatprep.subr.bf16.mxu0 %v12900_v14 }
 0x490   :  { %8851 = vmatmul.mubr.msk.bf16.vlgmr.msra.gmra.mrb[124].mxu1 %vm648_vm2, %v12936_v50 }
 0x491   :  { %8845 = vmatmul.mubr.msk.bf16.vlgmr.msra.gmra.mrb[108].mxu0 %vm648_vm2, %v12938_v9  ;;  %8861 = vmatpush3.bf16.xpose.msra.mxu1 %v3389_v11 }
 0x492   :  { %8855 = vmatpush3.bf16.xpose.msra.mxu0 %v3341_v17  ;;  %8862 = vmatprep.mubr.msk.bf16.mxu1 %vm9920_vm1, %v12900_v14  ;;  %v12944_v17 = vld [vmem:[#allocation25_spill] sm:$0xff] }
 0x493   :  { %8856 = vmatprep.mubr.msk.bf16.mxu0 %vm9920_vm1, %v12900_v14  ;;  %8872 = vmatprep.subr.bf16.mxu1 %v12900_v14 }
 0x494   :  { %8866 = vmatprep.subr.bf16.mxu0 %v12900_v14 }
 0x498   :  { %8863 = vmatmul.mubr.msk.bf16.vlgmr.msra.gmra.mrb[128].mxu1 %vm648_vm2, %v12940_v37 }
 0x499   :  { %8857 = vmatmul.mubr.msk.bf16.vlgmr.msra.gmra.mrb[112].mxu0 %vm648_vm2, %v12942_v53  ;;  %8873 = vmatpush3.bf16.xpose.msra.mxu1 %v3485_v16 }
 0x49a   :  { %8867 = vmatpush3.bf16.xpose.msra.mxu0 %v3437_v20  ;;  %8874 = vmatprep.mubr.msk.bf16.mxu1 %vm9920_vm1, %v12900_v14 }
 0x49b   :  { %8868 = vmatprep.mubr.msk.bf16.mxu0 %vm9920_vm1, %v12900_v14  ;;  %8884 = vmatprep.subr.bf16.mxu1 %v12900_v14 }
 0x49c   :  { %8878 = vmatprep.subr.bf16.mxu0 %v12900_v14 }
 0x49f   :  { %v1505_v44 = vpop.f32.mrb[48].mxu1 }
 0x4a0   :  { %v11266_v34 = vmul.f32 0.35355338, %v1505_v44  ;;  %v1457_v24 = vpop.f32.mrb[32].mxu0  ;;  %v8624_v13 = vpop.f32.mrb[49].mxu1  ;;  %8875 = vmatmul.mubr.msk.bf16.vlgmr.msra.gmra.mrb[132].mxu1 %vm648_vm2, %v12943_v45 }
 0x4a1   :  { %v11271_v11 = vmul.f32 0.35355338, %v1457_v24  ;;  %v1508_v10 = vpop.f32.mrb[50].mxu1  ;;  %8885 = vmatpush3.bf16.xpose.msra.mxu1 %v3581_v29  ;;  %8869 = vmatmul.mubr.msk.bf16.vlgmr.msra.gmra.mrb[116].mxu0 %vm648_vm2, %v12944_v17  ;;  %v8618_v8 = vpop.f32.mrb[33].mxu0  ;;  %v12945_v29 = vld [vmem:[#allocation80_spill] sm:$0xff] }
 0x4a2   :  { %v8625_v16 = vpop.f32.mrb[51].mxu1  ;;  %8879 = vmatpush3.bf16.xpose.msra.mxu0 %v3533_v35  ;;  %v3834_v56 = vsel %vm648_vm2, %v11266_v34, -inf  ;;  %8886 = vmatprep.mubr.msk.bf16.mxu1 %vm9920_vm1, %v12900_v14  ;;  %v1460_v20 = vpop.f32.mrb[34].mxu0  ;;  %v3677_v24 = vsel %vm648_vm2, %v12945_v29, 0  ;;  %v12946_v8 = vld [vmem:[#allocation61_spill] sm:$0xff] }
 0x4a3   :  { %3835 = vmax.xlane.f32.xlu1 %v3834_v56  ;;  %v3831_v46 = vsel %vm648_vm2, %v11271_v11, -inf  ;;  %8880 = vmatprep.mubr.msk.bf16.mxu0 %vm9920_vm1, %v12900_v14  ;;  %v8619_v25 = vpop.f32.mrb[35].mxu0  ;;  %v3629_v16 = vsel %vm648_vm2, %v10929_v38, 0 }
 0x4a4   :  { %3832 = vmax.xlane.f32.xlu0 %v3831_v46  ;;  %8896 = vmatprep.subr.bf16.mxu1 %v12900_v14  ;;  %v12947_v25 = vld [vmem:[#allocation62_spill] sm:$0xff] }
 0x4a5   :  { %8890 = vmatprep.subr.bf16.mxu0 %v12900_v14 }
 0x4a7   :  { %v1601_v44 = vpop.f32.mrb[52].mxu1 }
 0x4a8   :  { %v11287_v13 = vmul.f32 0.35355338, %v1601_v44  ;;  %v1553_v35 = vpop.f32.mrb[36].mxu0  ;;  %v8636_v10 = vpop.f32.mrb[53].mxu1  ;;  %8887 = vmatmul.mubr.msk.bf16.vlgmr.msra.gmra.mrb[136].mxu1 %vm648_vm2, %v12946_v8 }
 0x4a9   :  { %v11293_v56 = vmul.f32 0.35355338, %v1553_v35  ;;  %v8630_v20 = vpop.f32.mrb[37].mxu0  ;;  %v1604_v46 = vpop.f32.mrb[54].mxu1  ;;  %8881 = vmatmul.mubr.msk.bf16.vlgmr.msra.gmra.mrb[120].mxu0 %vm648_vm2, %v12947_v25  ;;  %8897 = vmatpush3.bf16.xpose.msra.mxu1 %v3677_v24  ;;  %v12949_v35 = vld [vmem:[#allocation49_spill] sm:$0xff] }
 0x4aa   :  { %v1556_v45 = vpop.f32.mrb[38].mxu0  ;;  %v8637_v29 = vpop.f32.mrb[55].mxu1  ;;  %8891 = vmatpush3.bf16.xpose.msra.mxu0 %v3629_v16  ;;  %v3840_v44 = vsel %vm648_vm2, %v11287_v13, -inf  ;;  %8898 = vmatprep.mubr.msk.bf16.mxu1 %vm9920_vm1, %v12900_v14  ;;  %v12950_v16 = vld [vmem:[#allocation39_spill] sm:$0xff]  ;;  %v12951_v46 = vld [vmem:[#allocation50_spill] sm:$0xff] }
 0x4ab   :  { %3841 = vmax.xlane.f32.xlu1 %v3840_v44  ;;  %v8631_v10 = vpop.f32.mrb[39].mxu0  ;;  %v3837_v38 = vsel %vm648_vm2, %v11293_v56, -inf  ;;  %8892 = vmatprep.mubr.msk.bf16.mxu0 %vm9920_vm1, %v12900_v14  ;;  %v12948_v45 = vld [vmem:[#allocation40_spill] sm:$0xff]  ;;  %v4558_v20 = vsel %vm4556_vm3, %v12950_v16, 0  ;;  %v11327_v8 = vpop.permute.xlu0 %5512 }
 0x4ac   :  { %3838 = vmax.xlane.f32.xlu0 %v3837_v38  ;;  %8908 = vmatprep.subr.bf16.mxu1 %v12900_v14  ;;  %v4606_v24 = vsel %vm4556_vm3, %v12948_v45, 0 }
 0x4ad   :  { %8902 = vmatprep.subr.bf16.mxu0 %v12900_v14 }
 0x4b0   :  { %8899 = vmatmul.mubr.msk.bf16.vlgmr.msra.gmra.mrb[140].mxu1 %vm648_vm2, %v12949_v35 }
 0x4b1   :  { %8893 = vmatmul.mubr.msk.bf16.vlgmr.msra.gmra.mrb[124].mxu0 %vm648_vm2, %v12951_v46  ;;  %8909 = vmatpush3.bf16.msra.mxu1 %v4606_v24 }
 0x4b2   :  { %8903 = vmatpush3.bf16.msra.mxu0 %v4558_v20  ;;  %8904 = vmatprep.mubr.msk.bf16.mxu0 %vm9920_vm1, %v12900_v14 }
 0x4b3   :  { %8914 = vmatprep.subr.bf16.mxu0 %v12900_v14  ;;  %8910 = vmatprep.mubr.msk.bf16.mxu1 %vm9920_vm1, %v12900_v14 }
 0x4b4   :  { %8920 = vmatprep.subr.bf16.mxu1 %v12900_v14 }
 0x4db   :  { %v1697_v29 = vpop.f32.mrb[56].mxu1 }
 0x4dc   :  { %v11321_v44 = vmul.f32 0.35355338, %v1697_v29  ;;  %v1649_v10 = vpop.f32.mrb[40].mxu0  ;;  %v8648_v38 = vpop.f32.mrb[57].mxu1 }
 0x4dd   :  { %v11323_v45 = vmul.f32 0.35355338, %v1649_v10  ;;  %v8642_v16 = vpop.f32.mrb[41].mxu0  ;;  %v1700_v24 = vpop.f32.mrb[58].mxu1 }
 0x4de   :  { %v1652_v20 = vpop.f32.mrb[42].mxu0  ;;  %v8649_v35 = vpop.f32.mrb[59].mxu1  ;;  %v3846_v46 = vsel %vm648_vm2, %v11321_v44, -inf }
 0x4df   :  { %3847 = vmax.xlane.f32.xlu1 %v3846_v46  ;;  %v8643_v25 = vpop.f32.mrb[43].mxu0  ;;  %v3843_v53 = vsel %vm648_vm2, %v11323_v45, -inf  ;;  %v11331_v29 = vpop.permute.xlu1 %5560 }
 0x4e0   :  { %3844 = vmax.xlane.f32.xlu0 %v3843_v53  ;;  %v3785_v38 = vpop.xlane.xlu0 %3784 }
 0x4e1   :  { %v3975_v9 = vsub.f32 %v10943_v40, %v3785_v38 }
 0x4e3   :  { %v1793_v10 = vpop.f32.mrb[60].mxu1  ;;  %v4039_v54 = vmul.f32 1.442695, %v3975_v9 }
 0x4e4   :  { %v11333_v17 = vmul.f32 0.35355338, %v1793_v10  ;;  %v1745_v16 = vpop.f32.mrb[44].mxu0  ;;  %v8660_v24 = vpop.f32.mrb[61].mxu1 }
 0x4e5   :  { %v11335_v35 = vmul.f32 0.35355338, %v1745_v16  ;;  %v8654_v20 = vpop.f32.mrb[45].mxu0  ;;  %v1796_v37 = vpop.f32.mrb[62].mxu1  ;;  %9485 = vpow2.f32 %v4039_v54 }
 0x4e6   :  { %v1748_v46 = vpop.f32.mrb[46].mxu0  ;;  %v8661_v25 = vpop.f32.mrb[63].mxu1  ;;  %v3852_v50 = vsel %vm648_vm2, %v11333_v17, -inf }
 0x4e7   :  { %3853 = vmax.xlane.f32.xlu1 %v3852_v50  ;;  %v8655_v53 = vpop.f32.mrb[47].mxu0  ;;  %v3849_v30 = vsel %vm648_vm2, %v11335_v35, -inf  ;;  %v3788_v24 = vpop.xlane.xlu1 %3787 }
 0x4e8   :  { %3850 = vmax.xlane.f32.xlu0 %v3849_v30  ;;  %v3976_v40 = vsub.f32 %v10961_v62, %v3788_v24 }
 0x4e9   :  { %v3797_v10 = vpop.xlane.xlu0 %3796 }
 0x4ea   :  { %v3979_v50 = vsub.f32 %v11093_v47, %v3797_v10  ;;  %v4041_v62 = vmul.f32 1.442695, %v3976_v40 }
 0x4eb   :  { %v1889_v16 = vpop.f32.mrb[64].mxu1 }
 0x4ec   :  { %v11342_v27 = vmul.f32 0.35355338, %v1889_v16  ;;  %v1841_v37 = vpop.f32.mrb[48].mxu0  ;;  %v8672_v20 = vpop.f32.mrb[65].mxu1  ;;  %v4047_v24 = vmul.f32 1.442695, %v3979_v50  ;;  %9487 = vpow2.f32 %v4041_v62 }
 0x4ed   :  { %v11345_v38 = vmul.f32 0.35355338, %v1841_v37  ;;  %v8666_v46 = vpop.f32.mrb[49].mxu0  ;;  %v1892_v25 = vpop.f32.mrb[66].mxu1 }
 0x4ee   :  { %v3791_v53 = vpop.xlane.xlu0 %3790  ;;  %v1844_v42 = vpop.f32.mrb[50].mxu0  ;;  %v3858_v30 = vsel %vm648_vm2, %v11342_v27, -inf  ;;  %9489 = vpow2.f32 %v4047_v24 }
 0x4ef   :  { %v8673_v9 = vpop.f32.mrb[67].mxu1  ;;  %3859 = vmax.xlane.f32.xlu1 %v3858_v30  ;;  %v3855_v16 = vsel %vm648_vm2, %v11345_v38, -inf  ;;  %v8667_v20 = vpop.f32.mrb[51].mxu0  ;;  %v3977_v30 = vsub.f32 %v11100_v36, %v3791_v53 }
 0x4f0   :  { %3856 = vmax.xlane.f32.xlu0 %v3855_v16  ;;  %v11361_v20 = vpop.eup %9485 }
 0x4f1   :  { %v4167_v36 = vsel %vm648_vm2, %v11361_v20, 0.0 }
 0x4f2   :  { %v3803_v37 = vpop.xlane.xlu0 %3802 }
 0x4f3   :  { %v1985_v46 = vpop.f32.mrb[68].mxu1 }
 0x4f4   :  { %v11352_v25 = vmul.f32 0.35355338, %v1985_v46  ;;  %v1937_v54 = vpop.f32.mrb[52].mxu0  ;;  %v8684_v47 = vpop.f32.mrb[69].mxu1 }
 0x4f5   :  { %v11354_v42 = vmul.f32 0.35355338, %v1937_v54  ;;  %v8678_v10 = vpop.f32.mrb[53].mxu0  ;;  %v1988_v21 = vpop.f32.mrb[70].mxu1  ;;  %v4043_v54 = vmul.f32 1.442695, %v3977_v30 }
 0x4f6   :  { %v1940_v9 = vpop.f32.mrb[54].mxu0  ;;  %v3864_v16 = vsel %vm648_vm2, %v11352_v25, -inf  ;;  %v8685_v40 = vpop.f32.mrb[71].mxu1  ;;  %v3981_v21 = vsub.f32 %v11118_v43, %v3803_v37 }
 0x4f7   :  { %3865 = vmax.xlane.f32.xlu1 %v3864_v16  ;;  %v3861_v50 = vsel %vm648_vm2, %v11354_v42, -inf  ;;  %v8679_v46 = vpop.f32.mrb[55].mxu0  ;;  %v3794_v62 = vpop.xlane.xlu0 %3793  ;;  %9491 = vpow2.f32 %v4043_v54 }
 0x4f8   :  { %3862 = vmax.xlane.f32.xlu0 %v3861_v50  ;;  %v4051_v46 = vmul.f32 1.442695, %v3981_v21  ;;  %v3978_v50 = vsub.f32 %v11125_v5, %v3794_v62  ;;  %v11373_v37 = vpop.eup %9487  ;;  %v3800_v62 = vpop.xlane.xlu1 %3799 }
 0x4fa   :  { %9493 = vpow2.f32 %v4051_v46  ;;  %v4045_v54 = vmul.f32 1.442695, %v3978_v50 }
 0x4fb   :  { %v2081_v24 = vpop.f32.mrb[72].mxu1 }
 0x4fc   :  { %v11366_v53 = vmul.f32 0.35355338, %v2081_v24  ;;  %v2033_v47 = vpop.f32.mrb[56].mxu0  ;;  %v8696_v10 = vpop.f32.mrb[73].mxu1  ;;  %4168 = vadd.xlane.f32.xlu0 %v4167_v36  ;;  %9495 = vpow2.f32 %v4045_v54 }
 0x4fd   :  { %v11368_v9 = vmul.f32 0.35355338, %v2033_v47  ;;  %v8690_v16 = vpop.f32.mrb[57].mxu0  ;;  %v2084_v40 = vpop.f32.mrb[74].mxu1 }
 0x4fe   :  { %v2036_v30 = vpop.f32.mrb[58].mxu0  ;;  %v8697_v31 = vpop.f32.mrb[75].mxu1  ;;  %v3870_v43 = vsel %vm648_vm2, %v11366_v53, -inf }
 0x4ff   :  { %v3809_v24 = vpop.xlane.xlu0 %3808  ;;  %3871 = vmax.xlane.f32.xlu1 %v3870_v43  ;;  %v8691_v60 = vpop.f32.mrb[59].mxu0  ;;  %v3867_v36 = vsel %vm648_vm2, %v11368_v9, -inf  ;;  %v4170_v31 = vsel %vm648_vm2, %v11373_v37, 0.0 }
 0x500   :  { %v11377_v47 = vpop.eup %9489  ;;  %3868 = vmax.xlane.f32.xlu0 %v3867_v36  ;;  %v3983_v5 = vsub.f32 %v11145_v26, %v3809_v24  ;;  %v3980_v26 = vsub.f32 %v11085_v7, %v3800_v62  ;;  %v3806_v54 = vpop.xlane.xlu1 %3805 }
 0x501   :  { %v4179_v10 = vsel %vm648_vm2, %v11377_v47, 0.0 }
 0x502   :  { %v4055_v43 = vmul.f32 1.442695, %v3983_v5 }
 0x503   :  { %v2177_v21 = vpop.f32.mrb[76].mxu1  ;;  %4171 = vadd.xlane.f32.xlu1 %v4170_v31  ;;  %v3815_v59 = vpop.xlane.xlu0 %3814 }
 0x504   :  { %v11384_v60 = vmul.f32 0.35355338, %v2177_v21  ;;  %v2129_v16 = vpop.f32.mrb[60].mxu0  ;;  %v8708_v40 = vpop.f32.mrb[77].mxu1  ;;  %4180 = vadd.xlane.f32.xlu0 %v4179_v10  ;;  %v4049_v10 = vmul.f32 1.442695, %v3980_v26  ;;  %9497 = vpow2.f32 %v4055_v43  ;;  %v3985_v7 = vsub.f32 %v11167_v49, %v3815_v59 }
 0x505   :  { %v11386_v30 = vmul.f32 0.35355338, %v2129_v16  ;;  %v8702_v46 = vpop.f32.mrb[61].mxu0  ;;  %v2180_v50 = vpop.f32.mrb[78].mxu1  ;;  %v3982_v26 = vsub.f32 %v11110_v55, %v3806_v54 }
 0x506   :  { %v2132_v24 = vpop.f32.mrb[62].mxu0  ;;  %v8709_v36 = vpop.f32.mrb[79].mxu1  ;;  %v3876_v31 = vsel %vm648_vm2, %v11384_v60, -inf  ;;  %9499 = vpow2.f32 %v4049_v10  ;;  %v4059_v43 = vmul.f32 1.442695, %v3985_v7 }
 0x507   :  { %v8703_v33 = vpop.f32.mrb[63].mxu0  ;;  %v3873_v21 = vsel %vm648_vm2, %v11386_v30, -inf  ;;  %v11393_v40 = vpop.eup %9491  ;;  %v4053_v10 = vmul.f32 1.442695, %v3982_v26 }
 0x508   :  { %3874 = vmax.xlane.f32.xlu1 %v3873_v21  ;;  %3877 = vmax.xlane.f32.xlu0 %v3876_v31  ;;  %v4173_v62 = vsel %vm648_vm2, %v11393_v40, 0.0  ;;  %v11398_v16 = vpop.eup %9493  ;;  %9501 = vpow2.f32 %v4059_v43  ;;  %v3812_v7 = vpop.xlane.xlu1 %3811 }
 0x509   :  { %v3821_v49 = vpop.xlane.xlu0 %3820  ;;  %9503 = vpow2.f32 %v4053_v10 }
 0x50a   :  { %v3987_v55 = vsub.f32 %v11189_v63, %v3821_v49  ;;  %v3984_v63 = vsub.f32 %v11135_v61, %v3812_v7 }
 0x50b   :  { %v2273_v5 = vpop.f32.mrb[80].mxu1 }
 0x50c   :  { %v2225_v46 = vpop.f32.mrb[64].mxu0  ;;  %v8720_v33 = vpop.f32.mrb[81].mxu1  ;;  %4174 = vadd.xlane.f32.xlu0 %v4173_v62  ;;  %v11403_v21 = vmul.f32 0.35355338, %v2273_v5  ;;  %v4185_v62 = vsel %vm648_vm2, %v11398_v16, 0.0 }
 0x50d   :  { %v11400_v50 = vmul.f32 0.35355338, %v2225_v46  ;;  %v8714_v24 = vpop.f32.mrb[65].mxu0  ;;  %v2276_v36 = vpop.f32.mrb[82].mxu1  ;;  %v4057_v10 = vmul.f32 1.442695, %v3984_v63 }
 0x50e   :  { %v2228_v31 = vpop.f32.mrb[66].mxu0  ;;  %v8721_v59 = vpop.f32.mrb[83].mxu1  ;;  %v3882_v5 = vsel %vm648_vm2, %v11403_v21, -inf }
 0x50f   :  { %v8715_v57 = vpop.f32.mrb[67].mxu0  ;;  %v3879_v23 = vsel %vm648_vm2, %v11400_v50, -inf  ;;  %v11409_v46 = vpop.eup %9495  ;;  %v4063_v31 = vmul.f32 1.442695, %v3987_v55 }
 0x510   :  { %3880 = vmax.xlane.f32.xlu1 %v3879_v23  ;;  %4186 = vadd.xlane.f32.xlu0 %v4185_v62  ;;  %v4176_v57 = vsel %vm648_vm2, %v11409_v46, 0.0  ;;  %v11416_v33 = vpop.eup %9497  ;;  %v3818_v55 = vpop.xlane.xlu1 %3817 }
 0x511   :  { %v3827_v62 = vpop.xlane.xlu0 %3826  ;;  %9505 = vpow2.f32 %v4063_v31 }
 0x512   :  { %v3989_v61 = vsub.f32 %v11209_v32, %v3827_v62  ;;  %9507 = vpow2.f32 %v4057_v10  ;;  %v3986_v32 = vsub.f32 %v11159_v18, %v3818_v55 }
 0x513   :  { %v2369_v54 = vpop.f32.mrb[84].mxu1 }
 0x514   :  { %v2321_v24 = vpop.f32.mrb[68].mxu0  ;;  %v8732_v36 = vpop.f32.mrb[85].mxu1  ;;  %3883 = vmax.xlane.f32.xlu0 %v3882_v5  ;;  %4177 = vadd.xlane.f32.xlu1 %v4176_v57  ;;  %v11421_v28 = vmul.f32 0.35355338, %v2369_v54  ;;  %v4191_v5 = vsel %vm648_vm2, %v11416_v33, 0.0 }
 0x515   :  { %v11418_v23 = vmul.f32 0.35355338, %v2321_v24  ;;  %v8726_v26 = vpop.f32.mrb[69].mxu0  ;;  %v2372_v43 = vpop.f32.mrb[86].mxu1  ;;  %v4067_v31 = vmul.f32 1.442695, %v3989_v61 }
 0x516   :  { %v2324_v59 = vpop.f32.mrb[70].mxu0  ;;  %v8733_v49 = vpop.f32.mrb[87].mxu1 }
 0x517   :  { %v8727_v4 = vpop.f32.mrb[71].mxu0  ;;  %v3885_v6 = vsel %vm648_vm2, %v11418_v23, -inf  ;;  %v11427_v57 = vpop.eup %9499  ;;  %9509 = vpow2.f32 %v4067_v31 }
 0x518   :  { %3886 = vmax.xlane.f32.xlu1 %v3885_v6  ;;  %4192 = vadd.xlane.f32.xlu0 %v4191_v5  ;;  %v4182_v54 = vsel %vm648_vm2, %v11427_v57, 0.0  ;;  %v3888_v4 = vsel %vm648_vm2, %v11421_v28, -inf  ;;  %v11434_v24 = vpop.eup %9501  ;;  %v3824_v10 = vpop.xlane.xlu1 %3823 }
 0x51b   :  { %v2465_v7 = vpop.f32.mrb[88].mxu1 }
 0x51c   :  { %v2417_v36 = vpop.f32.mrb[72].mxu0  ;;  %v8744_v26 = vpop.f32.mrb[89].mxu1  ;;  %4183 = vadd.xlane.f32.xlu1 %v4182_v54  ;;  %3889 = vmax.xlane.f32.xlu0 %v3888_v4  ;;  %v11439_v62 = vmul.f32 0.35355338, %v2465_v7  ;;  %v4197_v54 = vsel %vm648_vm2, %v11434_v24, 0.0 }
 0x51d   :  { %v11436_v6 = vmul.f32 0.35355338, %v2417_v36  ;;  %v8738_v43 = vpop.f32.mrb[73].mxu0  ;;  %v2468_v63 = vpop.f32.mrb[90].mxu1  ;;  %v4061_v36 = vmul.f32 1.442695, %v3986_v32  ;;  %v3988_v32 = vsub.f32 %v11181_v15, %v3824_v10 }
 0x51e   :  { %v2420_v59 = vpop.f32.mrb[74].mxu0  ;;  %v8745_v49 = vpop.f32.mrb[91].mxu1  ;;  %v3894_v55 = vsel %vm648_vm2, %v11439_v62, -inf }
 0x51f   :  { %v8739_v5 = vpop.f32.mrb[75].mxu0  ;;  %v3891_v58 = vsel %vm648_vm2, %v11436_v6, -inf  ;;  %v11445_v4 = vpop.eup %9503  ;;  %9511 = vpow2.f32 %v4061_v36 }
 0x520   :  { %3892 = vmax.xlane.f32.xlu1 %v3891_v58  ;;  %4198 = vadd.xlane.f32.xlu0 %v4197_v54  ;;  %v4188_v61 = vsel %vm648_vm2, %v11445_v4, 0.0  ;;  %v11451_v7 = vpop.eup %9505 }
 0x523   :  { %v2561_v18 = vpop.f32.mrb[92].mxu1 }
 0x524   :  { %v2513_v26 = vpop.f32.mrb[76].mxu0  ;;  %v8756_v43 = vpop.f32.mrb[93].mxu1  ;;  %4189 = vadd.xlane.f32.xlu1 %v4188_v61  ;;  %3895 = vmax.xlane.f32.xlu0 %v3894_v55  ;;  %v11456_v5 = vmul.f32 0.35355338, %v2561_v18  ;;  %v4065_v55 = vmul.f32 1.442695, %v3988_v32 }
 0x525   :  { %v11453_v63 = vmul.f32 0.35355338, %v2513_v26  ;;  %v8750_v58 = vpop.f32.mrb[77].mxu0  ;;  %v2564_v59 = vpop.f32.mrb[94].mxu1  ;;  %v4203_v43 = vsel %vm648_vm2, %v11451_v7, 0.0 }
 0x526   :  { %v2516_v31 = vpop.f32.mrb[78].mxu0  ;;  %v8757_v49 = vpop.f32.mrb[95].mxu1  ;;  %v3900_v10 = vsel %vm648_vm2, %v11456_v5, -inf  ;;  %9513 = vpow2.f32 %v4065_v55 }
 0x527   :  { %v8751_v54 = vpop.f32.mrb[79].mxu0  ;;  %v3897_v1 = vsel %vm648_vm2, %v11453_v63, -inf  ;;  %v11462_v61 = vpop.eup %9507 }
 0x528   :  { %3898 = vmax.xlane.f32.xlu1 %v3897_v1  ;;  %4204 = vadd.xlane.f32.xlu0 %v4203_v43  ;;  %v3830_v26 = vpop.xlane.xlu1 %3829  ;;  %v4194_v15 = vsel %vm648_vm2, %v11462_v61, 0.0  ;;  %v11468_v18 = vpop.eup %9509 }
 0x529   :  { %v3990_v32 = vsub.f32 %v11203_v48, %v3830_v26 }
 0x52b   :  { %v2657_v36 = vpop.f32.mrb[96].mxu1 }
 0x52c   :  { %v2609_v58 = vpop.f32.mrb[80].mxu0  ;;  %v8768_v59 = vpop.f32.mrb[97].mxu1  ;;  %4195 = vadd.xlane.f32.xlu1 %v4194_v15  ;;  %3901 = vmax.xlane.f32.xlu0 %v3900_v10  ;;  %v11473_v22 = vmul.f32 0.35355338, %v2657_v36  ;;  %v4069_v10 = vmul.f32 1.442695, %v3990_v32 }
 0x52d   :  { %v11470_v31 = vmul.f32 0.35355338, %v2609_v58  ;;  %v8762_v49 = vpop.f32.mrb[81].mxu0  ;;  %v2660_v1 = vpop.f32.mrb[98].mxu1  ;;  %v4209_v59 = vsel %vm648_vm2, %v11468_v18, 0.0 }
 0x52e   :  { %v2612_v54 = vpop.f32.mrb[82].mxu0  ;;  %v8769_v43 = vpop.f32.mrb[99].mxu1  ;;  %12953 = vst [vmem:[#allocation73_spill] sm:$0xff] %v11473_v22  ;;  %v3906_v55 = vsel %vm648_vm2, %v11473_v22, -inf  ;;  %9515 = vpow2.f32 %v4069_v10 }
 0x52f   :  { %12952 = vst [vmem:[#allocation79_spill] sm:$0xff] %v11470_v31  ;;  %v8763_v19 = vpop.f32.mrb[83].mxu0  ;;  %v3903_v51 = vsel %vm648_vm2, %v11470_v31, -inf  ;;  %v11479_v15 = vpop.eup %9511 }
 0x530   :  { %3904 = vmax.xlane.f32.xlu1 %v3903_v51  ;;  %4210 = vadd.xlane.f32.xlu0 %v4209_v59  ;;  %v4200_v48 = vsel %vm648_vm2, %v11479_v15, 0.0 }
 0x533   :  { %v2753_v58 = vpop.f32.mrb[100].mxu1 }
 0x534   :  { %v11485_v26 = vmul.f32 0.35355338, %v2753_v58  ;;  %v2705_v19 = vpop.f32.mrb[84].mxu0  ;;  %v8780_v36 = vpop.f32.mrb[101].mxu1  ;;  %4201 = vadd.xlane.f32.xlu1 %v4200_v48  ;;  %3907 = vmax.xlane.f32.xlu0 %v3906_v55 }
 0x535   :  { %v11487_v49 = vmul.f32 0.35355338, %v2705_v19  ;;  %v8774_v1 = vpop.f32.mrb[85].mxu0  ;;  %v2756_v54 = vpop.f32.mrb[102].mxu1 }
 0x536   :  { %12954 = vst [vmem:[#allocation74_spill] sm:$0xff] %v11485_v26  ;;  %v2708_v51 = vpop.f32.mrb[86].mxu0  ;;  %v8781_v32 = vpop.f32.mrb[103].mxu1  ;;  %v3912_v43 = vsel %vm648_vm2, %v11485_v26, -inf }
 0x537   :  { %12955 = vst [vmem:[#allocation67_spill] sm:$0xff] %v11487_v49  ;;  %v8775_v59 = vpop.f32.mrb[87].mxu0  ;;  %v3909_v52 = vsel %vm648_vm2, %v11487_v49, -inf  ;;  %v11493_v58 = vpop.eup %9513 }
 0x538   :  { %3910 = vmax.xlane.f32.xlu1 %v3909_v52  ;;  %3913 = vmax.xlane.f32.xlu0 %v3912_v43  ;;  %v4206_v55 = vsel %vm648_vm2, %v11493_v58, 0.0  ;;  %v11505_v26 = vpop.eup %9515 }
 0x53b   :  { %v2849_v48 = vpop.f32.mrb[104].mxu1 }
 0x53c   :  { %v11497_v19 = vmul.f32 0.35355338, %v2849_v48  ;;  %v2801_v10 = vpop.f32.mrb[88].mxu0  ;;  %v8792_v36 = vpop.f32.mrb[105].mxu1  ;;  %4207 = vadd.xlane.f32.xlu1 %v4206_v55  ;;  %v4212_v55 = vsel %vm648_vm2, %v11505_v26, 0.0 }
 0x53d   :  { %v11499_v1 = vmul.f32 0.35355338, %v2801_v10  ;;  %v8786_v54 = vpop.f32.mrb[89].mxu0  ;;  %v2852_v51 = vpop.f32.mrb[106].mxu1 }
 0x53e   :  { %12956 = vst [vmem:[#allocation68_spill] sm:$0xff] %v11497_v19  ;;  %v2804_v32 = vpop.f32.mrb[90].mxu0  ;;  %v8793_v59 = vpop.f32.mrb[107].mxu1  ;;  %v3918_v49 = vsel %vm648_vm2, %v11497_v19, -inf }
 0x53f   :  { %12957 = vst [vmem:[#allocation80_spill] sm:$0xff] %v11499_v1  ;;  %v8787_v52 = vpop.f32.mrb[91].mxu0  ;;  %3919 = vmax.xlane.f32.xlu0 %v3918_v49  ;;  %v3915_v43 = vsel %vm648_vm2, %v11499_v1, -inf }
 0x540   :  { %3916 = vmax.xlane.f32.xlu1 %v3915_v43 }
 0x543   :  { %v2945_v48 = vpop.f32.mrb[108].mxu1 }
 0x544   :  { %v11509_v10 = vmul.f32 0.35355338, %v2945_v48  ;;  %v2897_v36 = vpop.f32.mrb[92].mxu0  ;;  %v8804_v54 = vpop.f32.mrb[109].mxu1  ;;  %4213 = vadd.xlane.f32.xlu1 %v4212_v55 }
 0x545   :  { %v11511_v51 = vmul.f32 0.35355338, %v2897_v36  ;;  %v8798_v32 = vpop.f32.mrb[93].mxu0  ;;  %v2948_v59 = vpop.f32.mrb[110].mxu1 }
 0x546   :  { %12958 = vst [vmem:[#allocation40_spill] sm:$0xff] %v11509_v10  ;;  %v2900_v49 = vpop.f32.mrb[94].mxu0  ;;  %v8805_v52 = vpop.f32.mrb[111].mxu1  ;;  %v3924_v1 = vsel %vm648_vm2, %v11509_v10, -inf }
 0x547   :  { %12959 = vst [vmem:[#allocation39_spill] sm:$0xff] %v11511_v51  ;;  %v8799_v19 = vpop.f32.mrb[95].mxu0  ;;  %3925 = vmax.xlane.f32.xlu0 %v3924_v1  ;;  %v3921_v43 = vsel %vm648_vm2, %v11511_v51, -inf }
 0x548   :  { %3922 = vmax.xlane.f32.xlu1 %v3921_v43  ;;  %v3833_v19 = vpop.xlane.xlu0 %3832 }
 0x54b   :  { %v3041_v48 = vpop.f32.mrb[112].mxu1 }
 0x54c   :  { %v11517_v22 = vmul.f32 0.35355338, %v3041_v48  ;;  %v2993_v54 = vpop.f32.mrb[96].mxu0  ;;  %v8816_v55 = vpop.f32.mrb[113].mxu1 }
 0x54d   :  { %v11519_v36 = vmul.f32 0.35355338, %v2993_v54  ;;  %v8810_v32 = vpop.f32.mrb[97].mxu0  ;;  %v3044_v59 = vpop.f32.mrb[114].mxu1 }
 0x54e   :  { %12960 = vst [vmem:[#allocation83_spill] sm:$0xff] %v11517_v22  ;;  %v2996_v49 = vpop.f32.mrb[98].mxu0  ;;  %v8817_v52 = vpop.f32.mrb[115].mxu1  ;;  %v3930_v10 = vsel %vm648_vm2, %v11517_v22, -inf  ;;  %v3991_v59 = vsub.f32 %v11271_v11, %v3833_v19 }
 0x54f   :  { %12961 = vst [vmem:[#allocation84_spill] sm:$0xff] %v11519_v36  ;;  %v8811_v1 = vpop.f32.mrb[99].mxu0  ;;  %3931 = vmax.xlane.f32.xlu0 %v3930_v10  ;;  %v3927_v43 = vsel %vm648_vm2, %v11519_v36, -inf  ;;  %v3836_v48 = vpop.xlane.xlu1 %3835 }
 0x550   :  { %3928 = vmax.xlane.f32.xlu1 %v3927_v43  ;;  %v3839_v51 = vpop.xlane.xlu0 %3838  ;;  %v3992_v1 = vsub.f32 %v11266_v34, %v3836_v48 }
 0x551   :  { %v3993_v11 = vsub.f32 %v11293_v56, %v3839_v51 }
 0x552   :  { %v4073_v19 = vmul.f32 1.442695, %v3992_v1 }
 0x553   :  { %v3137_v31 = vpop.f32.mrb[116].mxu1  ;;  %v3842_v36 = vpop.xlane.xlu1 %3841 }
 0x554   :  { %v11525_v55 = vmul.f32 0.35355338, %v3137_v31  ;;  %v3089_v54 = vpop.f32.mrb[100].mxu0  ;;  %v8828_v32 = vpop.f32.mrb[117].mxu1 }
 0x555   :  { %v11528_v49 = vmul.f32 0.35355338, %v3089_v54  ;;  %v8822_v52 = vpop.f32.mrb[101].mxu0  ;;  %v3140_v22 = vpop.f32.mrb[118].mxu1  ;;  %v4071_v32 = vmul.f32 1.442695, %v3991_v59 }
 0x556   :  { %12962 = vst [vmem:[#allocation85_spill] sm:$0xff] %v11525_v55  ;;  %v3092_v10 = vpop.f32.mrb[102].mxu0  ;;  %v8829_v2 = vpop.f32.mrb[119].mxu1  ;;  %v3936_v43 = vsel %vm648_vm2, %v11525_v55, -inf  ;;  %v3994_v22 = vsub.f32 %v11287_v13, %v3842_v36  ;;  %v4075_v52 = vmul.f32 1.442695, %v3993_v11 }
 0x557   :  { %12963 = vst [vmem:[#allocation86_spill] sm:$0xff] %v11528_v49  ;;  %v8823_v3 = vpop.f32.mrb[103].mxu0  ;;  %3937 = vmax.xlane.f32.xlu0 %v3936_v43  ;;  %v3933_v31 = vsel %vm648_vm2, %v11528_v49, -inf  ;;  %9517 = vpow2.f32 %v4071_v32 }
 0x558   :  { %3934 = vmax.xlane.f32.xlu1 %v3933_v31  ;;  %9519 = vpow2.f32 %v4073_v19  ;;  %v4077_v49 = vmul.f32 1.442695, %v3994_v22 }
 0x559   :  { %9521 = vpow2.f32 %v4075_v52 }
 0x55a   :  { %9523 = vpow2.f32 %v4077_v49 }
 0x55b   :  { %v3233_v54 = vpop.f32.mrb[120].mxu1 }
 0x55c   :  { %v11537_v34 = vmul.f32 0.35355338, %v3233_v54  ;;  %v3185_v2 = vpop.f32.mrb[104].mxu0  ;;  %v8840_v48 = vpop.f32.mrb[121].mxu1 }
 0x55d   :  { %v11539_v10 = vmul.f32 0.35355338, %v3185_v2  ;;  %v8834_v3 = vpop.f32.mrb[105].mxu0  ;;  %v3236_v43 = vpop.f32.mrb[122].mxu1 }
 0x55e   :  { %12964 = vst [vmem:[#allocation87_spill] sm:$0xff] %v11537_v34  ;;  %v3188_v31 = vpop.f32.mrb[106].mxu0  ;;  %v8841_v59 = vpop.f32.mrb[123].mxu1  ;;  %v3942_v56 = vsel %vm648_vm2, %v11537_v34, -inf }
 0x55f   :  { %12965 = vst [vmem:[#allocation88_spill] sm:$0xff] %v11539_v10  ;;  %v8835_v51 = vpop.f32.mrb[107].mxu0  ;;  %3943 = vmax.xlane.f32.xlu0 %v3942_v56  ;;  %v3939_v13 = vsel %vm648_vm2, %v11539_v10, -inf }
 0x560   :  { %3940 = vmax.xlane.f32.xlu1 %v3939_v13 }
 0x561   :  { %v11551_v43 = vpop.eup %9517 }
 0x562   :  { %v11555_v52 = vpop.eup %9519  ;;  %v4215_v59 = vsel %vm648_vm2, %v11551_v43, 0.0 }
 0x563   :  { %v3329_v36 = vpop.f32.mrb[124].mxu1  ;;  %v11559_v56 = vpop.eup %9521  ;;  %v4218_v13 = vsel %vm648_vm2, %v11555_v52, 0.0 }
 0x564   :  { %v11545_v1 = vmul.f32 0.35355338, %v3329_v36  ;;  %v3281_v32 = vpop.f32.mrb[108].mxu0  ;;  %v8852_v11 = vpop.f32.mrb[125].mxu1 }
 0x565   :  { %v11547_v19 = vmul.f32 0.35355338, %v3281_v32  ;;  %v8846_v22 = vpop.f32.mrb[109].mxu0  ;;  %v3332_v54 = vpop.f32.mrb[126].mxu1 }
 0x566   :  { %12966 = vst [vmem:[#allocation89_spill] sm:$0xff] %v11545_v1  ;;  %v3284_v2 = vpop.f32.mrb[110].mxu0  ;;  %v8853_v48 = vpop.f32.mrb[127].mxu1  ;;  %v3948_v3 = vsel %vm648_vm2, %v11545_v1, -inf }
 0x567   :  { %12967 = vst [vmem:[#allocation90_spill] sm:$0xff] %v11547_v19  ;;  %v8847_v31 = vpop.f32.mrb[111].mxu0  ;;  %3949 = vmax.xlane.f32.xlu0 %v3948_v3  ;;  %v3945_v49 = vsel %vm648_vm2, %v11547_v19, -inf  ;;  %v11565_v36 = vpop.eup %9523 }
 0x568   :  { %3946 = vmax.xlane.f32.xlu1 %v3945_v49  ;;  %v4221_v31 = vsel %vm648_vm2, %v11559_v56, 0.0 }
 0x56b   :  { %v11561_v51 = vpop.f32.mrb[128].mxu1  ;;  %4216 = vadd.xlane.f32.xlu0 %v4215_v59 }
 0x56c   :  { %v8864_v32 = vpop.f32.mrb[129].mxu1  ;;  %v3848_v11 = vpop.xlane.xlu1 %3847  ;;  %4219 = vadd.xlane.f32.xlu1 %v4218_v13 }
 0x56d   :  { %v3996_v22 = vsub.f32 %v11321_v44, %v3848_v11  ;;  %v3377_v54 = vpop.f32.mrb[112].mxu0  ;;  %v3428_v2 = vpop.f32.mrb[130].mxu1  ;;  %v4224_v32 = vsel %vm648_vm2, %v11565_v36, 0.0 }
 0x56e   :  { %v8858_v48 = vpop.f32.mrb[113].mxu0  ;;  %v3845_v3 = vpop.xlane.xlu0 %3844 }
 0x56f   :  { %v4081_v49 = vmul.f32 1.442695, %v3996_v22  ;;  %v3995_v59 = vsub.f32 %v11323_v45, %v3845_v3  ;;  %v3380_v19 = vpop.f32.mrb[114].mxu0  ;;  %v8865_v1 = vpop.f32.mrb[131].mxu1  ;;  %4222 = vadd.xlane.f32.xlu0 %v4221_v31 }
 0x570   :  { %v8859_v10 = vpop.f32.mrb[115].mxu0  ;;  %4225 = vadd.xlane.f32.xlu1 %v4224_v32 }
 0x571   :  { %9525 = vpow2.f32 %v4081_v49  ;;  %v4079_v44 = vmul.f32 1.442695, %v3995_v59 }
 0x573   :  { %9527 = vpow2.f32 %v4079_v44  ;;  %v11573_v13 = vpop.f32.mrb[132].mxu1 }
 0x574   :  { %v8876_v11 = vpop.f32.mrb[133].mxu1  ;;  %v3854_v2 = vpop.xlane.xlu1 %3853 }
 0x575   :  { %v3998_v48 = vsub.f32 %v11333_v17, %v3854_v2  ;;  %v11576_v22 = vpop.f32.mrb[116].mxu0  ;;  %v3524_v45 = vpop.f32.mrb[134].mxu1 }
 0x576   :  { %v8870_v19 = vpop.f32.mrb[117].mxu0  ;;  %v3851_v1 = vpop.xlane.xlu0 %3850 }
 0x577   :  { %v4085_v3 = vmul.f32 1.442695, %v3998_v48  ;;  %v3997_v31 = vsub.f32 %v11335_v35, %v3851_v1  ;;  %v3476_v34 = vpop.f32.mrb[118].mxu0  ;;  %v8877_v10 = vpop.f32.mrb[135].mxu1 }
 0x578   :  { %v8871_v32 = vpop.f32.mrb[119].mxu0 }
 0x579   :  { %9529 = vpow2.f32 %v4085_v3  ;;  %v4083_v49 = vmul.f32 1.442695, %v3997_v31 }
 0x57b   :  { %v11579_v59 = vpop.eup %9525  ;;  %9531 = vpow2.f32 %v4083_v49  ;;  %v11581_v44 = vpop.f32.mrb[136].mxu1 }
 0x57c   :  { %12968 = vst [vmem:[#allocation91_spill] sm:$0xff] %v11581_v44  ;;  %v8888_v11 = vpop.f32.mrb[137].mxu1  ;;  %v3860_v17 = vpop.xlane.xlu1 %3859  ;;  %v4230_v2 = vsel %vm648_vm2, %v11579_v59, 0.0 }
 0x57d   :  { %v11585_v45 = vpop.eup %9527  ;;  %v4000_v48 = vsub.f32 %v11342_v27, %v3860_v17  ;;  %v11588_v35 = vpop.f32.mrb[120].mxu0  ;;  %4231 = vadd.xlane.f32.xlu1 %v4230_v2  ;;  %v11597_v17 = vmul.f32 0.35355338, %v3377_v54 }
 0x57e   :  { %v3620_v34 = vpop.f32.mrb[138].mxu1  ;;  %v8882_v19 = vpop.f32.mrb[121].mxu0  ;;  %v4227_v3 = vsel %vm648_vm2, %v11585_v45, 0.0 }
 0x57f   :  { %v3857_v1 = vpop.xlane.xlu0 %3856  ;;  %v4089_v31 = vmul.f32 1.442695, %v4000_v48  ;;  %v3572_v32 = vpop.f32.mrb[122].mxu0  ;;  %4228 = vadd.xlane.f32.xlu0 %v4227_v3  ;;  %12970 = vst [vmem:[#allocation93_spill] sm:$0xff] %v11597_v17 }
 0x580   :  { %v3999_v10 = vsub.f32 %v11345_v38, %v3857_v1  ;;  %v8889_v49 = vpop.f32.mrb[139].mxu1  ;;  %v8883_v11 = vpop.f32.mrb[123].mxu0 }
 0x581   :  { %9533 = vpow2.f32 %v4089_v31 }
 0x582   :  { %v4087_v55 = vmul.f32 1.442695, %v3999_v10 }
 0x583   :  { %v11593_v44 = vpop.eup %9529  ;;  %v11595_v27 = vpop.f32.mrb[140].mxu1 }
 0x584   :  { %9535 = vpow2.f32 %v4087_v55  ;;  %12969 = vst [vmem:[#allocation92_spill] sm:$0xff] %v11595_v27  ;;  %v8900_v2 = vpop.f32.mrb[141].mxu1  ;;  %v3866_v34 = vpop.xlane.xlu1 %3865  ;;  %v4236_v48 = vsel %vm648_vm2, %v11593_v44, 0.0  ;;  %v3951_v27 = vsel %vm648_vm2, %v11597_v17, -inf }
 0x585   :  { %v11601_v19 = vpop.eup %9531  ;;  %v4002_v38 = vsub.f32 %v11352_v25, %v3866_v34  ;;  %v11604_v1 = vpop.f32.mrb[124].mxu0  ;;  %4237 = vadd.xlane.f32.xlu1 %v4236_v48 }
 0x586   :  { %v3716_v3 = vpop.f32.mrb[142].mxu1  ;;  %v8894_v31 = vpop.f32.mrb[125].mxu0  ;;  %v4233_v55 = vsel %vm648_vm2, %v11601_v19, 0.0 }
 0x587   :  { %v3863_v10 = vpop.xlane.xlu0 %3862  ;;  %v4093_v54 = vmul.f32 1.442695, %v4002_v38  ;;  %v3668_v49 = vpop.f32.mrb[126].mxu0  ;;  %4234 = vadd.xlane.f32.xlu0 %v4233_v55 }
 0x588   :  { %v4001_v32 = vsub.f32 %v11354_v42, %v3863_v10  ;;  %v8901_v11 = vpop.f32.mrb[143].mxu1  ;;  %v8895_v2 = vpop.f32.mrb[127].mxu0  ;;  %v11619_v10 = vmul.f32 0.35355338, %v11561_v51 }
 0x589   :  { %9537 = vpow2.f32 %v4093_v54  ;;  %3952 = vmax.xlane.f32.xlu1 %v3951_v27 }
 0x58a   :  { %v4091_v25 = vmul.f32 1.442695, %v4001_v32  ;;  %12971 = vst [vmem:[#allocation94_spill] sm:$0xff] %v11619_v10 }
 0x58b   :  { %v4169_v34 = vpop.xlane.xlu0 %4168  ;;  %v11611_v48 = vpop.eup %9533 }
 0x58c   :  { %9539 = vpow2.f32 %v4091_v25  ;;  %v3872_v3 = vpop.xlane.xlu1 %3871  ;;  %v4242_v38 = vsel %vm648_vm2, %v11611_v48, 0.0 }
 0x58d   :  { %9541 = vrcp.f32 %v4169_v34  ;;  %v4004_v31 = vsub.f32 %v11366_v53, %v3872_v3  ;;  %4243 = vadd.xlane.f32.xlu1 %v4242_v38  ;;  %v3954_v53 = vsel %vm648_vm2, %v11619_v10, -inf }
 0x58e   :  { %v11615_v42 = vpop.eup %9535 }
 0x58f   :  { %v3869_v55 = vpop.xlane.xlu0 %3868  ;;  %v4239_v27 = vsel %vm648_vm2, %v11615_v42, 0.0  ;;  %v4097_v54 = vmul.f32 1.442695, %v4004_v31 }
 0x590   :  { %v4003_v32 = vsub.f32 %v11368_v9, %v3869_v55  ;;  %4240 = vadd.xlane.f32.xlu0 %v4239_v27  ;;  %v4172_v49 = vpop.xlane.xlu1 %4171 }
 0x591   :  { %9543 = vpow2.f32 %v4097_v54 }
 0x592   :  { %v4095_v11 = vmul.f32 1.442695, %v4003_v32  ;;  %9545 = vrcp.f32 %v4172_v49 }
 0x593   :  { %v4181_v2 = vpop.xlane.xlu0 %4180  ;;  %v11626_v25 = vpop.eup %9537 }
 0x594   :  { %9547 = vpow2.f32 %v4095_v11  ;;  %3955 = vmax.xlane.f32.xlu0 %v3954_v53  ;;  %v4248_v51 = vsel %vm648_vm2, %v11626_v25, 0.0 }
 0x595   :  { %v3875_v3 = vpop.xlane.xlu1 %3874  ;;  %4249 = vadd.xlane.f32.xlu1 %v4248_v51  ;;  %v12972_v51 = vld [vmem:[#allocation27_spill] sm:$0xff] }
 0x596   :  { %v11630_v34 = vpop.eup %9539  ;;  %v4005_v38 = vsub.f32 %v11386_v30, %v3875_v3  ;;  %v4654_v10 = vsel %vm4556_vm3, %v12972_v51, 0 }
 0x597   :  { %v9542_v9 = vpop.eup %9541  ;;  %v3878_v31 = vpop.xlane.xlu0 %3877  ;;  %v4245_v55 = vsel %vm648_vm2, %v11630_v34, 0.0 }
 0x598   :  { %v4006_v27 = vsub.f32 %v11384_v60, %v3878_v31  ;;  %4246 = vadd.xlane.f32.xlu0 %v4245_v55  ;;  %v4423_v54 = vmul.f32 %v9542_v9, %v11361_v20  ;;  %v4099_v32 = vmul.f32 1.442695, %v4005_v38 }
 0x59a   :  { %v4101_v49 = vmul.f32 1.442695, %v4006_v27  ;;  %v4487_v11 = vpack.c.bf16 %v4423_v54, %v4423_v54  ;;  %9549 = vpow2.f32 %v4099_v32  ;;  %v12973_v54 = vld [vmem:[#allocation28_spill] sm:$0xff] }
 0x59b   :  { %v4175_v53 = vpop.xlane.xlu0 %4174  ;;  %v11637_v17 = vpop.eup %9543  ;;  %v4702_v32 = vsel %vm4556_vm3, %v12973_v54, 0 }
 0x59c   :  { %9551 = vpow2.f32 %v4101_v49  ;;  %8905 = vmatmul.mubr.msk.bf16.vlgmr.msra.gmra.mrb[128].mxu0 %vm648_vm2, %v4487_v11  ;;  %v9546_v30 = vpop.eup %9545  ;;  %v4254_v60 = vsel %vm648_vm2, %v11637_v17, 0.0 }
 0x59d   :  { %8915 = vmatpush3.bf16.msra.mxu0 %v4654_v10  ;;  %9553 = vrcp.f32 %v4175_v53  ;;  %8916 = vmatprep.mubr.msk.bf16.mxu0 %vm9920_vm1, %v12900_v14  ;;  %v3881_v3 = vpop.xlane.xlu1 %3880  ;;  %v4424_v9 = vmul.f32 %v9546_v30, %v11373_v37 }
 0x59e   :  { %v11646_v20 = vpop.eup %9547  ;;  %4255 = vadd.xlane.f32.xlu1 %v4254_v60  ;;  %8926 = vmatprep.subr.bf16.mxu0 %v12900_v14  ;;  %v4007_v38 = vsub.f32 %v11400_v50, %v3881_v3  ;;  %9555 = vrcp.f32 %v4181_v2 }
 0x59f   :  { %v4187_v31 = vpop.xlane.xlu0 %4186  ;;  %v4251_v10 = vsel %vm648_vm2, %v11646_v20, 0.0  ;;  %v4488_v55 = vpack.c.bf16 %v4424_v9, %v4424_v9 }
 0x5a0   :  { %4252 = vadd.xlane.f32.xlu0 %v4251_v10  ;;  %v4103_v27 = vmul.f32 1.442695, %v4007_v38 }
 0x5a1   :  { %8911 = vmatmul.mubr.msk.bf16.vlgmr.msra.gmra.mrb[144].mxu1 %vm648_vm2, %v4488_v55  ;;  %v4178_v49 = vpop.xlane.xlu1 %4177 }
 0x5a2   :  { %9557 = vpow2.f32 %v4103_v27  ;;  %8921 = vmatpush3.bf16.msra.mxu1 %v4702_v32  ;;  %8922 = vmatprep.mubr.msk.bf16.mxu1 %vm9920_vm1, %v12900_v14 }
 0x5a3   :  { %v3884_v37 = vpop.xlane.xlu0 %3883  ;;  %9559 = vrcp.f32 %v4178_v49  ;;  %8932 = vmatprep.subr.bf16.mxu1 %v12900_v14  ;;  %v12974_v49 = vld [vmem:[#allocation64_spill] sm:$0xff] }
 0x5a4   :  { %v4008_v50 = vsub.f32 %v11403_v21, %v3884_v37  ;;  %v11660_v11 = vpop.eup %9549 }
 0x5a5   :  { %v3887_v51 = vpop.xlane.xlu1 %3886  ;;  %v4257_v30 = vsel %vm648_vm2, %v11660_v11, 0.0 }
 0x5a6   :  { %v11662_v2 = vpop.eup %9551  ;;  %v4105_v53 = vmul.f32 1.442695, %v4008_v50  ;;  %v4009_v3 = vsub.f32 %v11418_v23, %v3887_v51  ;;  %4258 = vadd.xlane.f32.xlu0 %v4257_v30  ;;  %v4750_v23 = vsel %vm4556_vm3, %v12974_v49, 0 }
 0x5a7   :  { %v9554_v60 = vpop.eup %9553  ;;  %v4193_v9 = vpop.xlane.xlu0 %4192  ;;  %v4260_v38 = vsel %vm648_vm2, %v11662_v2, 0.0 }
 0x5a8   :  { %9561 = vpow2.f32 %v4105_v53  ;;  %4261 = vadd.xlane.f32.xlu1 %v4260_v38  ;;  %v4425_v21 = vmul.f32 %v9554_v60, %v11393_v40  ;;  %v4107_v10 = vmul.f32 1.442695, %v4009_v3  ;;  %v9556_v54 = vpop.eup %9555 }
 0x5a9   :  { %9563 = vrcp.f32 %v4187_v31  ;;  %v4184_v55 = vpop.xlane.xlu1 %4183  ;;  %v4427_v53 = vmul.f32 %v9556_v54, %v11377_v47  ;;  %v12976_v47 = vld [vmem:[#allocation52_spill] sm:$0xff] }
 0x5aa   :  { %v4489_v27 = vpack.c.bf16 %v4425_v21, %v4425_v21  ;;  %9565 = vpow2.f32 %v4107_v10  ;;  %v4846_v54 = vsel %vm4556_vm3, %v12976_v47, 0 }
 0x5ab   :  { %v11670_v32 = vpop.xlane.xlu0 %3889  ;;  %9567 = vrcp.f32 %v4184_v55  ;;  %v4491_v21 = vpack.c.bf16 %v4427_v53, %v4427_v53  ;;  %v12975_v55 = vld [vmem:[#allocation63_spill] sm:$0xff] }
 0x5ac   :  { %8917 = vmatmul.mubr.msk.bf16.vlgmr.msra.gmra.mrb[132].mxu0 %vm648_vm2, %v4489_v27  ;;  %v11675_v37 = vpop.eup %9557  ;;  %9569 = vrcp.f32 %v4193_v9  ;;  %v4798_v27 = vsel %vm4556_vm3, %v12975_v55, 0 }
 0x5ad   :  { %8927 = vmatpush3.bf16.msra.mxu0 %v4750_v23  ;;  %8928 = vmatprep.mubr.msk.bf16.mxu0 %vm9920_vm1, %v12900_v14  ;;  %v9560_v40 = vpop.eup %9559  ;;  %v11679_v31 = vpop.xlane.xlu1 %3892  ;;  %v4263_v50 = vsel %vm648_vm2, %v11675_v37, 0.0 }
 0x5ae   :  { %8938 = vmatprep.subr.bf16.mxu0 %v12900_v14  ;;  %4264 = vadd.xlane.f32.xlu0 %v4263_v50  ;;  %v4426_v30 = vmul.f32 %v9560_v40, %v11409_v46 }
 0x5af   :  { %v4199_v51 = vpop.xlane.xlu0 %4198 }
 0x5b0   :  { %v4490_v60 = vpack.c.bf16 %v4426_v30, %v4426_v30 }
 0x5b1   :  { %v4190_v38 = vpop.xlane.xlu1 %4189 }
 0x5b2   :  { %v11686_v3 = vpop.eup %9561  ;;  %8923 = vmatmul.mubr.msk.bf16.vlgmr.msra.gmra.mrb[148].mxu1 %vm648_vm2, %v4490_v60  ;;  %9571 = vrcp.f32 %v4190_v38 }
 0x5b3   :  { %v9564_v10 = vpop.eup %9563  ;;  %v4266_v49 = vsel %vm648_vm2, %v11686_v3, 0.0  ;;  %8933 = vmatpush3.bf16.msra.mxu1 %v4798_v27  ;;  %v11696_v46 = vpop.xlane.xlu0 %3895  ;;  %8934 = vmatprep.mubr.msk.bf16.mxu1 %vm9920_vm1, %v12900_v14  ;;  %9573 = vrcp.f32 %v4199_v51 }
 0x5b4   :  { %8929 = vmatmul.mubr.msk.bf16.vlgmr.msra.gmra.mrb[136].mxu0 %vm648_vm2, %v4491_v21  ;;  %v11698_v9 = vpop.eup %9565  ;;  %4267 = vadd.xlane.f32.xlu1 %v4266_v49  ;;  %v4429_v53 = vmul.f32 %v9564_v10, %v11398_v16  ;;  %v12977_v49 = vld [vmem:[#allocation51_spill] sm:$0xff] }
 0x5b5   :  { %8939 = vmatpush3.bf16.msra.mxu0 %v4846_v54  ;;  %v9568_v23 = vpop.eup %9567  ;;  %v11700_v40 = vpop.xlane.xlu1 %3898  ;;  %v4269_v50 = vsel %vm648_vm2, %v11698_v9, 0.0  ;;  %8940 = vmatprep.mubr.msk.bf16.mxu0 %vm9920_vm1, %v12900_v14  ;;  %v4894_v47 = vsel %vm4556_vm3, %v12977_v49, 0  ;;  %v12978_v54 = vld [vmem:[#allocation41_spill] sm:$0xff] }
 0x5b6   :  { %4270 = vadd.xlane.f32.xlu0 %v4269_v50  ;;  %8944 = vmatprep.subr.bf16.mxu1 %v12900_v14  ;;  %v4428_v30 = vmul.f32 %v9568_v23, %v11427_v57  ;;  %v4493_v55 = vpack.c.bf16 %v4429_v53, %v4429_v53  ;;  %v9570_v27 = vpop.eup %9569  ;;  %v4942_v16 = vsel %vm4556_vm3, %v12978_v54, 0 }
 0x5b7   :  { %8950 = vmatprep.subr.bf16.mxu0 %v12900_v14  ;;  %v4205_v38 = vpop.xlane.xlu0 %4204  ;;  %v4431_v10 = vmul.f32 %v9570_v27, %v11416_v33 }
 0x5b8   :  { %v4492_v60 = vpack.c.bf16 %v4428_v30, %v4428_v30 }
 0x5b9   :  { %v4196_v21 = vpop.xlane.xlu1 %4195 }
 0x5ba   :  { %8935 = vmatmul.mubr.msk.bf16.vlgmr.msra.gmra.mrb[152].mxu1 %vm648_vm2, %v4492_v60  ;;  %9575 = vrcp.f32 %v4196_v21  ;;  %v4495_v60 = vpack.c.bf16 %v4431_v10, %v4431_v10 }
 0x5bb   :  { %8945 = vmatpush3.bf16.msra.mxu1 %v4894_v47  ;;  %8946 = vmatprep.mubr.msk.bf16.mxu1 %vm9920_vm1, %v12900_v14  ;;  %v11728_v50 = vpop.xlane.xlu0 %3901  ;;  %9577 = vrcp.f32 %v4205_v38  ;;  %v12980_v47 = vld [vmem:[#allocation29_spill] sm:$0xff] }
 0x5bc   :  { %8941 = vmatmul.mubr.msk.bf16.vlgmr.msra.gmra.mrb[140].mxu0 %vm648_vm2, %v4493_v55  ;;  %v9572_v57 = vpop.eup %9571  ;;  %8956 = vmatprep.subr.bf16.mxu1 %v12900_v14  ;;  %v12979_v55 = vld [vmem:[#allocation42_spill] sm:$0xff]  ;;  %v5038_v54 = vsel %vm4556_vm3, %v12980_v47, 0 }
 0x5bd   :  { %8951 = vmatpush3.bf16.msra.mxu0 %v4942_v16  ;;  %v11720_v51 = vpop.xlane.xlu1 %3904  ;;  %8952 = vmatprep.mubr.msk.bf16.mxu0 %vm9920_vm1, %v12900_v14  ;;  %v4430_v23 = vmul.f32 %v9572_v57, %v11445_v4  ;;  %v9574_v21 = vpop.eup %9573  ;;  %v4990_v49 = vsel %vm4556_vm3, %v12979_v55, 0 }
 0x5be   :  { %8962 = vmatprep.subr.bf16.mxu0 %v12900_v14  ;;  %v4433_v27 = vmul.f32 %v9574_v21, %v11434_v24 }
 0x5bf   :  { %v4494_v53 = vpack.c.bf16 %v4430_v23, %v4430_v23  ;;  %v4211_v4 = vpop.xlane.xlu0 %4210 }
 0x5c0   :  { %v4497_v23 = vpack.c.bf16 %v4433_v27, %v4433_v27 }
 0x5c1   :  { %v4202_v30 = vpop.xlane.xlu1 %4201 }
 0x5c2   :  { %8947 = vmatmul.mubr.msk.bf16.vlgmr.msra.gmra.mrb[156].mxu1 %vm648_vm2, %v4494_v53  ;;  %9579 = vrcp.f32 %v4202_v30  ;;  %v12981_v30 = vld [vmem:[#allocation30_spill] sm:$0xff] }
 0x5c3   :  { %8957 = vmatpush3.bf16.msra.mxu1 %v4990_v49  ;;  %8958 = vmatprep.mubr.msk.bf16.mxu1 %vm9920_vm1, %v12900_v14  ;;  %9581 = vrcp.f32 %v4211_v4  ;;  %v12983_v4 = vld [vmem:[#allocation65_spill] sm:$0xff] }
 0x5c4   :  { %8953 = vmatmul.mubr.msk.bf16.vlgmr.msra.gmra.mrb[144].mxu0 %vm648_vm2, %v4495_v60  ;;  %v9576_v33 = vpop.eup %9575  ;;  %8968 = vmatprep.subr.bf16.mxu1 %v12900_v14  ;;  %v12982_v60 = vld [vmem:[#allocation66_spill] sm:$0xff]  ;;  %v5182_v27 = vsel %vm4556_vm3, %v12983_v4, 0 }
 0x5c5   :  { %8963 = vmatpush3.bf16.msra.mxu0 %v5038_v54  ;;  %5944 = vrot.lane.b32.xlu1 %v10703_v12, %s9907_s1  ;;  %v11740_v38 = vpop.xlane.xlu1 %3910  ;;  %v4432_v16 = vmul.f32 %v9576_v33, %v11462_v61  ;;  %v9578_v53 = vpop.eup %9577  ;;  %v5086_v12 = vsel %vm4556_vm3, %v12981_v30, 0  ;;  %v5134_v55 = vsel %vm4556_vm3, %v12982_v60, 0  ;;  %v12985_v60 = vld [vmem:[#allocation53_spill] sm:$0xff] }
 0x5c6   :  { %8964 = vmatprep.mubr.msk.bf16.mxu0 %vm9920_vm1, %v12900_v14  ;;  %8974 = vmatprep.subr.bf16.mxu0 %v12900_v14  ;;  %v4435_v21 = vmul.f32 %v9578_v53, %v11451_v7  ;;  %v4010_v7 = vsub.f32 %v11421_v28, %v11670_v32  ;;  %v4011_v53 = vsub.f32 %v11436_v6, %v11679_v31 }
 0x5c7   :  { %v4496_v57 = vpack.c.bf16 %v4432_v16, %v4432_v16  ;;  %v12984_v16 = vld [vmem:[#allocation54_spill] sm:$0xff] }
 0x5c8   :  { %v4109_v28 = vmul.f32 1.442695, %v4010_v7  ;;  %v4111_v31 = vmul.f32 1.442695, %v4011_v53 }
 0x5c9   :  { %v4208_v10 = vpop.xlane.xlu1 %4207 }
 0x5ca   :  { %8959 = vmatmul.mubr.msk.bf16.vlgmr.msra.gmra.mrb[160].mxu1 %vm648_vm2, %v4496_v57  ;;  %9583 = vrcp.f32 %v4208_v10  ;;  %v5230_v57 = vsel %vm4556_vm3, %v12984_v16, 0  ;;  %v11821_v16 = vmul.f32 0.35355338, %v11576_v22 }
 0x5cb   :  { %8969 = vmatpush3.bf16.msra.mxu1 %v5086_v12  ;;  %8970 = vmatprep.mubr.msk.bf16.mxu1 %vm9920_vm1, %v12900_v14 }
 0x5cc   :  { %8965 = vmatmul.mubr.msk.bf16.vlgmr.msra.gmra.mrb[148].mxu0 %vm648_vm2, %v4497_v23  ;;  %5896 = vrot.lane.b32.xlu0 %v10710_v41, %s9907_s1  ;;  %v9580_v24 = vpop.eup %9579  ;;  %v4499_v41 = vpack.c.bf16 %v4435_v21, %v4435_v21  ;;  %v11780_v23 = vpop.xlane.xlu0 %3907 }
 0x5cd   :  { %8975 = vmatpush3.bf16.msra.mxu0 %v5134_v55  ;;  %v11756_v61 = vpop.xlane.xlu1 %3916  ;;  %8976 = vmatprep.mubr.msk.bf16.mxu0 %vm9920_vm1, %v12900_v14  ;;  %v4434_v49 = vmul.f32 %v9580_v24, %v11479_v15  ;;  %v9582_v33 = vpop.eup %9581  ;;  %v5278_v55 = vsel %vm4556_vm3, %v12985_v60, 0  ;;  %v12986_v24 = vld [vmem:[#allocation76_spill] sm:$0xff] }
 0x5ce   :  { %8980 = vmatprep.subr.bf16.mxu1 %v12900_v14  ;;  %8986 = vmatprep.subr.bf16.mxu0 %v12900_v14  ;;  %v4437_v15 = vmul.f32 %v9582_v33, %v11468_v18  ;;  %v5326_v21 = vsel %vm4556_vm3, %v12986_v24, 0  ;;  %v4012_v18 = vsub.f32 %v11439_v62, %v11696_v46 }
 0x5cf   :  { %v4498_v47 = vpack.c.bf16 %v4434_v49, %v4434_v49 }
 0x5d0   :  { %v4501_v12 = vpack.c.bf16 %v4437_v15, %v4437_v15  ;;  %v4113_v62 = vmul.f32 1.442695, %v4012_v18 }
 0x5d1   :  { %v4214_v54 = vpop.xlane.xlu1 %4213 }
 0x5d2   :  { %8971 = vmatmul.mubr.msk.bf16.vlgmr.msra.gmra.mrb[164].mxu1 %vm648_vm2, %v4498_v47  ;;  %9585 = vrcp.f32 %v4214_v54  ;;  %v12987_v54 = vld [vmem:[#allocation75_spill] sm:$0xff] }
 0x5d3   :  { %8981 = vmatpush3.bf16.msra.mxu1 %v5182_v27  ;;  %8982 = vmatprep.mubr.msk.bf16.mxu1 %vm9920_vm1, %v12900_v14  ;;  %9587 = vpow2.f32 %v4109_v28  ;;  %v11818_v27 = vmul.f32 0.35355338, %v11573_v13  ;;  %v3957_v13 = vsel %vm648_vm2, %v11821_v16, -inf }
 0x5d4   :  { %8977 = vmatmul.mubr.msk.bf16.vlgmr.msra.gmra.mrb[152].mxu0 %vm648_vm2, %v4499_v41  ;;  %8992 = vmatprep.subr.bf16.mxu1 %v12900_v14  ;;  %v9584_v10 = vpop.eup %9583  ;;  %9589 = vpow2.f32 %v4111_v31  ;;  %v5374_v41 = vsel %vm4556_vm3, %v12987_v54, 0 }
 0x5d5   :  { %8987 = vmatpush3.bf16.msra.mxu0 %v5230_v57  ;;  %8988 = vmatprep.mubr.msk.bf16.mxu0 %vm9920_vm1, %v12900_v14  ;;  %v4436_v32 = vmul.f32 %v9584_v10, %v11493_v58  ;;  %v11794_v58 = vpop.xlane.xlu0 %3913  ;;  %9591 = vpow2.f32 %v4113_v62  ;;  %v11814_v4 = vpop.xlane.xlu1 %3922  ;;  %v3960_v10 = vsel %vm648_vm2, %v11818_v27, -inf }
 0x5d6   :  { %8998 = vmatprep.subr.bf16.mxu0 %v12900_v14 }
 0x5d7   :  { %v4500_v30 = vpack.c.bf16 %v4436_v32, %v4436_v32 }
 0x5d9   :  { %v11803_v46 = vpop.xlane.xlu0 %3919 }
 0x5da   :  { %8983 = vmatmul.mubr.msk.bf16.vlgmr.msra.gmra.mrb[168].mxu1 %vm648_vm2, %v4500_v30 }
 0x5db   :  { %8993 = vmatpush3.bf16.msra.mxu1 %v5278_v55  ;;  %8994 = vmatprep.mubr.msk.bf16.mxu1 %vm9920_vm1, %v12900_v14 }
 0x5dc   :  { %8989 = vmatmul.mubr.msk.bf16.vlgmr.msra.gmra.mrb[156].mxu0 %vm648_vm2, %v4501_v12  ;;  %v9586_v6 = vpop.eup %9585  ;;  %9004 = vmatprep.subr.bf16.mxu1 %v12900_v14 }
 0x5dd   :  { %8999 = vmatpush3.bf16.msra.mxu0 %v5326_v21  ;;  %v4438_v49 = vmul.f32 %v9586_v6, %v11505_v26  ;;  %9000 = vmatprep.mubr.msk.bf16.mxu0 %vm9920_vm1, %v12900_v14  ;;  %v11808_v33 = vpop.xlane.xlu0 %3925  ;;  %v11812_v26 = vpop.eup %9587 }
 0x5de   :  { %9010 = vmatprep.subr.bf16.mxu0 %v12900_v14  ;;  %v4272_v7 = vsel %vm648_vm2, %v11812_v26, 0.0  ;;  %v11827_v15 = vpop.xlane.xlu1 %3928  ;;  %v11831_v28 = vpop.eup %9589 }
 0x5df   :  { %v4502_v47 = vpack.c.bf16 %v4438_v49, %v4438_v49  ;;  %v11837_v22 = vpop.eup %9591  ;;  %v4275_v30 = vsel %vm648_vm2, %v11831_v28, 0.0 }
 0x5e0   :  { %v4278_v60 = vsel %vm648_vm2, %v11837_v22, 0.0 }
 0x5e1   :  { %v11823_v57 = vpop.xlane.xlu0 %3931 }
 0x5e2   :  { %8995 = vmatmul.mubr.msk.bf16.vlgmr.msra.gmra.mrb[172].mxu1 %vm648_vm2, %v4502_v47 }
 0x5e3   :  { %9005 = vmatpush3.bf16.msra.mxu1 %v5374_v41  ;;  %9006 = vmatprep.mubr.msk.bf16.mxu1 %vm9920_vm1, %v12900_v14 }
 0x5e4   :  { %9016 = vmatprep.subr.bf16.mxu1 %v12900_v14 }
 0x5e5   :  { %v11833_v32 = vpop.xlane.xlu0 %3937  ;;  %v11839_v53 = vpop.xlane.xlu1 %3934 }
 0x5e9   :  { %4273 = vadd.xlane.f32.xlu1 %v4272_v7 }
 0x5eb   :  { %3961 = vmax.xlane.f32.xlu0 %v3960_v10 }
 0x5ec   :  { %v11843_v12 = vpop.xlane.xlu0 %3943 }
 0x5ed   :  { %3958 = vmax.xlane.f32.xlu1 %v3957_v13  ;;  %v11847_v55 = vpop.xlane.xlu1 %3940 }
 0x5ef   :  { %4276 = vadd.xlane.f32.xlu0 %v4275_v30 }
 0x5f1   :  { %4279 = vadd.xlane.f32.xlu1 %v4278_v60  ;;  %v12988_v60 = vld [vmem:[#allocation70_spill] sm:$0xff] }
 0x5f4   :  { %v11849_v24 = vpop.xlane.xlu0 %3949 }
 0x5f5   :  { %v11851_v21 = vpop.xlane.xlu1 %3946 }
 0x5f8   :  { %v4217_v18 = vpop.xlane.xlu0 %4216 }
 0x5f9   :  { %v4220_v6 = vpop.xlane.xlu1 %4219  ;;  %9593 = vrcp.f32 %v4217_v18  ;;  %v5422_v18 = vsel %vm4556_vm3, %v12988_v60, 0 }
 0x5fa   :  { %9595 = vrcp.f32 %v4220_v6 }
 0x5fc   :  { %v4223_v31 = vpop.xlane.xlu0 %4222 }
 0x5fd   :  { %v4226_v49 = vpop.xlane.xlu1 %4225  ;;  %9597 = vrcp.f32 %v4223_v31 }
 0x5fe   :  { %9599 = vrcp.f32 %v4226_v49 }
 0x602   :  { %6040 = vrot.lane.b32.xlu1 %v10619_v0, %s9907_s1  ;;  %v12989_v0 = vld [vmem:[#allocation69_spill] sm:$0xff] }
 0x603   :  { %v9594_v62 = vpop.eup %9593  ;;  %v5470_v31 = vsel %vm4556_vm3, %v12989_v0, 0  ;;  %v12991_v0 = vld [vmem:[#allocation82_spill] sm:$0xff] }
 0x604   :  { %v9596_v47 = vpop.eup %9595  ;;  %v4439_v54 = vmul.f32 %v9594_v62, %v11551_v43 }
 0x605   :  { %5992 = vrot.lane.b32.xlu0 %v10623_v39, %s9907_s1  ;;  %v4440_v41 = vmul.f32 %v9596_v47, %v11555_v52  ;;  %v5518_v47 = vsel %vm4556_vm3, %v11327_v8, 0 }
 0x606   :  { %v4503_v7 = vpack.c.bf16 %v4439_v54, %v4439_v54  ;;  %v4013_v54 = vsub.f32 %v11453_v63, %v11700_v40 }
 0x607   :  { %v9598_v10 = vpop.eup %9597  ;;  %v4504_v13 = vpack.c.bf16 %v4440_v41, %v4440_v41  ;;  %v5566_v41 = vsel %vm4556_vm3, %v11331_v29, 0 }
 0x608   :  { %v9600_v30 = vpop.eup %9599  ;;  %9001 = vmatmul.mubr.msk.bf16.vlgmr.msra.gmra.mrb[160].mxu0 %vm648_vm2, %v4503_v7  ;;  %v4441_v43 = vmul.f32 %v9598_v10, %v11559_v56  ;;  %v4014_v7 = vsub.f32 %v11456_v5, %v11728_v50  ;;  %v4115_v29 = vmul.f32 1.442695, %v4013_v54 }
 0x609   :  { %9011 = vmatpush3.bf16.msra.mxu0 %v5422_v18  ;;  %9007 = vmatmul.mubr.msk.bf16.vlgmr.msra.gmra.mrb[176].mxu1 %vm648_vm2, %v4504_v13  ;;  %v4442_v52 = vmul.f32 %v9600_v30, %v11565_v36  ;;  %v12990_v18 = vld [vmem:[#allocation81_spill] sm:$0xff] }
 0x60a   :  { %v4232_v6 = vpop.xlane.xlu1 %4231  ;;  %9017 = vmatpush3.bf16.msra.mxu1 %v5470_v31  ;;  %9012 = vmatprep.mubr.msk.bf16.mxu0 %vm9920_vm1, %v12900_v14  ;;  %v4505_v49 = vpack.c.bf16 %v4441_v43, %v4441_v43  ;;  %v4117_v50 = vmul.f32 1.442695, %v4014_v7  ;;  %v5614_v31 = vsel %vm4556_vm3, %v12991_v0, 0 }
 0x60b   :  { %9601 = vrcp.f32 %v4232_v6  ;;  %9022 = vmatprep.subr.bf16.mxu0 %v12900_v14  ;;  %9018 = vmatprep.mubr.msk.bf16.mxu1 %vm9920_vm1, %v12900_v14  ;;  %v4506_v62 = vpack.c.bf16 %v4442_v52, %v4442_v52  ;;  %v5662_v6 = vsel %vm4556_vm3, %v12990_v18, 0  ;;  %v12992_v52 = vld [vmem:[#allocation91_spill] sm:$0xff] }
 0x60c   :  { %v4229_v39 = vpop.xlane.xlu0 %4228  ;;  %9028 = vmatprep.subr.bf16.mxu1 %v12900_v14 }
 0x60d   :  { %9603 = vrcp.f32 %v4229_v39 }
 0x610   :  { %9013 = vmatmul.mubr.msk.bf16.vlgmr.msra.gmra.mrb[164].mxu0 %vm648_vm2, %v4505_v49  ;;  %v11907_v49 = vmul.f32 0.35355338, %v12992_v52 }
 0x611   :  { %9023 = vmatpush3.bf16.msra.mxu0 %v5518_v47  ;;  %9019 = vmatmul.mubr.msk.bf16.vlgmr.msra.gmra.mrb[180].mxu1 %vm648_vm2, %v4506_v62 }
 0x612   :  { %v4238_v56 = vpop.xlane.xlu1 %4237  ;;  %9029 = vmatpush3.bf16.msra.mxu1 %v5566_v41  ;;  %9030 = vmatprep.mubr.msk.bf16.mxu1 %vm9920_vm1, %v12900_v14 }
 0x613   :  { %9605 = vrcp.f32 %v4238_v56  ;;  %9040 = vmatprep.subr.bf16.mxu1 %v12900_v14  ;;  %9024 = vmatprep.mubr.msk.bf16.mxu0 %vm9920_vm1, %v12900_v14  ;;  %v11913_v56 = vmul.f32 0.35355338, %v11588_v35  ;;  %v3966_v35 = vsel %vm648_vm2, %v11907_v49, -inf }
 0x614   :  { %v4235_v36 = vpop.xlane.xlu0 %4234  ;;  %9034 = vmatprep.subr.bf16.mxu0 %v12900_v14 }
 0x615   :  { %v9602_v8 = vpop.eup %9601  ;;  %9607 = vrcp.f32 %v4235_v36 }
 0x616   :  { %v11888_v63 = vpop.xlane.xlu1 %3952  ;;  %v4444_v5 = vmul.f32 %v9602_v8, %v11579_v59  ;;  %9609 = vpow2.f32 %v4115_v29  ;;  %v12994_v29 = vld [vmem:[#allocation78_spill] sm:$0xff] }
 0x617   :  { %v9604_v40 = vpop.eup %9603  ;;  %9611 = vpow2.f32 %v4117_v50  ;;  %v3963_v50 = vsel %vm648_vm2, %v11913_v56, -inf }
 0x618   :  { %v4508_v10 = vpack.c.bf16 %v4444_v5, %v4444_v5  ;;  %v4443_v13 = vmul.f32 %v9604_v40, %v11585_v45  ;;  %v5710_v5 = vsel %vm4556_vm3, %v12994_v29, 0 }
 0x61a   :  { %v4244_v30 = vpop.xlane.xlu1 %4243  ;;  %v4507_v60 = vpack.c.bf16 %v4443_v13, %v4443_v13  ;;  %9031 = vmatmul.mubr.msk.bf16.vlgmr.msra.gmra.mrb[184].mxu1 %vm648_vm2, %v4508_v10 }
 0x61b   :  { %9041 = vmatpush3.bf16.msra.mxu1 %v5662_v6  ;;  %9613 = vrcp.f32 %v4244_v30  ;;  %9042 = vmatprep.mubr.msk.bf16.mxu1 %vm9920_vm1, %v12900_v14 }
 0x61c   :  { %9025 = vmatmul.mubr.msk.bf16.vlgmr.msra.gmra.mrb[168].mxu0 %vm648_vm2, %v4507_v60  ;;  %9052 = vmatprep.subr.bf16.mxu1 %v12900_v14 }
 0x61d   :  { %v4241_v59 = vpop.xlane.xlu0 %4240  ;;  %v9606_v39 = vpop.eup %9605  ;;  %9035 = vmatpush3.bf16.msra.mxu0 %v5614_v31  ;;  %9036 = vmatprep.mubr.msk.bf16.mxu0 %vm9920_vm1, %v12900_v14 }
 0x61e   :  { %9615 = vrcp.f32 %v4241_v59  ;;  %v4446_v45 = vmul.f32 %v9606_v39, %v11593_v44  ;;  %9046 = vmatprep.subr.bf16.mxu0 %v12900_v14  ;;  %v12993_v44 = vld [vmem:[#allocation77_spill] sm:$0xff]  ;;  %v12995_v59 = vld [vmem:[#allocation71_spill] sm:$0xff]  ;;  %v12996_v39 = vld [vmem:[#allocation72_spill] sm:$0xff] }
 0x61f   :  { %v9608_v43 = vpop.eup %9607  ;;  %v5758_v36 = vsel %vm4556_vm3, %v12993_v44, 0 }
 0x620   :  { %v4510_v47 = vpack.c.bf16 %v4446_v45, %v4446_v45  ;;  %v4445_v54 = vmul.f32 %v9608_v43, %v11601_v19  ;;  %v11918_v8 = vpop.eup %9609  ;;  %v5806_v45 = vsel %vm4556_vm3, %v12996_v39, 0 }
 0x621   :  { %v11909_v62 = vpop.xlane.xlu0 %3955  ;;  %v11925_v40 = vpop.eup %9611  ;;  %v4281_v60 = vsel %vm648_vm2, %v11918_v8, 0.0 }
 0x622   :  { %v4250_v41 = vpop.xlane.xlu1 %4249  ;;  %v4509_v7 = vpack.c.bf16 %v4445_v54, %v4445_v54  ;;  %9043 = vmatmul.mubr.msk.bf16.vlgmr.msra.gmra.mrb[188].mxu1 %vm648_vm2, %v4510_v47  ;;  %v4284_v6 = vsel %vm648_vm2, %v11925_v40, 0.0 }
 0x623   :  { %9617 = vrcp.f32 %v4250_v41  ;;  %9053 = vmatpush3.bf16.msra.mxu1 %v5758_v36  ;;  %9054 = vmatprep.mubr.msk.bf16.mxu1 %vm9920_vm1, %v12900_v14  ;;  %v12997_v36 = vld [vmem:[#allocation32_spill] sm:$0xff] }
 0x624   :  { %9037 = vmatmul.mubr.msk.bf16.vlgmr.msra.gmra.mrb[172].mxu0 %vm648_vm2, %v4509_v7  ;;  %3967 = vmax.xlane.f32.xlu0 %v3966_v35 }
 0x625   :  { %v4247_v19 = vpop.xlane.xlu0 %4246  ;;  %9047 = vmatpush3.bf16.msra.mxu0 %v5710_v5  ;;  %v9614_v10 = vpop.eup %9613  ;;  %9064 = vmatprep.subr.bf16.mxu1 %v12900_v14  ;;  %v12998_v5 = vld [vmem:[#allocation31_spill] sm:$0xff] }
 0x626   :  { %9619 = vrcp.f32 %v4247_v19  ;;  %3964 = vmax.xlane.f32.xlu1 %v3963_v50  ;;  %v4448_v30 = vmul.f32 %v9614_v10, %v11611_v48  ;;  %9048 = vmatprep.mubr.msk.bf16.mxu0 %vm9920_vm1, %v12900_v14  ;;  %v5854_v48 = vsel %vm4556_vm3, %v12995_v59, 0 }
 0x627   :  { %9058 = vmatprep.subr.bf16.mxu0 %v12900_v14 }
 0x628   :  { %v9616_v13 = vpop.eup %9615  ;;  %4282 = vadd.xlane.f32.xlu0 %v4281_v60  ;;  %v4512_v0 = vpack.c.bf16 %v4448_v30, %v4448_v30 }
 0x629   :  { %v4447_v18 = vmul.f32 %v9616_v13, %v11615_v42 }
 0x62a   :  { %4285 = vadd.xlane.f32.xlu1 %v4284_v6  ;;  %9055 = vmatmul.mubr.msk.bf16.vlgmr.msra.gmra.mrb[192].mxu1 %vm648_vm2, %v4512_v0 }
 0x62b   :  { %v4511_v31 = vpack.c.bf16 %v4447_v18, %v4447_v18  ;;  %9065 = vmatpush3.bf16.msra.mxu1 %v5854_v48  ;;  %9066 = vmatprep.mubr.msk.bf16.mxu1 %vm9920_vm1, %v12900_v14  ;;  %v4256_v7 = vpop.xlane.xlu1 %4255 }
 0x62c   :  { %9076 = vmatprep.subr.bf16.mxu1 %v12900_v14  ;;  %9621 = vrcp.f32 %v4256_v7 }
 0x62d   :  { %9049 = vmatmul.mubr.msk.bf16.vlgmr.msra.gmra.mrb[176].mxu0 %vm648_vm2, %v4511_v31  ;;  %v9618_v43 = vpop.eup %9617  ;;  %v4253_v44 = vpop.xlane.xlu0 %4252 }
 0x62e   :  { %9059 = vmatpush3.bf16.msra.mxu0 %v5806_v45  ;;  %9060 = vmatprep.mubr.msk.bf16.mxu0 %vm9920_vm1, %v12900_v14  ;;  %v4450_v42 = vmul.f32 %v9618_v43, %v11626_v25  ;;  %9623 = vrcp.f32 %v4253_v44 }
 0x62f   :  { %9070 = vmatprep.subr.bf16.mxu0 %v12900_v14 }
 0x630   :  { %v9620_v52 = vpop.eup %9619  ;;  %v4514_v47 = vpack.c.bf16 %v4450_v42, %v4450_v42  ;;  %v13001_v42 = vld [vmem:[#allocation92_spill] sm:$0xff] }
 0x631   :  { %v4449_v54 = vmul.f32 %v9620_v52, %v11630_v34  ;;  %v11988_v52 = vmul.f32 0.35355338, %v13001_v42 }
 0x632   :  { %9067 = vmatmul.mubr.msk.bf16.vlgmr.msra.gmra.mrb[196].mxu1 %vm648_vm2, %v4514_v47  ;;  %v11991_v47 = vmul.f32 0.35355338, %v11604_v1 }
 0x633   :  { %v4513_v41 = vpack.c.bf16 %v4449_v54, %v4449_v54  ;;  %9078 = vmatprep.mubr.msk.bf16.mxu1 %vm9920_vm1, %v12900_v14  ;;  %v4259_v25 = vpop.xlane.xlu0 %4258 }
 0x635   :  { %9061 = vmatmul.mubr.msk.bf16.vlgmr.msra.gmra.mrb[180].mxu0 %vm648_vm2, %v4513_v41  ;;  %v4262_v34 = vpop.xlane.xlu1 %4261 }
 0x636   :  { %9072 = vmatprep.mubr.msk.bf16.mxu0 %vm9920_vm1, %v12900_v14  ;;  %v9622_v19 = vpop.eup %9621 }
 0x637   :  { %v4452_v13 = vmul.f32 %v9622_v19, %v11637_v17  ;;  %v12999_v17 = vld [vmem:[#allocation79_spill] sm:$0xff] }
 0x638   :  { %v9624_v50 = vpop.eup %9623  ;;  %v4015_v48 = vsub.f32 %v12999_v17, %v11720_v51  ;;  %v3972_v51 = vsel %vm648_vm2, %v11988_v52, -inf }
 0x639   :  { %v4451_v18 = vmul.f32 %v9624_v50, %v11646_v20  ;;  %v4516_v31 = vpack.c.bf16 %v4452_v13, %v4452_v13  ;;  %v13000_v20 = vld [vmem:[#allocation73_spill] sm:$0xff]  ;;  %v13003_v50 = vld [vmem:[#allocation20_spill] sm:$0xff] }
 0x63a   :  { %v4016_v39 = vsub.f32 %v13000_v20, %v11780_v23  ;;  %v4119_v45 = vmul.f32 1.442695, %v4015_v48  ;;  %v3969_v23 = vsel %vm648_vm2, %v11991_v47, -inf }
 0x63b   :  { %6136 = vrot.lane.b32.xlu1 %v12997_v36, %s9907_s1  ;;  %v11963_v29 = vpop.xlane.xlu0 %4264  ;;  %v4515_v59 = vpack.c.bf16 %v4451_v18, %v4451_v18 }
 0x63c   :  { %v4121_v43 = vmul.f32 1.442695, %v4016_v39  ;;  %9625 = vpow2.f32 %v4119_v45 }
 0x63e   :  { %6088 = vrot.lane.b32.xlu0 %v12998_v5, %s9907_s1  ;;  %9627 = vpow2.f32 %v4121_v43 }
 0x63f   :  { %9629 = vrcp.f32 %v4259_v25 }
 0x640   :  { %9631 = vrcp.f32 %v4262_v34 }
 0x641   :  { %v11967_v35 = vpop.xlane.xlu1 %4267 }
 0x643   :  { %v11969_v10 = vpop.xlane.xlu0 %4270 }
 0x645   :  { %v5945_v30 = vpop.permute.xlu1 %5944 }
 0x646   :  { %v5950_v60 = vsel %vm4556_vm3, %v5945_v30, 0  ;;  %v11995_v54 = vpop.eup %9625 }
 0x647   :  { %9077 = vmatpush3.bf16.msra.mxu1 %v5950_v60  ;;  %v5897_v6 = vpop.permute.xlu0 %5896  ;;  %v4287_v7 = vsel %vm648_vm2, %v11995_v54, 0.0 }
 0x648   :  { %v5902_v0 = vsel %vm4556_vm3, %v5897_v6, 0  ;;  %9088 = vmatprep.subr.bf16.mxu1 %v12900_v14  ;;  %v11999_v41 = vpop.eup %9627 }
 0x649   :  { %9071 = vmatpush3.bf16.msra.mxu0 %v5902_v0  ;;  %v4290_v1 = vsel %vm648_vm2, %v11999_v41, 0.0  ;;  %v13005_v0 = vld [vmem:[#allocation19_spill] sm:$0xff]  ;;  %v9630_v17 = vpop.eup %9629 }
 0x64a   :  { %9079 = vmatmul.mubr.msk.bf16.vlgmr.msra.gmra.mrb[200].mxu1 %vm648_vm2, %v4516_v31  ;;  %9082 = vmatprep.subr.bf16.mxu0 %v12900_v14  ;;  %v9632_v34 = vpop.eup %9631  ;;  %v4453_v39 = vmul.f32 %v9630_v17, %v11660_v11 }
 0x64b   :  { %9090 = vmatprep.mubr.msk.bf16.mxu1 %vm9920_vm1, %v12900_v14 }
 0x64c   :  { %9073 = vmatmul.mubr.msk.bf16.vlgmr.msra.gmra.mrb[184].mxu0 %vm648_vm2, %v4515_v59 }
 0x64d   :  { %9084 = vmatprep.mubr.msk.bf16.mxu0 %vm9920_vm1, %v12900_v14 }
 0x65d   :  { %3973 = vmax.xlane.f32.xlu0 %v3972_v51  ;;  %v13007_v51 = vld [vmem:[#allocation74_spill] sm:$0xff] }
 0x65f   :  { %3970 = vmax.xlane.f32.xlu1 %v3969_v23  ;;  %v4018_v23 = vsub.f32 %v13007_v51, %v11794_v58 }
 0x661   :  { %4288 = vadd.xlane.f32.xlu0 %v4287_v7  ;;  %v4125_v11 = vmul.f32 1.442695, %v4018_v23 }
 0x663   :  { %4291 = vadd.xlane.f32.xlu1 %v4290_v1  ;;  %9633 = vpow2.f32 %v4125_v11 }
 0x66f   :  { %v12005_v44 = vpop.f32.mrb[128].mxu0 }
 0x670   :  { %13002 = vst [vmem:[#allocation27_spill] sm:$0xff] %v12005_v44  ;;  %v8906_v36 = vpop.f32.mrb[129].mxu0 }
 0x671   :  { %v4597_v5 = vpop.f32.mrb[130].mxu0  ;;  %v4454_v36 = vmul.f32 %v9632_v34, %v11662_v2 }
 0x672   :  { %v8907_v19 = vpop.f32.mrb[131].mxu0  ;;  %v13008_v5 = vld [vmem:[#allocation67_spill] sm:$0xff] }
 0x673   :  { %v4017_v19 = vsub.f32 %v13008_v5, %v11740_v38  ;;  %v4518_v58 = vpack.c.bf16 %v4454_v36, %v4454_v36 }
 0x674   :  { %6232 = vrot.lane.b32.xlu1 %v13003_v50, %s9907_s1  ;;  %v12009_v13 = vpop.f32.mrb[144].mxu1 }
 0x675   :  { %13004 = vst [vmem:[#allocation28_spill] sm:$0xff] %v12009_v13  ;;  %v8912_v30 = vpop.f32.mrb[145].mxu1  ;;  %v4123_v2 = vmul.f32 1.442695, %v4017_v19 }
 0x676   :  { %v12011_v60 = vpop.xlane.xlu1 %4273  ;;  %v4645_v18 = vpop.f32.mrb[146].mxu1 }
 0x677   :  { %v8913_v6 = vpop.f32.mrb[147].mxu1  ;;  %6184 = vrot.lane.b32.xlu0 %v13005_v0, %s9907_s1  ;;  %v4517_v18 = vpack.c.bf16 %v4453_v39, %v4453_v39  ;;  %9635 = vpow2.f32 %v4123_v2 }
 0x678   :  { %v12015_v31 = vpop.xlane.xlu0 %3961  ;;  %9637 = vrcp.f32 %v11963_v29 }
 0x679   :  { %9639 = vrcp.f32 %v11967_v35  ;;  %v13023_v35 = vld [vmem:[#allocation68_spill] sm:$0xff] }
 0x67a   :  { %v12017_v59 = vpop.xlane.xlu1 %3958 }
 0x67c   :  { %v12019_v25 = vpop.xlane.xlu0 %4276 }
 0x67e   :  { %v12023_v20 = vpop.xlane.xlu1 %4279 }
 0x67f   :  { %v12021_v48 = vpop.f32.mrb[132].mxu0 }
 0x680   :  { %13006 = vst [vmem:[#allocation64_spill] sm:$0xff] %v12021_v48  ;;  %v8918_v45 = vpop.f32.mrb[133].mxu0  ;;  %v5993_v42 = vpop.permute.xlu0 %5992 }
 0x681   :  { %v4693_v43 = vpop.f32.mrb[134].mxu0  ;;  %v5998_v1 = vsel %vm4556_vm3, %v5993_v42, 0 }
 0x682   :  { %v8919_v7 = vpop.f32.mrb[135].mxu0  ;;  %v6041_v50 = vpop.permute.xlu1 %6040  ;;  %9083 = vmatpush3.bf16.msra.mxu0 %v5998_v1 }
 0x683   :  { %v6046_v30 = vsel %vm4556_vm3, %v6041_v50, 0  ;;  %9094 = vmatprep.subr.bf16.mxu0 %v12900_v14  ;;  %v12049_v50 = vpop.eup %9633 }
 0x684   :  { %9089 = vmatpush3.bf16.msra.mxu1 %v6046_v30  ;;  %v12051_v30 = vpop.eup %9635  ;;  %v4296_v2 = vsel %vm648_vm2, %v12049_v50, 0.0 }
 0x685   :  { %v12034_v6 = vpop.f32.mrb[148].mxu1  ;;  %9085 = vmatmul.mubr.msk.bf16.vlgmr.msra.gmra.mrb[188].mxu0 %vm648_vm2, %v4517_v18  ;;  %9100 = vmatprep.subr.bf16.mxu1 %v12900_v14  ;;  %v9638_v29 = vpop.eup %9637 }
 0x686   :  { %13009 = vst [vmem:[#allocation63_spill] sm:$0xff] %v12034_v6  ;;  %v8924_v38 = vpop.f32.mrb[149].mxu1  ;;  %9096 = vmatprep.mubr.msk.bf16.mxu0 %vm9920_vm1, %v12900_v14 }
 0x687   :  { %v12038_v0 = vpop.f32.mrb[136].mxu0  ;;  %9091 = vmatmul.mubr.msk.bf16.vlgmr.msra.gmra.mrb[204].mxu1 %vm648_vm2, %v4518_v58  ;;  %v4741_v34 = vpop.f32.mrb[150].mxu1 }
 0x688   :  { %13010 = vst [vmem:[#allocation52_spill] sm:$0xff] %v12038_v0  ;;  %v8930_v17 = vpop.f32.mrb[137].mxu0  ;;  %v8925_v45 = vpop.f32.mrb[151].mxu1  ;;  %9102 = vmatprep.mubr.msk.bf16.mxu1 %vm9920_vm1, %v12900_v14  ;;  %v4293_v34 = vsel %vm648_vm2, %v12051_v30, 0.0 }
 0x689   :  { %v4789_v39 = vpop.f32.mrb[138].mxu0 }
 0x68a   :  { %v8931_v43 = vpop.f32.mrb[139].mxu0 }
 0x68d   :  { %v12045_v42 = vpop.f32.mrb[152].mxu1 }
 0x68e   :  { %13011 = vst [vmem:[#allocation51_spill] sm:$0xff] %v12045_v42  ;;  %v8936_v23 = vpop.f32.mrb[153].mxu1 }
 0x68f   :  { %v12047_v51 = vpop.f32.mrb[140].mxu0  ;;  %v4837_v1 = vpop.f32.mrb[154].mxu1 }
 0x690   :  { %13012 = vst [vmem:[#allocation41_spill] sm:$0xff] %v12047_v51  ;;  %v8942_v7 = vpop.f32.mrb[141].mxu0  ;;  %v8937_v5 = vpop.f32.mrb[155].mxu1 }
 0x691   :  { %v4885_v36 = vpop.f32.mrb[142].mxu0 }
 0x692   :  { %v8943_v19 = vpop.f32.mrb[143].mxu0 }
 0x695   :  { %v12053_v18 = vpop.f32.mrb[156].mxu1 }
 0x696   :  { %13013 = vst [vmem:[#allocation42_spill] sm:$0xff] %v12053_v18  ;;  %v8948_v11 = vpop.f32.mrb[157].mxu1  ;;  %4297 = vadd.xlane.f32.xlu0 %v4296_v2 }
 0x697   :  { %v12055_v58 = vpop.f32.mrb[144].mxu0  ;;  %v4933_v17 = vpop.f32.mrb[158].mxu1 }
 0x698   :  { %13014 = vst [vmem:[#allocation29_spill] sm:$0xff] %v12055_v58  ;;  %v8954_v38 = vpop.f32.mrb[145].mxu0  ;;  %4294 = vadd.xlane.f32.xlu1 %v4293_v34  ;;  %v8949_v45 = vpop.f32.mrb[159].mxu1 }
 0x699   :  { %v4981_v39 = vpop.f32.mrb[146].mxu0 }
 0x69a   :  { %v8955_v43 = vpop.f32.mrb[147].mxu0 }
 0x69d   :  { %v12061_v23 = vpop.f32.mrb[160].mxu1 }
 0x69e   :  { %13015 = vst [vmem:[#allocation30_spill] sm:$0xff] %v12061_v23  ;;  %v8960_v1 = vpop.f32.mrb[161].mxu1  ;;  %v13019_v23 = vld [vmem:[#allocation55_spill] sm:$0xff] }
 0x69f   :  { %v12063_v7 = vpop.f32.mrb[148].mxu0  ;;  %v5029_v5 = vpop.f32.mrb[162].mxu1  ;;  %v13020_v1 = vld [vmem:[#allocation56_spill] sm:$0xff] }
 0x6a0   :  { %13016 = vst [vmem:[#allocation66_spill] sm:$0xff] %v12063_v7  ;;  %v8966_v36 = vpop.f32.mrb[149].mxu0  ;;  %v8961_v11 = vpop.f32.mrb[163].mxu1 }
 0x6a1   :  { %v5077_v19 = vpop.f32.mrb[150].mxu0 }
 0x6a2   :  { %v8967_v58 = vpop.f32.mrb[151].mxu0 }
 0x6a5   :  { %v12065_v38 = vpop.f32.mrb[164].mxu1 }
 0x6a6   :  { %13017 = vst [vmem:[#allocation65_spill] sm:$0xff] %v12065_v38  ;;  %v8972_v51 = vpop.f32.mrb[165].mxu1 }
 0x6a7   :  { %v12067_v17 = vpop.f32.mrb[152].mxu0  ;;  %v5125_v39 = vpop.f32.mrb[166].mxu1 }
 0x6a8   :  { %13018 = vst [vmem:[#allocation54_spill] sm:$0xff] %v12067_v17  ;;  %v8978_v2 = vpop.f32.mrb[153].mxu0  ;;  %v8973_v45 = vpop.f32.mrb[167].mxu1 }
 0x6a9   :  { %v5173_v34 = vpop.f32.mrb[154].mxu0  ;;  %6328 = vrot.lane.b32.xlu1 %v13019_v23, %s9907_s1  ;;  %v4020_v45 = vsub.f32 %v13023_v35, %v11803_v46  ;;  %v9640_v17 = vpop.eup %9639 }
 0x6aa   :  { %v8979_v43 = vpop.f32.mrb[155].mxu0  ;;  %v4456_v38 = vmul.f32 %v9640_v17, %v11686_v3 }
 0x6ac   :  { %6280 = vrot.lane.b32.xlu0 %v13020_v1, %s9907_s1 }
 0x6ad   :  { %v12075_v58 = vpop.f32.mrb[168].mxu1 }
 0x6ae   :  { %13021 = vst [vmem:[#allocation53_spill] sm:$0xff] %v12075_v58  ;;  %v8984_v51 = vpop.f32.mrb[169].mxu1  ;;  %v4129_v58 = vmul.f32 1.442695, %v4020_v45 }
 0x6af   :  { %v12077_v36 = vpop.f32.mrb[156].mxu0  ;;  %v5221_v19 = vpop.f32.mrb[170].mxu1  ;;  %v13025_v51 = vld [vmem:[#allocation80_spill] sm:$0xff] }
 0x6b0   :  { %13022 = vst [vmem:[#allocation76_spill] sm:$0xff] %v12077_v36  ;;  %v8990_v5 = vpop.f32.mrb[157].mxu0  ;;  %v8985_v2 = vpop.f32.mrb[171].mxu1  ;;  %9641 = vpow2.f32 %v4129_v58  ;;  %v13026_v58 = vld [vmem:[#allocation43_spill] sm:$0xff] }
 0x6b1   :  { %v5269_v11 = vpop.f32.mrb[158].mxu0  ;;  %v12079_v34 = vpop.xlane.xlu0 %3967  ;;  %v4019_v5 = vsub.f32 %v13025_v51, %v11756_v61  ;;  %v4520_v51 = vpack.c.bf16 %v4456_v38, %v4456_v38 }
 0x6b2   :  { %v8991_v39 = vpop.f32.mrb[159].mxu0 }
 0x6b3   :  { %v12081_v23 = vpop.xlane.xlu1 %3964  ;;  %v4455_v39 = vmul.f32 %v9638_v29, %v11675_v37  ;;  %v4127_v46 = vmul.f32 1.442695, %v4019_v5 }
 0x6b5   :  { %v12085_v43 = vpop.f32.mrb[172].mxu1  ;;  %v12087_v1 = vpop.xlane.xlu0 %4282  ;;  %v4519_v61 = vpack.c.bf16 %v4455_v39, %v4455_v39  ;;  %9643 = vpow2.f32 %v4127_v46  ;;  %v13027_v39 = vld [vmem:[#allocation44_spill] sm:$0xff] }
 0x6b6   :  { %13024 = vst [vmem:[#allocation75_spill] sm:$0xff] %v12085_v43  ;;  %v8996_v19 = vpop.f32.mrb[173].mxu1  ;;  %9645 = vrcp.f32 %v11969_v10  ;;  %v13029_v10 = vld [vmem:[#allocation39_spill] sm:$0xff] }
 0x6b7   :  { %v12091_v11 = vpop.xlane.xlu1 %4285  ;;  %v5317_v2 = vpop.f32.mrb[174].mxu1  ;;  %9647 = vrcp.f32 %v12011_v60 }
 0x6b8   :  { %v8997_v36 = vpop.f32.mrb[175].mxu1 }
 0x6b9   :  { %v6089_v7 = vpop.permute.xlu0 %6088 }
 0x6ba   :  { %v6094_v43 = vsel %vm4556_vm3, %v6089_v7, 0  ;;  %v12105_v37 = vpop.eup %9641 }
 0x6bb   :  { %v6137_v35 = vpop.permute.xlu1 %6136  ;;  %9095 = vmatpush3.bf16.msra.mxu0 %v6094_v43 }
 0x6bc   :  { %v6142_v18 = vsel %vm4556_vm3, %v6137_v35, 0  ;;  %9106 = vmatprep.subr.bf16.mxu0 %v12900_v14 }
 0x6bd   :  { %9101 = vmatpush3.bf16.msra.mxu1 %v6142_v18  ;;  %v4302_v18 = vsel %vm648_vm2, %v12105_v37, 0.0 }
 0x6be   :  { %9112 = vmatprep.subr.bf16.mxu1 %v12900_v14  ;;  %9097 = vmatmul.mubr.msk.bf16.vlgmr.msra.gmra.mrb[192].mxu0 %vm648_vm2, %v4519_v61 }
 0x6bf   :  { %9108 = vmatprep.mubr.msk.bf16.mxu0 %vm9920_vm1, %v12900_v14  ;;  %v12107_v3 = vpop.eup %9643 }
 0x6c0   :  { %9103 = vmatmul.mubr.msk.bf16.vlgmr.msra.gmra.mrb[208].mxu1 %vm648_vm2, %v4520_v51  ;;  %v4299_v7 = vsel %vm648_vm2, %v12107_v3, 0.0 }
 0x6c1   :  { %9114 = vmatprep.mubr.msk.bf16.mxu1 %vm9920_vm1, %v12900_v14 }
 0x6cb   :  { %4303 = vadd.xlane.f32.xlu0 %v4302_v18 }
 0x6cd   :  { %4300 = vadd.xlane.f32.xlu1 %v4299_v7 }
 0x6db   :  { %v12113_v38 = vpop.f32.mrb[160].mxu0 }
 0x6dc   :  { %v12115_v17 = vpop.f32.mrb[176].mxu1  ;;  %v9002_v36 = vpop.f32.mrb[161].mxu0 }
 0x6dd   :  { %v5365_v45 = vpop.f32.mrb[162].mxu0  ;;  %v9008_v43 = vpop.f32.mrb[177].mxu1 }
 0x6de   :  { %6424 = vrot.lane.b32.xlu1 %v13026_v58, %s9907_s1  ;;  %v9003_v5 = vpop.f32.mrb[163].mxu0  ;;  %v5413_v19 = vpop.f32.mrb[178].mxu1  ;;  %v13028_v43 = vld [vmem:[#allocation40_spill] sm:$0xff] }
 0x6df   :  { %v9009_v2 = vpop.f32.mrb[179].mxu1  ;;  %v4022_v5 = vsub.f32 %v13028_v43, %v11808_v33 }
 0x6e0   :  { %v4021_v2 = vsub.f32 %v13029_v10, %v11814_v4 }
 0x6e1   :  { %6376 = vrot.lane.b32.xlu0 %v13027_v39, %s9907_s1  ;;  %v4133_v29 = vmul.f32 1.442695, %v4022_v5 }
 0x6e3   :  { %v12124_v46 = vpop.f32.mrb[164].mxu0  ;;  %9649 = vpow2.f32 %v4133_v29 }
 0x6e4   :  { %v9014_v35 = vpop.f32.mrb[165].mxu0  ;;  %v12127_v61 = vpop.f32.mrb[180].mxu1 }
 0x6e5   :  { %v5461_v18 = vpop.f32.mrb[166].mxu0  ;;  %v9020_v7 = vpop.f32.mrb[181].mxu1 }
 0x6e6   :  { %v9015_v58 = vpop.f32.mrb[167].mxu0  ;;  %v5509_v36 = vpop.f32.mrb[182].mxu1 }
 0x6e7   :  { %v9021_v45 = vpop.f32.mrb[183].mxu1  ;;  %v9646_v35 = vpop.eup %9645  ;;  %v4131_v58 = vmul.f32 1.442695, %v4021_v2 }
 0x6e8   :  { %v9648_v7 = vpop.eup %9647  ;;  %v4457_v42 = vmul.f32 %v9646_v35, %v11698_v9 }
 0x6e9   :  { %9651 = vpow2.f32 %v4131_v58 }
 0x6ea   :  { %v12133_v19 = vpop.xlane.xlu0 %3973  ;;  %v4521_v29 = vpack.c.bf16 %v4457_v42, %v4457_v42  ;;  %9653 = vrcp.f32 %v12019_v25 }
 0x6eb   :  { %9655 = vrcp.f32 %v12023_v20 }
 0x6ec   :  { %v12137_v60 = vpop.xlane.xlu1 %3970 }
 0x6ed   :  { %v12139_v39 = vpop.f32.mrb[184].mxu1  ;;  %v12167_v42 = vpop.eup %9649 }
 0x6ee   :  { %v9032_v51 = vpop.f32.mrb[185].mxu1  ;;  %v12147_v45 = vpop.xlane.xlu0 %4288 }
 0x6ef   :  { %v12141_v18 = vpop.f32.mrb[168].mxu0  ;;  %v5605_v4 = vpop.f32.mrb[186].mxu1  ;;  %v4458_v51 = vmul.f32 %v9648_v7, %v11812_v26 }
 0x6f0   :  { %v12143_v36 = vpop.xlane.xlu1 %4291  ;;  %v9026_v43 = vpop.f32.mrb[169].mxu0 }
 0x6f1   :  { %v5557_v10 = vpop.f32.mrb[170].mxu0  ;;  %v9033_v0 = vpop.f32.mrb[187].mxu1  ;;  %v4522_v4 = vpack.c.bf16 %v4458_v51, %v4458_v51 }
 0x6f2   :  { %v9027_v5 = vpop.f32.mrb[171].mxu0  ;;  %v6185_v2 = vpop.permute.xlu0 %6184 }
 0x6f3   :  { %v6190_v44 = vsel %vm4556_vm3, %v6185_v2, 0  ;;  %v12169_v7 = vpop.eup %9651 }
 0x6f4   :  { %v6233_v48 = vpop.permute.xlu1 %6232  ;;  %9107 = vmatpush3.bf16.msra.mxu0 %v6190_v44  ;;  %v9654_v20 = vpop.eup %9653 }
 0x6f5   :  { %v6238_v6 = vsel %vm4556_vm3, %v6233_v48, 0  ;;  %v12153_v33 = vpop.f32.mrb[188].mxu1  ;;  %9118 = vmatprep.subr.bf16.mxu0 %v12900_v14 }
 0x6f6   :  { %9113 = vmatpush3.bf16.msra.mxu1 %v6238_v6  ;;  %v9044_v0 = vpop.f32.mrb[189].mxu1 }
 0x6f7   :  { %v12155_v43 = vpop.f32.mrb[172].mxu0  ;;  %9124 = vmatprep.subr.bf16.mxu1 %v12900_v14  ;;  %v5701_v48 = vpop.f32.mrb[190].mxu1  ;;  %9109 = vmatmul.mubr.msk.bf16.vlgmr.msra.gmra.mrb[196].mxu0 %vm648_vm2, %v4521_v29  ;;  %v4308_v29 = vsel %vm648_vm2, %v12167_v42, 0.0 }
 0x6f8   :  { %v9038_v26 = vpop.f32.mrb[173].mxu0  ;;  %v9045_v6 = vpop.f32.mrb[191].mxu1  ;;  %9120 = vmatprep.mubr.msk.bf16.mxu0 %vm9920_vm1, %v12900_v14 }
 0x6f9   :  { %9115 = vmatmul.mubr.msk.bf16.vlgmr.msra.gmra.mrb[212].mxu1 %vm648_vm2, %v4522_v4  ;;  %v5653_v44 = vpop.f32.mrb[174].mxu0  ;;  %v4305_v26 = vsel %vm648_vm2, %v12169_v7, 0.0 }
 0x6fa   :  { %v9039_v35 = vpop.f32.mrb[175].mxu0  ;;  %9126 = vmatprep.mubr.msk.bf16.mxu1 %vm9920_vm1, %v12900_v14 }
 0x6fd   :  { %v12171_v58 = vpop.f32.mrb[192].mxu1 }
 0x6fe   :  { %13030 = vst [vmem:[#allocation70_spill] sm:$0xff] %v12171_v58  ;;  %v9056_v51 = vpop.f32.mrb[193].mxu1 }
 0x6ff   :  { %v5797_v0 = vpop.f32.mrb[194].mxu1 }
 0x700   :  { %v12173_v10 = vpop.f32.mrb[176].mxu0  ;;  %v9057_v4 = vpop.f32.mrb[195].mxu1  ;;  %4309 = vadd.xlane.f32.xlu0 %v4308_v29  ;;  %v13035_v29 = vld [vmem:[#allocation33_spill] sm:$0xff] }
 0x701   :  { %13031 = vst [vmem:[#allocation69_spill] sm:$0xff] %v12173_v10  ;;  %v9050_v2 = vpop.f32.mrb[177].mxu0  ;;  %v13034_v10 = vld [vmem:[#allocation34_spill] sm:$0xff] }
 0x702   :  { %v5749_v48 = vpop.f32.mrb[178].mxu0  ;;  %4306 = vadd.xlane.f32.xlu1 %v4305_v26 }
 0x703   :  { %v9051_v44 = vpop.f32.mrb[179].mxu0 }
 0x705   :  { %v12181_v6 = vpop.f32.mrb[196].mxu1 }
 0x706   :  { %13032 = vst [vmem:[#allocation81_spill] sm:$0xff] %v12181_v6  ;;  %v9068_v35 = vpop.f32.mrb[197].mxu1 }
 0x707   :  { %v5893_v9 = vpop.f32.mrb[198].mxu1 }
 0x708   :  { %v12183_v51 = vpop.f32.mrb[180].mxu0  ;;  %v9069_v5 = vpop.f32.mrb[199].mxu1 }
 0x709   :  { %13033 = vst [vmem:[#allocation82_spill] sm:$0xff] %v12183_v51  ;;  %v9062_v0 = vpop.f32.mrb[181].mxu0  ;;  %v13037_v5 = vld [vmem:[#allocation83_spill] sm:$0xff] }
 0x70a   :  { %v5845_v13 = vpop.f32.mrb[182].mxu0 }
 0x70b   :  { %v9063_v4 = vpop.f32.mrb[183].mxu0  ;;  %v4024_v13 = vsub.f32 %v13037_v5, %v11823_v57  ;;  %v4459_v57 = vmul.f32 %v9654_v20, %v11831_v28  ;;  %v13040_v20 = vld [vmem:[#allocation21_spill] sm:$0xff] }
 0x70c   :  { %v13038_v4 = vld [vmem:[#allocation84_spill] sm:$0xff] }
 0x70d   :  { %v4137_v51 = vmul.f32 1.442695, %v4024_v13  ;;  %v4523_v13 = vpack.c.bf16 %v4459_v57, %v4459_v57  ;;  %v13042_v57 = vld [vmem:[#allocation86_spill] sm:$0xff] }
 0x70f   :  { %9657 = vpow2.f32 %v4137_v51 }
 0x713   :  { %6520 = vrot.lane.b32.xlu1 %v13034_v10, %s9907_s1 }
 0x716   :  { %6472 = vrot.lane.b32.xlu0 %v13035_v29, %s9907_s1  ;;  %v4023_v29 = vsub.f32 %v13038_v4, %v11827_v15 }
 0x71d   :  { %v12193_v26 = vpop.f32.mrb[200].mxu1 }
 0x71e   :  { %v9080_v9 = vpop.f32.mrb[201].mxu1 }
 0x71f   :  { %v5989_v48 = vpop.f32.mrb[202].mxu1  ;;  %v12195_v44 = vpop.f32.mrb[184].mxu0 }
 0x720   :  { %13036 = vst [vmem:[#allocation91_spill] sm:$0xff] %v12195_v44  ;;  %v9081_v35 = vpop.f32.mrb[203].mxu1  ;;  %v9074_v0 = vpop.f32.mrb[185].mxu0  ;;  %v4135_v48 = vmul.f32 1.442695, %v4023_v29 }
 0x721   :  { %v5941_v25 = vpop.f32.mrb[186].mxu0  ;;  %v9656_v9 = vpop.eup %9655 }
 0x722   :  { %v9075_v2 = vpop.f32.mrb[187].mxu0  ;;  %v4460_v5 = vmul.f32 %v9656_v9, %v11837_v22  ;;  %9659 = vpow2.f32 %v4135_v48  ;;  %v12219_v28 = vpop.eup %9657  ;;  %v13039_v25 = vld [vmem:[#allocation22_spill] sm:$0xff]  ;;  %v13041_v9 = vld [vmem:[#allocation85_spill] sm:$0xff] }
 0x723   :  { %v12203_v6 = vpop.xlane.xlu0 %4297  ;;  %v4314_v51 = vsel %vm648_vm2, %v12219_v28, 0.0  ;;  %9661 = vrcp.f32 %v12087_v1  ;;  %v4026_v48 = vsub.f32 %v13041_v9, %v11833_v32 }
 0x724   :  { %v4524_v4 = vpack.c.bf16 %v4460_v5, %v4460_v5  ;;  %9663 = vrcp.f32 %v12091_v11  ;;  %v4025_v5 = vsub.f32 %v13042_v57, %v11839_v53 }
 0x725   :  { %v12205_v58 = vpop.xlane.xlu1 %4294 }
 0x727   :  { %v6281_v35 = vpop.permute.xlu0 %6280 }
 0x728   :  { %v6286_v15 = vsel %vm4556_vm3, %v6281_v35, 0 }
 0x729   :  { %v6329_v0 = vpop.permute.xlu1 %6328  ;;  %9119 = vmatpush3.bf16.msra.mxu0 %v6286_v15  ;;  %v4141_v15 = vmul.f32 1.442695, %v4026_v48 }
 0x72a   :  { %v6334_v2 = vsel %vm4556_vm3, %v6329_v0, 0  ;;  %9130 = vmatprep.subr.bf16.mxu0 %v12900_v14 }
 0x72b   :  { %9125 = vmatpush3.bf16.msra.mxu1 %v6334_v2  ;;  %9665 = vpow2.f32 %v4141_v15  ;;  %v13044_v15 = vld [vmem:[#allocation58_spill] sm:$0xff] }
 0x72c   :  { %9136 = vmatprep.subr.bf16.mxu1 %v12900_v14  ;;  %9121 = vmatmul.mubr.msk.bf16.vlgmr.msra.gmra.mrb[200].mxu0 %vm648_vm2, %v4523_v13  ;;  %v12221_v22 = vpop.eup %9659 }
 0x72d   :  { %9132 = vmatprep.mubr.msk.bf16.mxu0 %vm9920_vm1, %v12900_v14  ;;  %v4311_v29 = vsel %vm648_vm2, %v12221_v22, 0.0  ;;  %v9662_v0 = vpop.eup %9661 }
 0x72e   :  { %9127 = vmatmul.mubr.msk.bf16.vlgmr.msra.gmra.mrb[216].mxu1 %vm648_vm2, %v4524_v4  ;;  %v9664_v4 = vpop.eup %9663  ;;  %v4461_v53 = vmul.f32 %v9662_v0, %v11918_v8  ;;  %v13043_v0 = vld [vmem:[#allocation57_spill] sm:$0xff] }
 0x72f   :  { %9138 = vmatprep.mubr.msk.bf16.mxu1 %vm9920_vm1, %v12900_v14  ;;  %v4462_v48 = vmul.f32 %v9664_v4, %v11925_v40  ;;  %v13045_v4 = vld [vmem:[#allocation87_spill] sm:$0xff] }
 0x730   :  { %v4525_v11 = vpack.c.bf16 %v4461_v53, %v4461_v53 }
 0x735   :  { %4315 = vadd.xlane.f32.xlu0 %v4314_v51  ;;  %v4139_v51 = vmul.f32 1.442695, %v4025_v5  ;;  %v12259_v8 = vpop.eup %9665 }
 0x737   :  { %4312 = vadd.xlane.f32.xlu1 %v4311_v29  ;;  %9667 = vpow2.f32 %v4139_v51  ;;  %v4028_v51 = vsub.f32 %v13045_v4, %v11843_v12 }
 0x738   :  { %9669 = vrcp.f32 %v12147_v45 }
 0x739   :  { %9671 = vrcp.f32 %v12143_v36 }
 0x741   :  { %v12261_v40 = vpop.eup %9667 }
 0x742   :  { %v9670_v53 = vpop.eup %9669 }
 0x748   :  { %6616 = vrot.lane.b32.xlu1 %v13039_v25, %s9907_s1 }
 0x74b   :  { %6568 = vrot.lane.b32.xlu0 %v13040_v20, %s9907_s1 }
 0x758   :  { %v12237_v35 = vpop.f32.mrb[188].mxu0  ;;  %v12239_v2 = vpop.xlane.xlu0 %4303 }
 0x759   :  { %v9086_v13 = vpop.f32.mrb[189].mxu0 }
 0x75a   :  { %v12241_v29 = vpop.f32.mrb[204].mxu1  ;;  %v12243_v1 = vpop.xlane.xlu1 %4300 }
 0x75b   :  { %v9092_v32 = vpop.f32.mrb[205].mxu1  ;;  %v6037_v25 = vpop.f32.mrb[190].mxu0 }
 0x75c   :  { %v6085_v20 = vpop.f32.mrb[206].mxu1  ;;  %v9087_v9 = vpop.f32.mrb[191].mxu0  ;;  %v4526_v32 = vpack.c.bf16 %v4462_v48, %v4462_v48 }
 0x75d   :  { %v9093_v57 = vpop.f32.mrb[207].mxu1  ;;  %v6377_v13 = vpop.permute.xlu0 %6376  ;;  %v4145_v20 = vmul.f32 1.442695, %v4028_v51 }
 0x75e   :  { %v6425_v5 = vpop.permute.xlu1 %6424  ;;  %v6382_v10 = vsel %vm4556_vm3, %v6377_v13, 0  ;;  %v9672_v48 = vpop.eup %9671 }
 0x75f   :  { %v6430_v44 = vsel %vm4556_vm3, %v6425_v5, 0  ;;  %9131 = vmatpush3.bf16.msra.mxu0 %v6382_v10  ;;  %v4317_v10 = vsel %vm648_vm2, %v12261_v40, 0.0  ;;  %v4463_v5 = vmul.f32 %v9670_v53, %v11995_v54  ;;  %9673 = vpow2.f32 %v4145_v20 }
 0x760   :  { %9137 = vmatpush3.bf16.msra.mxu1 %v6430_v44  ;;  %9142 = vmatprep.subr.bf16.mxu0 %v12900_v14  ;;  %v4320_v44 = vsel %vm648_vm2, %v12259_v8, 0.0  ;;  %v4464_v45 = vmul.f32 %v9672_v48, %v11999_v41 }
 0x761   :  { %9148 = vmatprep.subr.bf16.mxu1 %v12900_v14  ;;  %v4527_v41 = vpack.c.bf16 %v4463_v5, %v4463_v5 }
 0x762   :  { %9133 = vmatmul.mubr.msk.bf16.vlgmr.msra.gmra.mrb[204].mxu0 %vm648_vm2, %v4525_v11  ;;  %v13046_v11 = vld [vmem:[#allocation88_spill] sm:$0xff]  ;;  %v4528_v53 = vpack.c.bf16 %v4464_v45, %v4464_v45  ;;  %v13047_v45 = vld [vmem:[#allocation45_spill] sm:$0xff] }
 0x763   :  { %9139 = vmatmul.mubr.msk.bf16.vlgmr.msra.gmra.mrb[220].mxu1 %vm648_vm2, %v4526_v32  ;;  %9144 = vmatprep.mubr.msk.bf16.mxu0 %vm9920_vm1, %v12900_v14  ;;  %v4027_v25 = vsub.f32 %v13046_v11, %v11847_v55 }
 0x764   :  { %9150 = vmatprep.mubr.msk.bf16.mxu1 %vm9920_vm1, %v12900_v14 }
 0x765   :  { %v4143_v57 = vmul.f32 1.442695, %v4027_v25 }
 0x767   :  { %9675 = vpow2.f32 %v4143_v57 }
 0x768   :  { %9677 = vrcp.f32 %v12205_v58 }
 0x769   :  { %v12299_v20 = vpop.eup %9673  ;;  %9679 = vrcp.f32 %v12203_v6 }
 0x76a   :  { %4321 = vadd.xlane.f32.xlu0 %v4320_v44  ;;  %v4326_v57 = vsel %vm648_vm2, %v12299_v20, 0.0 }
 0x76c   :  { %4318 = vadd.xlane.f32.xlu1 %v4317_v10 }
 0x771   :  { %v12301_v48 = vpop.eup %9675 }
 0x772   :  { %v4323_v5 = vsel %vm648_vm2, %v12301_v48, 0.0 }
 0x77d   :  { %6712 = vrot.lane.b32.xlu1 %v13043_v0, %s9907_s1 }
 0x780   :  { %6664 = vrot.lane.b32.xlu0 %v13044_v15, %s9907_s1 }
 0x78d   :  { %v12277_v9 = vpop.xlane.xlu0 %4309 }
 0x78f   :  { %v12279_v13 = vpop.xlane.xlu1 %4306 }
 0x791   :  { %v12283_v36 = vpop.f32.mrb[192].mxu0  ;;  %v6473_v32 = vpop.permute.xlu0 %6472 }
 0x792   :  { %v6478_v44 = vsel %vm4556_vm3, %v6473_v32, 0  ;;  %v9098_v15 = vpop.f32.mrb[193].mxu0  ;;  %v13048_v32 = vld [vmem:[#allocation46_spill] sm:$0xff] }
 0x793   :  { %v12285_v12 = vpop.f32.mrb[208].mxu1  ;;  %v6521_v55 = vpop.permute.xlu1 %6520  ;;  %9143 = vmatpush3.bf16.msra.mxu0 %v6478_v44 }
 0x794   :  { %v6526_v10 = vsel %vm4556_vm3, %v6521_v55, 0  ;;  %v9339_v0 = vpack.i.bf16 %v12285_v12, %v12283_v36  ;;  %v9104_v4 = vpop.f32.mrb[209].mxu1  ;;  %v6133_v54 = vpop.f32.mrb[194].mxu0  ;;  %9154 = vmatprep.subr.bf16.mxu0 %v12900_v14  ;;  %v13049_v55 = vld [vmem:[#allocation89_spill] sm:$0xff] }
 0x795   :  { %v6181_v51 = vpop.f32.mrb[210].mxu1  ;;  %9149 = vmatpush3.bf16.msra.mxu1 %v6526_v10  ;;  %v9099_v11 = vpop.f32.mrb[195].mxu0  ;;  %v4030_v44 = vsub.f32 %v13049_v55, %v11849_v24  ;;  %v13050_v10 = vld [vmem:[#allocation90_spill] sm:$0xff] }
 0x796   :  { %v9105_v25 = vpop.f32.mrb[211].mxu1  ;;  %9160 = vmatprep.subr.bf16.mxu1 %v12900_v14  ;;  %9145 = vmatmul.mubr.msk.bf16.vlgmr.msra.gmra.mrb[208].mxu0 %vm648_vm2, %v4527_v41  ;;  %v4029_v15 = vsub.f32 %v13050_v10, %v11851_v21  ;;  %v9678_v4 = vpop.eup %9677 }
 0x797   :  { %9156 = vmatprep.mubr.msk.bf16.mxu0 %vm9920_vm1, %v12900_v14  ;;  %v4149_v54 = vmul.f32 1.442695, %v4030_v44  ;;  %v9680_v41 = vpop.eup %9679 }
 0x798   :  { %9151 = vmatmul.mubr.msk.bf16.vlgmr.msra.gmra.mrb[224].mxu1 %vm648_vm2, %v4528_v53  ;;  %v4147_v11 = vmul.f32 1.442695, %v4029_v15  ;;  %v4465_v53 = vmul.f32 %v9678_v4, %v12051_v30  ;;  %v4466_v58 = vmul.f32 %v9680_v41, %v12049_v50 }
 0x799   :  { %9162 = vmatprep.mubr.msk.bf16.mxu1 %vm9920_vm1, %v12900_v14  ;;  %9681 = vpow2.f32 %v4149_v54 }
 0x79a   :  { %9683 = vpow2.f32 %v4147_v11 }
 0x79b   :  { %9685 = vrcp.f32 %v12243_v1 }
 0x79c   :  { %9687 = vrcp.f32 %v12239_v2 }
 0x79f   :  { %4327 = vadd.xlane.f32.xlu0 %v4326_v57 }
 0x7a1   :  { %4324 = vadd.xlane.f32.xlu1 %v4323_v5  ;;  %v4529_v5 = vpack.c.bf16 %v4465_v53, %v4465_v53 }
 0x7a3   :  { %v12339_v41 = vpop.eup %9681 }
 0x7a4   :  { %v12341_v11 = vpop.eup %9683  ;;  %v4332_v53 = vsel %vm648_vm2, %v12339_v41, 0.0 }
 0x7b2   :  { %6808 = vrot.lane.b32.xlu1 %v13047_v45, %s9907_s1  ;;  %v4530_v45 = vpack.c.bf16 %v4466_v58, %v4466_v58  ;;  %v4329_v58 = vsel %vm648_vm2, %v12341_v11, 0.0 }
 0x7b5   :  { %6760 = vrot.lane.b32.xlu0 %v13048_v32, %s9907_s1 }
 0x7c2   :  { %v12317_v51 = vpop.xlane.xlu0 %4315 }
 0x7c4   :  { %v12319_v25 = vpop.xlane.xlu1 %4312 }
 0x7c6   :  { %v6569_v6 = vpop.permute.xlu0 %6568 }
 0x7c7   :  { %v6574_v24 = vsel %vm4556_vm3, %v6569_v6, 0  ;;  %v13051_v6 = vld [vmem:[#allocation36_spill] sm:$0xff] }
 0x7c8   :  { %v6617_v57 = vpop.permute.xlu1 %6616  ;;  %9155 = vmatpush3.bf16.msra.mxu0 %v6574_v24  ;;  %v13053_v24 = vld [vmem:[#allocation94_spill] sm:$0xff] }
 0x7c9   :  { %v6622_v21 = vsel %vm4556_vm3, %v6617_v57, 0  ;;  %9166 = vmatprep.subr.bf16.mxu0 %v12900_v14  ;;  %v13052_v57 = vld [vmem:[#allocation35_spill] sm:$0xff] }
 0x7ca   :  { %9161 = vmatpush3.bf16.msra.mxu1 %v6622_v21  ;;  %v12327_v32 = vpop.f32.mrb[196].mxu0  ;;  %v4032_v21 = vsub.f32 %v13053_v24, %v11909_v62 }
 0x7cb   :  { %9172 = vmatprep.subr.bf16.mxu1 %v12900_v14  ;;  %9157 = vmatmul.mubr.msk.bf16.vlgmr.msra.gmra.mrb[212].mxu0 %vm648_vm2, %v4529_v5  ;;  %v9110_v55 = vpop.f32.mrb[197].mxu0  ;;  %v13054_v5 = vld [vmem:[#allocation93_spill] sm:$0xff] }
 0x7cc   :  { %v12329_v30 = vpop.f32.mrb[212].mxu1  ;;  %9168 = vmatprep.mubr.msk.bf16.mxu0 %vm9920_vm1, %v12900_v14  ;;  %v6229_v10 = vpop.f32.mrb[198].mxu0 }
 0x7cd   :  { %v9344_v50 = vpack.i.bf16 %v12329_v30, %v12327_v32  ;;  %v9116_v44 = vpop.f32.mrb[213].mxu1  ;;  %9163 = vmatmul.mubr.msk.bf16.vlgmr.msra.gmra.mrb[228].mxu1 %vm648_vm2, %v4530_v45  ;;  %v9111_v4 = vpop.f32.mrb[199].mxu0  ;;  %v4031_v45 = vsub.f32 %v13054_v5, %v11888_v63 }
 0x7ce   :  { %v6277_v15 = vpop.f32.mrb[214].mxu1  ;;  %9174 = vmatprep.mubr.msk.bf16.mxu1 %vm9920_vm1, %v12900_v14  ;;  %v9686_v55 = vpop.eup %9685  ;;  %v4153_v44 = vmul.f32 1.442695, %v4032_v21 }
 0x7cf   :  { %v9117_v54 = vpop.f32.mrb[215].mxu1  ;;  %v9688_v15 = vpop.eup %9687  ;;  %v4151_v4 = vmul.f32 1.442695, %v4031_v45 }
 0x7d0   :  { %9689 = vpow2.f32 %v4153_v44  ;;  %v4468_v1 = vmul.f32 %v9688_v15, %v12105_v37 }
 0x7d1   :  { %9691 = vpow2.f32 %v4151_v4 }
 0x7d2   :  { %v4532_v24 = vpack.c.bf16 %v4468_v1, %v4468_v1  ;;  %9693 = vrcp.f32 %v12279_v13 }
 0x7d3   :  { %9695 = vrcp.f32 %v12277_v9 }
 0x7d4   :  { %4333 = vadd.xlane.f32.xlu0 %v4332_v53  ;;  %v4467_v53 = vmul.f32 %v9686_v55, %v12107_v3 }
 0x7d6   :  { %4330 = vadd.xlane.f32.xlu1 %v4329_v58 }
 0x7da   :  { %v12379_v4 = vpop.eup %9689 }
 0x7db   :  { %v4338_v1 = vsel %vm648_vm2, %v12379_v4, 0.0 }
 0x7e7   :  { %6904 = vrot.lane.b32.xlu1 %v13051_v6, %s9907_s1  ;;  %v4531_v6 = vpack.c.bf16 %v4467_v53, %v4467_v53  ;;  %v12381_v53 = vpop.eup %9691 }
 0x7ea   :  { %6856 = vrot.lane.b32.xlu0 %v13052_v57, %s9907_s1 }
 0x7f7   :  { %v12357_v10 = vpop.xlane.xlu0 %4321 }
 0x7f9   :  { %v12359_v54 = vpop.xlane.xlu1 %4318 }
 0x7fb   :  { %v6665_v2 = vpop.permute.xlu0 %6664 }
 0x7fc   :  { %v6670_v62 = vsel %vm4556_vm3, %v6665_v2, 0  ;;  %v4335_v2 = vsel %vm648_vm2, %v12381_v53, 0.0 }
 0x7fd   :  { %v6713_v58 = vpop.permute.xlu1 %6712  ;;  %9167 = vmatpush3.bf16.msra.mxu0 %v6670_v62  ;;  %v13056_v62 = vld [vmem:[#allocation23_spill] sm:$0xff] }
 0x7fe   :  { %v6718_v63 = vsel %vm4556_vm3, %v6713_v58, 0  ;;  %9178 = vmatprep.subr.bf16.mxu0 %v12900_v14  ;;  %v13055_v58 = vld [vmem:[#allocation24_spill] sm:$0xff] }
 0x7ff   :  { %9173 = vmatpush3.bf16.msra.mxu1 %v6718_v63  ;;  %v12366_v57 = vpop.f32.mrb[200].mxu0  ;;  %v4034_v63 = vsub.f32 %v11818_v27, %v12015_v31 }
 0x800   :  { %9184 = vmatprep.subr.bf16.mxu1 %v12900_v14  ;;  %v9122_v37 = vpop.f32.mrb[201].mxu0  ;;  %9169 = vmatmul.mubr.msk.bf16.vlgmr.msra.gmra.mrb[216].mxu0 %vm648_vm2, %v4531_v6  ;;  %v4033_v6 = vsub.f32 %v11821_v16, %v12017_v59 }
 0x801   :  { %v12369_v3 = vpop.f32.mrb[216].mxu1  ;;  %v6325_v45 = vpop.f32.mrb[202].mxu0  ;;  %9180 = vmatprep.mubr.msk.bf16.mxu0 %vm9920_vm1, %v12900_v14  ;;  %v4157_v37 = vmul.f32 1.442695, %v4034_v63 }
 0x802   :  { %v9369_v21 = vpack.i.bf16 %v12369_v3, %v12366_v57  ;;  %v9128_v5 = vpop.f32.mrb[217].mxu1  ;;  %9175 = vmatmul.mubr.msk.bf16.vlgmr.msra.gmra.mrb[232].mxu1 %vm648_vm2, %v4532_v24  ;;  %v9123_v44 = vpop.f32.mrb[203].mxu0 }
 0x803   :  { %v6373_v55 = vpop.f32.mrb[218].mxu1  ;;  %9186 = vmatprep.mubr.msk.bf16.mxu1 %vm9920_vm1, %v12900_v14  ;;  %v9694_v24 = vpop.eup %9693  ;;  %9697 = vpow2.f32 %v4157_v37 }
 0x804   :  { %v9129_v15 = vpop.f32.mrb[219].mxu1  ;;  %v9696_v45 = vpop.eup %9695  ;;  %v4155_v55 = vmul.f32 1.442695, %v4033_v6 }
 0x805   :  { %v4469_v15 = vmul.f32 %v9694_v24, %v12169_v7  ;;  %v4470_v13 = vmul.f32 %v9696_v45, %v12167_v42 }
 0x806   :  { %9699 = vpow2.f32 %v4155_v55 }
 0x807   :  { %v4533_v31 = vpack.c.bf16 %v4469_v15, %v4469_v15  ;;  %9701 = vrcp.f32 %v12319_v25 }
 0x808   :  { %9703 = vrcp.f32 %v12317_v51 }
 0x809   :  { %4339 = vadd.xlane.f32.xlu0 %v4338_v1 }
 0x80b   :  { %4336 = vadd.xlane.f32.xlu1 %v4335_v2  ;;  %v4534_v2 = vpack.c.bf16 %v4470_v13, %v4470_v13 }
 0x80d   :  { %v12419_v45 = vpop.eup %9697 }
 0x80e   :  { %v4344_v15 = vsel %vm648_vm2, %v12419_v45, 0.0 }
 0x810   :  { %v12421_v55 = vpop.eup %9699 }
 0x811   :  { %v4341_v13 = vsel %vm648_vm2, %v12421_v55, 0.0 }
 0x81c   :  { %7000 = vrot.lane.b32.xlu1 %v13055_v58, %s9907_s1 }
 0x81f   :  { %6952 = vrot.lane.b32.xlu0 %v13056_v62, %s9907_s1 }
 0x82c   :  { %v12397_v5 = vpop.xlane.xlu0 %4327 }
 0x82e   :  { %v12399_v44 = vpop.xlane.xlu1 %4324 }
 0x830   :  { %v6761_v9 = vpop.permute.xlu0 %6760 }
 0x831   :  { %v6766_v27 = vsel %vm4556_vm3, %v6761_v9, 0  ;;  %v13057_v9 = vld [vmem:[#allocation59_spill] sm:$0xff] }
 0x832   :  { %v6809_v1 = vpop.permute.xlu1 %6808  ;;  %9179 = vmatpush3.bf16.msra.mxu0 %v6766_v27  ;;  %v4036_v27 = vsub.f32 %v11907_v49, %v12079_v34 }
 0x833   :  { %v6814_v16 = vsel %vm4556_vm3, %v6809_v1, 0  ;;  %9190 = vmatprep.subr.bf16.mxu0 %v12900_v14  ;;  %v13058_v1 = vld [vmem:[#allocation60_spill] sm:$0xff] }
 0x834   :  { %9185 = vmatpush3.bf16.msra.mxu1 %v6814_v16  ;;  %v4035_v16 = vsub.f32 %v11913_v56, %v12081_v23 }
 0x835   :  { %v12406_v59 = vpop.f32.mrb[204].mxu0  ;;  %9196 = vmatprep.subr.bf16.mxu1 %v12900_v14  ;;  %9181 = vmatmul.mubr.msk.bf16.vlgmr.msra.gmra.mrb[220].mxu0 %vm648_vm2, %v4533_v31  ;;  %v9702_v31 = vpop.eup %9701 }
 0x836   :  { %v12409_v7 = vpop.f32.mrb[220].mxu1  ;;  %v9134_v42 = vpop.f32.mrb[205].mxu0  ;;  %9192 = vmatprep.mubr.msk.bf16.mxu0 %vm9920_vm1, %v12900_v14 }
 0x837   :  { %v9374_v58 = vpack.i.bf16 %v12409_v7, %v12406_v59  ;;  %v9140_v62 = vpop.f32.mrb[221].mxu1  ;;  %9187 = vmatmul.mubr.msk.bf16.vlgmr.msra.gmra.mrb[236].mxu1 %vm648_vm2, %v4534_v2  ;;  %v6421_v63 = vpop.f32.mrb[206].mxu0  ;;  %v4161_v2 = vmul.f32 1.442695, %v4036_v27 }
 0x838   :  { %v6469_v6 = vpop.f32.mrb[222].mxu1  ;;  %v9135_v24 = vpop.f32.mrb[207].mxu0  ;;  %9198 = vmatprep.mubr.msk.bf16.mxu1 %vm9920_vm1, %v12900_v14  ;;  %v4159_v63 = vmul.f32 1.442695, %v4035_v16 }
 0x839   :  { %v9141_v37 = vpop.f32.mrb[223].mxu1  ;;  %v9704_v62 = vpop.eup %9703  ;;  %v4471_v24 = vmul.f32 %v9702_v31, %v12221_v22  ;;  %9705 = vpow2.f32 %v4161_v2 }
 0x83a   :  { %v4472_v25 = vmul.f32 %v9704_v62, %v12219_v28  ;;  %9707 = vpow2.f32 %v4159_v63 }
 0x83b   :  { %v4535_v34 = vpack.c.bf16 %v4471_v24, %v4471_v24  ;;  %9709 = vrcp.f32 %v12359_v54 }
 0x83c   :  { %9711 = vrcp.f32 %v12357_v10 }
 0x83e   :  { %4345 = vadd.xlane.f32.xlu0 %v4344_v15  ;;  %v4536_v15 = vpack.c.bf16 %v4472_v25, %v4472_v25  ;;  %v13059_v25 = vld [vmem:[#allocation47_spill] sm:$0xff] }
 0x840   :  { %4342 = vadd.xlane.f32.xlu1 %v4341_v13 }
 0x843   :  { %v12459_v2 = vpop.eup %9705 }
 0x844   :  { %v12461_v62 = vpop.eup %9707  ;;  %v4350_v63 = vsel %vm648_vm2, %v12459_v2, 0.0 }
 0x845   :  { %v4347_v24 = vsel %vm648_vm2, %v12461_v62, 0.0 }
 0x851   :  { %7096 = vrot.lane.b32.xlu1 %v13057_v9, %s9907_s1 }
 0x854   :  { %7048 = vrot.lane.b32.xlu0 %v13058_v1, %s9907_s1 }
 0x861   :  { %v12437_v42 = vpop.xlane.xlu0 %4333 }
 0x863   :  { %v12439_v6 = vpop.xlane.xlu1 %4330 }
 0x865   :  { %v6857_v51 = vpop.permute.xlu0 %6856 }
 0x866   :  { %v6862_v49 = vsel %vm4556_vm3, %v6857_v51, 0  ;;  %v13060_v51 = vld [vmem:[#allocation48_spill] sm:$0xff] }
 0x867   :  { %v6905_v37 = vpop.permute.xlu1 %6904  ;;  %9191 = vmatpush3.bf16.msra.mxu0 %v6862_v49  ;;  %v4037_v49 = vsub.f32 %v11991_v47, %v12137_v60 }
 0x868   :  { %v6910_v56 = vsel %vm4556_vm3, %v6905_v37, 0  ;;  %9202 = vmatprep.subr.bf16.mxu0 %v12900_v14  ;;  %v4038_v37 = vsub.f32 %v11988_v52, %v12133_v19 }
 0x869   :  { %9197 = vmatpush3.bf16.msra.mxu1 %v6910_v56  ;;  %v12446_v23 = vpop.f32.mrb[208].mxu0  ;;  %v9710_v56 = vpop.eup %9709 }
 0x86a   :  { %9208 = vmatprep.subr.bf16.mxu1 %v12900_v14  ;;  %v9146_v28 = vpop.f32.mrb[209].mxu0  ;;  %9193 = vmatmul.mubr.msk.bf16.vlgmr.msra.gmra.mrb[224].mxu0 %vm648_vm2, %v4535_v34  ;;  %v4165_v34 = vmul.f32 1.442695, %v4038_v37 }
 0x86b   :  { %v12449_v22 = vpop.f32.mrb[224].mxu1  ;;  %v6517_v1 = vpop.f32.mrb[210].mxu0  ;;  %9204 = vmatprep.mubr.msk.bf16.mxu0 %vm9920_vm1, %v12900_v14 }
 0x86c   :  { %v9399_v13 = vpack.i.bf16 %v12449_v22, %v12446_v23  ;;  %v9152_v9 = vpop.f32.mrb[225].mxu1  ;;  %9199 = vmatmul.mubr.msk.bf16.vlgmr.msra.gmra.mrb[240].mxu1 %vm648_vm2, %v4536_v15  ;;  %v9147_v16 = vpop.f32.mrb[211].mxu0  ;;  %9713 = vpow2.f32 %v4165_v34 }
 0x86d   :  { %v6565_v27 = vpop.f32.mrb[226].mxu1  ;;  %9210 = vmatprep.mubr.msk.bf16.mxu1 %vm9920_vm1, %v12900_v14  ;;  %v9712_v28 = vpop.eup %9711  ;;  %v4163_v9 = vmul.f32 1.442695, %v4037_v49 }
 0x86e   :  { %v9153_v31 = vpop.f32.mrb[227].mxu1  ;;  %v4473_v27 = vmul.f32 %v9710_v56, %v12261_v40  ;;  %v4474_v54 = vmul.f32 %v9712_v28, %v12259_v8 }
 0x86f   :  { %9715 = vpow2.f32 %v4163_v9 }
 0x870   :  { %v4537_v19 = vpack.c.bf16 %v4473_v27, %v4473_v27  ;;  %v4538_v31 = vpack.c.bf16 %v4474_v54, %v4474_v54  ;;  %v13061_v27 = vld [vmem:[#allocation38_spill] sm:$0xff]  ;;  %v13062_v54 = vld [vmem:[#allocation25_spill] sm:$0xff]  ;;  %9717 = vrcp.f32 %v12399_v44  ;;  %v13069_v44 = vpack.i.bf16 %v12115_v17, %v12113_v38 }
 0x871   :  { %9719 = vrcp.f32 %v12397_v5 }
 0x872   :  { %9721 = vrcp.f32 %v12439_v6 }
 0x873   :  { %4351 = vadd.xlane.f32.xlu0 %v4350_v63  ;;  %9723 = vrcp.f32 %v12437_v42 }
 0x875   :  { %4348 = vadd.xlane.f32.xlu1 %v4347_v24 }
 0x876   :  { %v12499_v56 = vpop.eup %9713 }
 0x877   :  { %v4356_v28 = vsel %vm648_vm2, %v12499_v56, 0.0 }
 0x879   :  { %v12501_v34 = vpop.eup %9715 }
 0x87a   :  { %v4353_v9 = vsel %vm648_vm2, %v12501_v34, 0.0  ;;  %v9718_v5 = vpop.eup %9717 }
 0x886   :  { %7192 = vrot.lane.b32.xlu1 %v13059_v25, %s9907_s1 }
 0x889   :  { %7144 = vrot.lane.b32.xlu0 %v13060_v51, %s9907_s1 }
 0x896   :  { %v12477_v15 = vpop.xlane.xlu0 %4339 }
 0x898   :  { %v12479_v1 = vpop.xlane.xlu1 %4336 }
 0x899   :  { %9725 = vrcp.f32 %v12479_v1 }
 0x89a   :  { %v6953_v10 = vpop.permute.xlu0 %6952  ;;  %9727 = vrcp.f32 %v12477_v15 }
 0x89b   :  { %v6958_v52 = vsel %vm4556_vm3, %v6953_v10, 0  ;;  %v13063_v10 = vld [vmem:[#allocation37_spill] sm:$0xff] }
 0x89c   :  { %v7001_v16 = vpop.permute.xlu1 %7000  ;;  %9203 = vmatpush3.bf16.msra.mxu0 %v6958_v52  ;;  %v13065_v52 = vld [vmem:[#allocation62_spill] sm:$0xff] }
 0x89d   :  { %v7006_v47 = vsel %vm4556_vm3, %v7001_v16, 0  ;;  %9214 = vmatprep.subr.bf16.mxu0 %v12900_v14  ;;  %v13064_v16 = vld [vmem:[#allocation26_spill] sm:$0xff] }
 0x89e   :  { %9209 = vmatpush3.bf16.msra.mxu1 %v7006_v47  ;;  %v12486_v60 = vpop.f32.mrb[212].mxu0  ;;  %v13066_v47 = vld [vmem:[#allocation61_spill] sm:$0xff] }
 0x89f   :  { %9220 = vmatprep.subr.bf16.mxu1 %v12900_v14  ;;  %v9158_v8 = vpop.f32.mrb[213].mxu0  ;;  %9205 = vmatmul.mubr.msk.bf16.vlgmr.msra.gmra.mrb[228].mxu0 %vm648_vm2, %v4537_v19  ;;  %v13067_v19 = vld [vmem:[#allocation50_spill] sm:$0xff] }
 0x8a0   :  { %v12489_v40 = vpop.f32.mrb[228].mxu1  ;;  %v6613_v25 = vpop.f32.mrb[214].mxu0  ;;  %9216 = vmatprep.mubr.msk.bf16.mxu0 %vm9920_vm1, %v12900_v14 }
 0x8a1   :  { %v9404_v63 = vpack.i.bf16 %v12489_v40, %v12486_v60  ;;  %v9164_v24 = vpop.f32.mrb[229].mxu1  ;;  %9211 = vmatmul.mubr.msk.bf16.vlgmr.msra.gmra.mrb[244].mxu1 %vm648_vm2, %v4538_v31  ;;  %v9159_v37 = vpop.f32.mrb[215].mxu0  ;;  %v13068_v31 = vld [vmem:[#allocation49_spill] sm:$0xff] }
 0x8a2   :  { %v6661_v51 = vpop.f32.mrb[230].mxu1  ;;  %9222 = vmatprep.mubr.msk.bf16.mxu1 %vm9920_vm1, %v12900_v14  ;;  %v9720_v24 = vpop.eup %9719  ;;  %v13070_v37 = vpack.i.bf16 %v12127_v61, %v12124_v46 }
 0x8a3   :  { %v9165_v49 = vpop.f32.mrb[231].mxu1  ;;  %v4475_v51 = vmul.f32 %v9718_v5, %v12301_v48  ;;  %v4476_v38 = vmul.f32 %v9720_v24, %v12299_v20 }
 0x8a5   :  { %v4539_v46 = vpack.c.bf16 %v4475_v51, %v4475_v51  ;;  %v4540_v36 = vpack.c.bf16 %v4476_v38, %v4476_v38 }
 0x8a8   :  { %4357 = vadd.xlane.f32.xlu0 %v4356_v28 }
 0x8aa   :  { %4354 = vadd.xlane.f32.xlu1 %v4353_v9 }
 0x8bb   :  { %7288 = vrot.lane.b32.xlu1 %v13061_v27, %s9907_s1 }
 0x8be   :  { %7240 = vrot.lane.b32.xlu0 %v13063_v10, %s9907_s1 }
 0x8bf   :  { %7336 = vrot.lane.b32.xlu1 %v13062_v54, %s9907_s1  ;;  %v9722_v54 = vpop.eup %9721 }
 0x8c2   :  { %7432 = vrot.lane.b32.xlu0 %v13065_v52, %s9907_s1 }
 0x8c3   :  { %7384 = vrot.lane.b32.xlu1 %v13064_v16, %s9907_s1  ;;  %v9724_v16 = vpop.eup %9723 }
 0x8c6   :  { %7528 = vrot.lane.b32.xlu0 %v13067_v19, %s9907_s1  ;;  %v4478_v19 = vmul.f32 %v9724_v16, %v12339_v41 }
 0x8c7   :  { %7480 = vrot.lane.b32.xlu1 %v13066_v47, %s9907_s1  ;;  %v4477_v47 = vmul.f32 %v9722_v54, %v12341_v11 }
 0x8c8   :  { %v4542_v6 = vpack.c.bf16 %v4478_v19, %v4478_v19 }
 0x8c9   :  { %v4541_v51 = vpack.c.bf16 %v4477_v47, %v4477_v47 }
 0x8ca   :  { %9330 = vrot.lane.b32.xlu0 %v13069_v44, %s9911_s24 }
 0x8cb   :  { %7576 = vrot.lane.b32.xlu1 %v13068_v31, %s9907_s1  ;;  %v12529_v8 = vpop.xlane.xlu0 %4345 }
 0x8cd   :  { %v4343_v25 = vpop.xlane.xlu1 %4342 }
 0x8ce   :  { %9340 = vrot.lane.b32.xlu0 %v9339_v0, %s9921_s28  ;;  %9729 = vrcp.f32 %v4343_v25 }
 0x8cf   :  { %9335 = vrot.lane.b32.xlu1 %v13070_v37, %s9911_s24  ;;  %v7049_v17 = vpop.permute.xlu0 %7048  ;;  %9731 = vrcp.f32 %v12529_v8 }
 0x8d0   :  { %v7054_v28 = vsel %vm4556_vm3, %v7049_v17, 0 }
 0x8d1   :  { %v7097_v49 = vpop.permute.xlu1 %7096  ;;  %9215 = vmatpush3.bf16.msra.mxu0 %v7054_v28 }
 0x8d2   :  { %v7102_v9 = vsel %vm4556_vm3, %v7097_v49, 0  ;;  %9226 = vmatprep.subr.bf16.mxu0 %v12900_v14 }
 0x8d3   :  { %9345 = vrot.lane.b32.xlu1 %v9344_v50, %s9921_s28  ;;  %9221 = vmatpush3.bf16.msra.mxu1 %v7102_v9  ;;  %v12547_v61 = vpop.f32.mrb[216].mxu0 }
 0x8d4   :  { %9232 = vmatprep.subr.bf16.mxu1 %v12900_v14  ;;  %v9170_v0 = vpop.f32.mrb[217].mxu0  ;;  %9217 = vmatmul.mubr.msk.bf16.vlgmr.msra.gmra.mrb[232].mxu0 %vm648_vm2, %v4539_v46  ;;  %v9726_v46 = vpop.eup %9725 }
 0x8d5   :  { %v12551_v12 = vpop.f32.mrb[232].mxu1  ;;  %v6709_v32 = vpop.f32.mrb[218].mxu0  ;;  %9228 = vmatprep.mubr.msk.bf16.mxu0 %vm9920_vm1, %v12900_v14 }
 0x8d6   :  { %v9429_v20 = vpack.i.bf16 %v12551_v12, %v12547_v61  ;;  %v9176_v48 = vpop.f32.mrb[233].mxu1  ;;  %9223 = vmatmul.mubr.msk.bf16.vlgmr.msra.gmra.mrb[248].mxu1 %vm648_vm2, %v4540_v36  ;;  %v9171_v50 = vpop.f32.mrb[219].mxu0  ;;  %v4479_v32 = vmul.f32 %v9726_v46, %v12381_v53 }
 0x8d7   :  { %v6757_v30 = vpop.f32.mrb[234].mxu1  ;;  %9234 = vmatprep.mubr.msk.bf16.mxu1 %vm9920_vm1, %v12900_v14  ;;  %v9728_v0 = vpop.eup %9727 }
 0x8d8   :  { %v9177_v27 = vpop.f32.mrb[235].mxu1  ;;  %v4480_v30 = vmul.f32 %v9728_v0, %v12379_v4  ;;  %v4543_v15 = vpack.c.bf16 %v4479_v32, %v4479_v32  ;;  %v9730_v8 = vpop.eup %9729 }
 0x8d9   :  { %v9732_v53 = vpop.eup %9731 }
 0x8da   :  { %v4544_v25 = vpack.c.bf16 %v4480_v30, %v4480_v30 }
 0x900   :  { %v4352_v10 = vpop.xlane.xlu0 %4351 }
 0x902   :  { %v4349_v52 = vpop.xlane.xlu1 %4348 }
 0x903   :  { %9733 = vrcp.f32 %v4349_v52 }
 0x904   :  { %v7145_v31 = vpop.permute.xlu0 %7144  ;;  %9735 = vrcp.f32 %v4352_v10  ;;  %v4481_v10 = vmul.f32 %v9730_v8, %v12421_v55  ;;  %v9451_v8 = vld [vmem:[#allocation10] sm:$0xff]  }
 0x905   :  { %v7150_v5 = vsel %vm4556_vm3, %v7145_v31, 0 }
 0x906   :  { %v7193_v44 = vpop.permute.xlu1 %7192  ;;  %9227 = vmatpush3.bf16.msra.mxu0 %v7150_v5 }
 0x907   :  { %v7198_v24 = vsel %vm4556_vm3, %v7193_v44, 0  ;;  %9238 = vmatprep.subr.bf16.mxu0 %v12900_v14 }
 0x908   :  { %9233 = vmatpush3.bf16.msra.mxu1 %v7198_v24  ;;  %v12568_v42 = vpop.f32.mrb[220].mxu0 }
 0x909   :  { %9244 = vmatprep.subr.bf16.mxu1 %v12900_v14  ;;  %v9182_v11 = vpop.f32.mrb[221].mxu0  ;;  %9229 = vmatmul.mubr.msk.bf16.vlgmr.msra.gmra.mrb[236].mxu0 %vm648_vm2, %v4541_v51  ;;  %v4482_v51 = vmul.f32 %v9732_v53, %v12419_v45  ;;  %v13071_v45 = vpack.i.bf16 %v12139_v39, %v12141_v18 }
 0x90a   :  { %v12571_v37 = vpop.f32.mrb[236].mxu1  ;;  %v6805_v17 = vpop.f32.mrb[222].mxu0  ;;  %9240 = vmatprep.mubr.msk.bf16.mxu0 %vm9920_vm1, %v12900_v14 }
 0x90b   :  { %v9434_v41 = vpack.i.bf16 %v12571_v37, %v12568_v42  ;;  %v9188_v38 = vpop.f32.mrb[237].mxu1  ;;  %9235 = vmatmul.mubr.msk.bf16.vlgmr.msra.gmra.mrb[252].mxu1 %vm648_vm2, %v4542_v6  ;;  %v9183_v28 = vpop.f32.mrb[223].mxu0 }
 0x90c   :  { %v6853_v49 = vpop.f32.mrb[238].mxu1  ;;  %9246 = vmatprep.mubr.msk.bf16.mxu1 %vm9920_vm1, %v12900_v14 }
 0x90d   :  { %v9189_v9 = vpop.f32.mrb[239].mxu1  ;;  %v4545_v49 = vpack.c.bf16 %v4481_v10, %v4481_v10  ;;  %v9734_v28 = vpop.eup %9733 }
 0x90e   :  { %v4546_v9 = vpack.c.bf16 %v4482_v51, %v4482_v51  ;;  %v9736_v46 = vpop.eup %9735 }
 0x90f   :  { %v4484_v39 = vmul.f32 %v9736_v46, %v12459_v2  ;;  %v13076_v46 = vld [vmem:[#allocation28_spill] sm:$0xff] }
 0x935   :  { %v4358_v36 = vpop.xlane.xlu0 %4357 }
 0x937   :  { %v4355_v48 = vpop.xlane.xlu1 %4354 }
 0x938   :  { %9737 = vrcp.f32 %v4355_v48 }
 0x939   :  { %v7241_v50 = vpop.permute.xlu0 %7240  ;;  %9739 = vrcp.f32 %v4358_v36  ;;  %v4483_v36 = vmul.f32 %v9734_v28, %v12461_v62 }
 0x93a   :  { %v7246_v54 = vsel %vm4556_vm3, %v7241_v50, 0 }
 0x93b   :  { %v7289_v27 = vpop.permute.xlu1 %7288  ;;  %9239 = vmatpush3.bf16.msra.mxu0 %v7246_v54  ;;  %v4547_v30 = vpack.c.bf16 %v4483_v36, %v4483_v36 }
 0x93c   :  { %v7294_v1 = vsel %vm4556_vm3, %v7289_v27, 0  ;;  %9250 = vmatprep.subr.bf16.mxu0 %v12900_v14  ;;  %v4548_v27 = vpack.c.bf16 %v4484_v39, %v4484_v39 }
 0x93d   :  { %9245 = vmatpush3.bf16.msra.mxu1 %v7294_v1  ;;  %v6898_v16 = vpop.f32.mrb[224].mxu0  ;;  %v7433_v17 = vpop.permute.xlu0 %7432 }
 0x93e   :  { %9256 = vmatprep.subr.bf16.mxu1 %v12900_v14  ;;  %9241 = vmatmul.mubr.msk.bf16.vlgmr.msra.gmra.mrb[240].mxu0 %vm648_vm2, %v4543_v15  ;;  %v9194_v31 = vpop.f32.mrb[225].mxu0  ;;  %v7438_v0 = vsel %vm4556_vm3, %v7433_v17, 0 }
 0x93f   :  { %v7337_v4 = vpop.permute.xlu1 %7336  ;;  %v6946_v47 = vpop.f32.mrb[240].mxu1  ;;  %9252 = vmatprep.mubr.msk.bf16.mxu0 %vm9920_vm1, %v12900_v14  ;;  %v13072_v31 = vpack.i.bf16 %v12153_v33, %v12155_v43  ;;  %v13073_v33 = vld [vmem:[#allocation70_spill] sm:$0xff]  ;;  %v13074_v43 = vld [vmem:[#allocation69_spill] sm:$0xff] }
 0x940   :  { %v7342_v52 = vsel %vm4556_vm3, %v7337_v4, 0  ;;  %v9349_v19 = vpack.i.bf16 %v6946_v47, %v6898_v16  ;;  %v9200_v44 = vpop.f32.mrb[241].mxu1  ;;  %9247 = vmatmul.mubr.msk.bf16.vlgmr.msra.gmra.mrb[0].mxu1 %vm648_vm2, %v4544_v25  ;;  %v6901_v5 = vpop.f32.mrb[226].mxu0  ;;  %v9452_v25 = vld [vmem:[#allocation10 + $0x8] sm:$0xff]   ;;  %v13075_v28 = vpack.i.bf16 %v13073_v33, %v13074_v43 }
 0x941   :  { %v6949_v24 = vpop.f32.mrb[242].mxu1  ;;  %9251 = vmatpush3.bf16.msra.mxu0 %v7342_v52  ;;  %9258 = vmatprep.mubr.msk.bf16.mxu1 %vm9920_vm1, %v12900_v14  ;;  %v9195_v11 = vpop.f32.mrb[227].mxu0 }
 0x942   :  { %v9201_v6 = vpop.f32.mrb[243].mxu1  ;;  %9350 = vrot.lane.b32.xlu0 %v9349_v19, %s9922_s29  ;;  %9262 = vmatprep.subr.bf16.mxu0 %v12900_v14  ;;  %v7529_v18 = vpop.permute.xlu0 %7528 }
 0x943   :  { %v7385_v38 = vpop.permute.xlu1 %7384  ;;  %v9738_v50 = vpop.eup %9737  ;;  %v7534_v2 = vsel %vm4556_vm3, %v7529_v18, 0 }
 0x944   :  { %v7390_v55 = vsel %vm4556_vm3, %v7385_v38, 0  ;;  %v9740_v54 = vpop.eup %9739  ;;  %v4485_v3 = vmul.f32 %v9738_v50, %v12501_v34 }
 0x945   :  { %9257 = vmatpush3.bf16.msra.mxu1 %v7390_v55 }
 0x946   :  { %9360 = vrot.lane.b32.xlu0 %v13071_v45, %s9911_s24  ;;  %9268 = vmatprep.subr.bf16.mxu1 %v12900_v14  ;;  %v4549_v1 = vpack.c.bf16 %v4485_v3, %v4485_v3  ;;  %v9331_v44 = vpop.permute.xlu0 %9330 }
 0x947   :  { %v7481_v32 = vpop.permute.xlu1 %7480  ;;  %9253 = vmatmul.mubr.msk.bf16.vlgmr.msra.gmra.mrb[244].mxu0 %vm648_vm2, %v4545_v49  ;;  %v9333_v59 = vunpack.i.h.bf16 %v9331_v44  ;;  %v9332_v7 = vunpack.i.l.bf16 %v9331_v44 }
 0x948   :  { %v7486_v48 = vsel %vm4556_vm3, %v7481_v32, 0  ;;  %9259 = vmatmul.mubr.msk.bf16.vlgmr.msra.gmra.mrb[4].mxu1 %vm648_vm2, %v4546_v9  ;;  %9263 = vmatpush3.bf16.msra.mxu0 %v7438_v0  ;;  %v13077_v32 = vld [vmem:[#allocation27_spill] sm:$0xff] }
 0x949   :  { %9269 = vmatpush3.bf16.msra.mxu1 %v7486_v48  ;;  %9264 = vmatprep.mubr.msk.bf16.mxu0 %vm9920_vm1, %v12900_v14  ;;  %v7817_v0 = vsel %vm648_vm2, %v13076_v46, %v9333_v59  ;;  %v7816_v48 = vsel %vm648_vm2, %v13077_v32, %v9332_v7 }
 0x94a   :  { %9370 = vrot.lane.b32.xlu0 %v9369_v21, %s9921_s28  ;;  %9270 = vmatprep.mubr.msk.bf16.mxu1 %vm9920_vm1, %v12900_v14  ;;  %v4486_v21 = vmul.f32 %v9740_v54, %v12499_v56  ;;  %v9341_v49 = vpop.permute.xlu0 %9340 }
 0x94b   :  { %9274 = vmatprep.subr.bf16.mxu0 %v12900_v14  ;;  %9280 = vmatprep.subr.bf16.mxu1 %v12900_v14  ;;  %v7577_v62 = vpop.permute.xlu1 %7576  ;;  %v9342_v9 = vunpack.i.l.bf16 %v9341_v49 }
 0x94c   :  { %v7582_v57 = vsel %vm4556_vm3, %v7577_v62, 0  ;;  %v4550_v15 = vpack.c.bf16 %v4486_v21, %v4486_v21 }
 0x94d   :  { %v7833_v18 = vsel %vm7832_vm4, %v7816_v48, %v9342_v9 }
 0x94f   :  { %9265 = vmatmul.mubr.msk.bf16.vlgmr.msra.gmra.mrb[248].mxu0 %vm648_vm2, %v4547_v30  ;;  %v9336_v22 = vpop.permute.xlu1 %9335 }
 0x950   :  { %9271 = vmatmul.mubr.msk.bf16.vlgmr.msra.gmra.mrb[8].mxu1 %vm648_vm2, %v4548_v27  ;;  %9275 = vmatpush3.bf16.msra.mxu0 %v7534_v2 }
 0x951   :  { %9281 = vmatpush3.bf16.msra.mxu1 %v7582_v57  ;;  %9276 = vmatprep.mubr.msk.bf16.mxu0 %vm9920_vm1, %v12900_v14 }
 0x952   :  { %9282 = vmatprep.mubr.msk.bf16.mxu1 %vm9920_vm1, %v12900_v14  ;;  %9286 = vmatprep.subr.bf16.mxu0 %v9451_v8 }
 0x957   :  { %9277 = vmatmul.mubr.msk.bf16.vlgmr.msra.gmra.mrb[252].mxu0 %vm648_vm2, %v4549_v1 }
 0x958   :  { %9283 = vmatmul.mubr.msk.bf16.vlgmr.msra.gmra.mrb[12].mxu1 %vm648_vm2, %v4550_v15  ;;  %9287 = vmatpush3.bf16.msra.mxu0 %v9451_v8  ;;  %v9346_v8 = vpop.permute.xlu1 %9345 }
 0x959   :  { %9288 = vmatprep.subr.bf16.mxu0 %v9452_v25 }
 0x95c   :  { %9289 = vmatpush3.bf16.msra.mxu0 %v9452_v25  ;;  %v13078_v25 = vld [vmem:[#allocation81_spill] sm:$0xff] }
 0x972   :  { %v6994_v34 = vpop.f32.mrb[228].mxu0 }
 0x973   :  { %v9206_v53 = vpop.f32.mrb[229].mxu0 }
 0x974   :  { %v7042_v16 = vpop.f32.mrb[244].mxu1  ;;  %v6997_v47 = vpop.f32.mrb[230].mxu0  ;;  %v9338_v53 = vunpack.i.h.bf16 %v9336_v22 }
 0x975   :  { %v9354_v4 = vpack.i.bf16 %v7042_v16, %v6994_v34  ;;  %v9212_v56 = vpop.f32.mrb[245].mxu1  ;;  %v9207_v14 = vpop.f32.mrb[231].mxu0  ;;  %v13079_v34 = vld [vmem:[#allocation82_spill] sm:$0xff]  ;;  %v9347_v47 = vunpack.i.l.bf16 %v9346_v8 }
 0x976   :  { %v7045_v52 = vpop.f32.mrb[246].mxu1  ;;  %v13080_v16 = vpack.i.bf16 %v13078_v25, %v13079_v34  ;;  %v9348_v56 = vunpack.i.h.bf16 %v9346_v8  ;;  %v13081_v14 = vld [vmem:[#allocation63_spill] sm:$0xff] }
 0x977   :  { %v9213_v19 = vpop.f32.mrb[247].mxu1  ;;  %9355 = vrot.lane.b32.xlu1 %v9354_v4, %s9922_s29  ;;  %v9337_v4 = vunpack.i.l.bf16 %v9336_v22 }
 0x978   :  { %v7819_v19 = vsel %vm648_vm2, %v13081_v14, %v9338_v53 }
 0x97b   :  { %9365 = vrot.lane.b32.xlu1 %v13072_v31, %s9911_s24  ;;  %v13082_v31 = vld [vmem:[#allocation64_spill] sm:$0xff] }
 0x97c   :  { %v7818_v44 = vsel %vm648_vm2, %v13082_v31, %v9337_v4 }
 0x97f   :  { %9375 = vrot.lane.b32.xlu1 %v9374_v58, %s9921_s28  ;;  %v9343_v58 = vunpack.i.h.bf16 %v9341_v49 }
 0x981   :  { %v7834_v62 = vsel %vm7832_vm4, %v7817_v0, %v9343_v58  ;;  %v13083_v58 = vld [vmem:[#allocation91_spill] sm:$0xff] }
 0x982   :  { %v13084_v9 = vpack.i.bf16 %v12193_v26, %v13083_v58 }
 0x9a7   :  { %v7090_v10 = vpop.f32.mrb[232].mxu0 }
 0x9a8   :  { %v9218_v24 = vpop.f32.mrb[233].mxu0 }
 0x9a9   :  { %v7138_v5 = vpop.f32.mrb[248].mxu1  ;;  %v7093_v11 = vpop.f32.mrb[234].mxu0  ;;  %v7836_v24 = vsel %vm7832_vm4, %v7819_v19, %v9348_v56 }
 0x9aa   :  { %v9379_v51 = vpack.i.bf16 %v7138_v5, %v7090_v10  ;;  %v9224_v6 = vpop.f32.mrb[249].mxu1  ;;  %v9219_v17 = vpop.f32.mrb[235].mxu0 }
 0x9ab   :  { %v7141_v38 = vpop.f32.mrb[250].mxu1 }
 0x9ac   :  { %v9225_v55 = vpop.f32.mrb[251].mxu1  ;;  %9380 = vrot.lane.b32.xlu0 %v9379_v51, %s9922_s29  ;;  %v7835_v51 = vsel %vm7832_vm4, %v7818_v44, %v9347_v47 }
 0x9b0   :  { %9390 = vrot.lane.b32.xlu0 %v13075_v28, %s9911_s24 }
 0x9b4   :  { %9400 = vrot.lane.b32.xlu0 %v9399_v13, %s9921_s28  ;;  %v9351_v45 = vpop.permute.xlu0 %9350 }
 0x9b5   :  { %v9353_v36 = vunpack.i.h.bf16 %v9351_v45  ;;  %v9352_v39 = vunpack.i.l.bf16 %v9351_v45 }
 0x9b7   :  { %v7850_v30 = vsel %vm7849_vm5, %v7833_v18, %v9352_v39  ;;  %v7851_v50 = vsel %vm7849_vm5, %v7834_v62, %v9353_v36 }
 0x9b8   :  { %v7866_v23 = vpack.c.bf16 %v7851_v50, %v7850_v30  ;;  %v9361_v60 = vpop.permute.xlu0 %9360 }
 0x9b9   :  { %v9363_v46 = vunpack.i.h.bf16 %v9361_v60  ;;  %v9362_v0 = vunpack.i.l.bf16 %v9361_v60 }
 0x9ba   :  { %9290 = vmatprep.mubr.msk.bf16.mxu0 %vm119_vm0, %v7866_v23 }
 0x9bc   :  { %v9371_v7 = vpop.permute.xlu0 %9370 }
 0x9bd   :  { %v9373_v36 = vunpack.i.h.bf16 %v9371_v7  ;;  %v9372_v39 = vunpack.i.l.bf16 %v9371_v7 }
 0x9dc   :  { %v7186_v13 = vpop.f32.mrb[236].mxu0 }
 0x9dd   :  { %v9230_v54 = vpop.f32.mrb[237].mxu0 }
 0x9de   :  { %v7234_v27 = vpop.f32.mrb[252].mxu1  ;;  %v7189_v3 = vpop.f32.mrb[238].mxu0  ;;  %v13086_v54 = vld [vmem:[#allocation52_spill] sm:$0xff] }
 0x9df   :  { %v9384_v2 = vpack.i.bf16 %v7234_v27, %v7186_v13  ;;  %v9236_v57 = vpop.f32.mrb[253].mxu1  ;;  %v9231_v1 = vpop.f32.mrb[239].mxu0  ;;  %v13085_v13 = vld [vmem:[#allocation51_spill] sm:$0xff] }
 0x9e0   :  { %v7237_v21 = vpop.f32.mrb[254].mxu1  ;;  %v7821_v27 = vsel %vm648_vm2, %v13085_v13, %v9363_v46 }
 0x9e1   :  { %v9237_v15 = vpop.f32.mrb[255].mxu1  ;;  %9385 = vrot.lane.b32.xlu1 %v9384_v2, %s9922_s29  ;;  %v7820_v2 = vsel %vm648_vm2, %v13086_v54, %v9362_v0  ;;  %v7838_v1 = vsel %vm7832_vm4, %v7821_v27, %v9373_v36 }
 0x9e2   :  { %v7837_v21 = vsel %vm7832_vm4, %v7820_v2, %v9372_v39  ;;  %v13090_v39 = vld [vmem:[#allocation30_spill] sm:$0xff] }
 0x9e5   :  { %9395 = vrot.lane.b32.xlu1 %v13080_v16, %s9911_s24 }
 0x9e9   :  { %v9356_v52 = vpop.permute.xlu1 %9355  ;;  %9405 = vrot.lane.b32.xlu1 %v9404_v63, %s9921_s28 }
 0x9ea   :  { %v9358_v10 = vunpack.i.h.bf16 %v9356_v52  ;;  %v9357_v5 = vunpack.i.l.bf16 %v9356_v52 }
 0x9ec   :  { %v7853_v6 = vsel %vm7849_vm5, %v7836_v24, %v9358_v10  ;;  %v7852_v11 = vsel %vm7849_vm5, %v7835_v51, %v9357_v5 }
 0x9ed   :  { %v7867_v38 = vpack.c.bf16 %v7853_v6, %v7852_v11  ;;  %v9366_v51 = vpop.permute.xlu1 %9365 }
 0x9ee   :  { %v9368_v11 = vunpack.i.h.bf16 %v9366_v51 }
 0x9ef   :  { %9291 = vmatmul.mubr.msk.bf16.vlgmr.msra.gmra.mrb[0].mxu0 %vm119_vm0, %v7867_v38  ;;  %v9367_v38 = vunpack.i.l.bf16 %v9366_v51  ;;  %v13095_v51 = vld [vmem:[#allocation54_spill] sm:$0xff] }
 0x9f1   :  { %v9376_v6 = vpop.permute.xlu1 %9375 }
 0x9f2   :  { %v9378_v60 = vunpack.i.h.bf16 %v9376_v6  ;;  %v9377_v42 = vunpack.i.l.bf16 %v9376_v6 }
 0xa11   :  { %v7282_v40 = vpop.f32.mrb[240].mxu0 }
 0xa12   :  { %v9242_v17 = vpop.f32.mrb[241].mxu0 }
 0xa13   :  { %v7330_v63 = vpop.f32.mrb[0].mxu1  ;;  %v7285_v33 = vpop.f32.mrb[242].mxu0 }
 0xa14   :  { %v9409_v55 = vpack.i.bf16 %v7330_v63, %v7282_v40  ;;  %v9248_v49 = vpop.f32.mrb[1].mxu1  ;;  %v9243_v28 = vpop.f32.mrb[243].mxu0  ;;  %v13089_v63 = vld [vmem:[#allocation41_spill] sm:$0xff] }
 0xa15   :  { %v7333_v43 = vpop.f32.mrb[2].mxu1  ;;  %v7822_v17 = vsel %vm648_vm2, %v13089_v63, %v9367_v38 }
 0xa16   :  { %v9249_v59 = vpop.f32.mrb[3].mxu1  ;;  %9410 = vrot.lane.b32.xlu0 %v9409_v55, %s9922_s29  ;;  %v7839_v33 = vsel %vm7832_vm4, %v7822_v17, %v9377_v42 }
 0xa1a   :  { %9420 = vrot.lane.b32.xlu0 %v13084_v9, %s9911_s24  ;;  %v7378_v45 = vpop.f32.mrb[244].mxu0 }
 0xa1b   :  { %v7426_v32 = vpop.f32.mrb[4].mxu1  ;;  %v9254_v48 = vpop.f32.mrb[245].mxu0 }
 0xa1c   :  { %v9414_v18 = vpack.i.bf16 %v7426_v32, %v7378_v45  ;;  %v9260_v62 = vpop.f32.mrb[5].mxu1  ;;  %v7381_v30 = vpop.f32.mrb[246].mxu0 }
 0xa1d   :  { %v7429_v50 = vpop.f32.mrb[6].mxu1  ;;  %v9255_v23 = vpop.f32.mrb[247].mxu0  ;;  %v13091_v62 = vld [vmem:[#allocation29_spill] sm:$0xff] }
 0xa1e   :  { %v9261_v22 = vpop.f32.mrb[7].mxu1  ;;  %9430 = vrot.lane.b32.xlu0 %v9429_v20, %s9921_s28  ;;  %9415 = vrot.lane.b32.xlu1 %v9414_v18, %s9922_s29  ;;  %v9381_v26 = vpop.permute.xlu0 %9380  ;;  %v13087_v20 = vpack.i.bf16 %v12241_v29, %v12237_v35 }
 0xa1f   :  { %v9383_v57 = vunpack.i.h.bf16 %v9381_v26  ;;  %v9382_v3 = vunpack.i.l.bf16 %v9381_v26 }
 0xa21   :  { %v7854_v15 = vsel %vm7849_vm5, %v7837_v21, %v9382_v3  ;;  %v7855_v61 = vsel %vm7849_vm5, %v7838_v1, %v9383_v57 }
 0xa22   :  { %v7868_v12 = vpack.c.bf16 %v7855_v61, %v7854_v15  ;;  %9425 = vrot.lane.b32.xlu1 %v13087_v20, %s9911_s24  ;;  %v7474_v8 = vpop.f32.mrb[248].mxu0  ;;  %v9391_v58 = vpop.permute.xlu0 %9390  ;;  %s9923_s24 = smov [#allocation13]  }
 0xa23   :  { %v7522_v25 = vpop.f32.mrb[8].mxu1  ;;  %v9266_v34 = vpop.f32.mrb[249].mxu0  ;;  %v9393_v45 = vunpack.i.h.bf16 %v9391_v58  ;;  %v9392_v46 = vunpack.i.l.bf16 %v9391_v58  ;;  %s8056_s30 = sshll.u32 %s9923_s24, 4  ;;  %s8057_s30 = int_to_ptr.vmem [resolvable:$true] %s8056_s30 }
 0xa24   :  { %v9439_v16 = vpack.i.bf16 %v7522_v25, %v7474_v8  ;;  %v9272_v53 = vpop.f32.mrb[9].mxu1  ;;  %9294 = vmatprep.mubr.msk.bf16.mxu0 %vm119_vm0, %v7868_v12  ;;  %v7477_v4 = vpop.f32.mrb[250].mxu0  ;;  %v13092_v12 = vld [vmem:[#allocation65_spill] sm:$0xff]  ;;  %v13093_v8 = vld [vmem:[#allocation66_spill] sm:$0xff]  ;;  %s9873_s7 = scalar_lea.vmem %s8057_s30, 1024  ;;  %p9878_p7 = scmp.lt.s32.totalorder %s8057_s30, %s8057_s30 }
 0xa25   :  { %v7525_v56 = vpop.f32.mrb[10].mxu1  ;;  %v9267_v47 = vpop.f32.mrb[251].mxu0  ;;  %v7825_v18 = vsel %vm648_vm2, %v13090_v39, %v9393_v45  ;;  %v7824_v30 = vsel %vm648_vm2, %v13091_v62, %v9392_v46  ;;  %v8211_v39 = vld [vmem:[#allocation11] ss:$0 sm:$0xff]  ;;  %p9874_p6 = scmp.ne.s32.totalorder %s8057_s30, %s9873_s7  ;;  %p9879_p8 = scmp.lt.s32.totalorder %s9873_s7, %s9873_s7 }
 0xa26   :  { %v9273_v52 = vpop.f32.mrb[11].mxu1  ;;  %9435 = vrot.lane.b32.xlu1 %v9434_v41, %s9921_s28  ;;  %9440 = vrot.lane.b32.xlu0 %v9439_v16, %s9922_s29  ;;  %v13088_v41 = vld [vmem:[#allocation42_spill] sm:$0xff]  ;;  %v9401_v9 = vpop.permute.xlu0 %9400 }
 0xa27   :  { %v7823_v40 = vsel %vm648_vm2, %v13088_v41, %v9368_v11  ;;  %v9403_v32 = vunpack.i.h.bf16 %v9401_v9  ;;  %v9402_v48 = vunpack.i.l.bf16 %v9401_v9  ;;  %p9880_p9 = por %p9879_p8, %p9878_p7 }
 0xa28   :  { %v7840_v43 = vsel %vm7832_vm4, %v7823_v40, %v9378_v60 }
 0xa29   :  { %v7841_v22 = vsel %vm7832_vm4, %v7824_v30, %v9402_v48  ;;  %v7842_v26 = vsel %vm7832_vm4, %v7825_v18, %v9403_v32  ;;  %p9881_p10 = pnand %p9880_p9, %p9874_p6 }
 0xa2a   :  { %v7570_v35 = vpop.f32.mrb[252].mxu0 }
 0xa2b   :  { %v7618_v29 = vpop.f32.mrb[12].mxu1  ;;  %v9278_v14 = vpop.f32.mrb[253].mxu0 }
 0xa2c   :  { %v9444_v19 = vpack.i.bf16 %v7618_v29, %v7570_v35  ;;  %v9284_v31 = vpop.f32.mrb[13].mxu1  ;;  %v7573_v44 = vpop.f32.mrb[254].mxu0 }
 0xa2d   :  { %v7621_v10 = vpop.f32.mrb[14].mxu1  ;;  %v9279_v5 = vpop.f32.mrb[255].mxu0 }
 0xa2e   :  { %v9285_v24 = vpop.f32.mrb[15].mxu1  ;;  %9445 = vrot.lane.b32.xlu1 %v9444_v19, %s9922_s29  ;;  %v13094_v5 = vld [vmem:[#allocation53_spill] sm:$0xff] }
 0xa53   :  { %v9386_v37 = vpop.permute.xlu1 %9385 }
 0xa54   :  { %v9388_v55 = vunpack.i.h.bf16 %v9386_v37  ;;  %v9387_v49 = vunpack.i.l.bf16 %v9386_v37 }
 0xa56   :  { %v7857_v28 = vsel %vm7849_vm5, %v7840_v43, %v9388_v55  ;;  %v7856_v59 = vsel %vm7849_vm5, %v7839_v33, %v9387_v49 }
 0xa57   :  { %v7869_v7 = vpack.c.bf16 %v7857_v28, %v7856_v59  ;;  %v9396_v0 = vpop.permute.xlu1 %9395  ;;  %v13096_v28 = vld [vmem:[#allocation75_spill] sm:$0xff] }
 0xa58   :  { %v9398_v57 = vunpack.i.h.bf16 %v9396_v0  ;;  %v9397_v3 = vunpack.i.l.bf16 %v9396_v0 }
 0xa59   :  { %9295 = vmatmul.mubr.msk.bf16.gmra.mrb[4].mxu0 %vm119_vm0, %v7869_v7  ;;  %v13097_v7 = vld [vmem:[#allocation76_spill] sm:$0xff] }
 0xa5a   :  { %v7827_v20 = vsel %vm648_vm2, %v13092_v12, %v9398_v57  ;;  %v7826_v25 = vsel %vm648_vm2, %v13093_v8, %v9397_v3 }
 0xa5b   :  { %v9406_v13 = vpop.permute.xlu1 %9405 }
 0xa5c   :  { %v9408_v1 = vunpack.i.h.bf16 %v9406_v13  ;;  %v9407_v15 = vunpack.i.l.bf16 %v9406_v13 }
 0xa5e   :  { %v7843_v53 = vsel %vm7832_vm4, %v7826_v25, %v9407_v15  ;;  %v7844_v4 = vsel %vm7832_vm4, %v7827_v20, %v9408_v1 }
 0xa88   :  { %v9411_v36 = vpop.permute.xlu0 %9410 }
 0xa89   :  { %v9413_v50 = vunpack.i.h.bf16 %v9411_v36  ;;  %v9412_v23 = vunpack.i.l.bf16 %v9411_v36 }
 0xa8b   :  { %v7858_v27 = vsel %vm7849_vm5, %v7841_v22, %v9412_v23  ;;  %v7859_v54 = vsel %vm7849_vm5, %v7842_v26, %v9413_v50 }
 0xa8c   :  { %v7870_v2 = vpack.c.bf16 %v7859_v54, %v7858_v27  ;;  %v9421_v21 = vpop.permute.xlu0 %9420 }
 0xa8d   :  { %v9423_v29 = vunpack.i.h.bf16 %v9421_v21  ;;  %v9422_v14 = vunpack.i.l.bf16 %v9421_v21 }
 0xa8e   :  { %9298 = vmatprep.mubr.msk.bf16.mxu0 %vm119_vm0, %v7870_v2 }
 0xa8f   :  { %v7829_v24 = vsel %vm648_vm2, %v13094_v5, %v9423_v29  ;;  %v7828_v6 = vsel %vm648_vm2, %v13095_v51, %v9422_v14 }
 0xa90   :  { %v9416_v61 = vpop.permute.xlu1 %9415  ;;  %v9431_v52 = vpop.permute.xlu0 %9430 }
 0xa91   :  { %v9418_v34 = vunpack.i.h.bf16 %v9416_v61  ;;  %v9417_v16 = vunpack.i.l.bf16 %v9416_v61  ;;  %v9433_v31 = vunpack.i.h.bf16 %v9431_v52  ;;  %v9432_v44 = vunpack.i.l.bf16 %v9431_v52 }
 0xa93   :  { %v7861_v56 = vsel %vm7849_vm5, %v7844_v4, %v9418_v34  ;;  %v7860_v47 = vsel %vm7849_vm5, %v7843_v53, %v9417_v16  ;;  %v7845_v60 = vsel %vm7832_vm4, %v7828_v6, %v9432_v44  ;;  %v7846_v42 = vsel %vm7832_vm4, %v7829_v24, %v9433_v31 }
 0xa94   :  { %v7871_v35 = vpack.c.bf16 %v7861_v56, %v7860_v47  ;;  %v9426_v19 = vpop.permute.xlu1 %9425 }
 0xa95   :  { %v9428_v17 = vunpack.i.h.bf16 %v9426_v19  ;;  %v9427_v55 = vunpack.i.l.bf16 %v9426_v19 }
 0xa96   :  { %9299 = vmatmul.mubr.msk.bf16.gmra.mrb[8].mxu0 %vm119_vm0, %v7871_v35 }
 0xa97   :  { %v7831_v59 = vsel %vm648_vm2, %v13096_v28, %v9428_v17  ;;  %v7830_v58 = vsel %vm648_vm2, %v13097_v7, %v9427_v55 }
 0xa98   :  { %v9441_v10 = vpop.permute.xlu0 %9440  ;;  %v9436_v37 = vpop.permute.xlu1 %9435 }
 0xa99   :  { %v9443_v11 = vunpack.i.h.bf16 %v9441_v10  ;;  %v9442_v38 = vunpack.i.l.bf16 %v9441_v10  ;;  %v9438_v49 = vunpack.i.h.bf16 %v9436_v37  ;;  %v9437_v33 = vunpack.i.l.bf16 %v9436_v37 }
 0xa9b   :  { %v7862_v41 = vsel %vm7849_vm5, %v7845_v60, %v9442_v38  ;;  %v7863_v40 = vsel %vm7849_vm5, %v7846_v42, %v9443_v11  ;;  %v7847_v46 = vsel %vm7832_vm4, %v7830_v58, %v9437_v33  ;;  %v7848_v0 = vsel %vm7832_vm4, %v7831_v59, %v9438_v49 }
 0xa9c   :  { %v7872_v63 = vpack.c.bf16 %v7863_v40, %v7862_v41 }
 0xa9e   :  { %9302 = vmatprep.mubr.msk.bf16.mxu0 %vm119_vm0, %v7872_v63 }
 0xaa0   :  { %v9446_v43 = vpop.permute.xlu1 %9445 }
 0xaa1   :  { %v9448_v9 = vunpack.i.h.bf16 %v9446_v43  ;;  %v9447_v45 = vunpack.i.l.bf16 %v9446_v43 }
 0xaa3   :  { %v7865_v32 = vsel %vm7849_vm5, %v7848_v0, %v9448_v9  ;;  %v7864_v48 = vsel %vm7849_vm5, %v7847_v46, %v9447_v45 }
 0xaa4   :  { %v7873_v36 = vpack.c.bf16 %v7865_v32, %v7864_v48 }
 0xaa6   :  { %9303 = vmatmul.mubr.msk.bf16.gmra.mrb[12].mxu0 %vm119_vm0, %v7873_v36 }
 0xac2   :  { %v9292_v18 = vpop.f32.mrb[0].mxu0 }
 0xac3   :  { %v7964_v62 = vadd.f32 %v9292_v18, %v8211_v39  ;;  %v7955_v30 = vpop.f32.mrb[1].mxu0 }
 0xac4   :  { %v7956_v50 = vadd.f32 %v8211_v39, %v7955_v30  ;;  %v9293_v23 = vpop.f32.mrb[2].mxu0 }
 0xac5   :  { %v8020_v22 = vpack.c.bf16 %v7964_v62, %v7964_v62  ;;  %v7967_v26 = vadd.f32 %v9293_v23, %v8211_v39  ;;  %v7958_v13 = vpop.f32.mrb[3].mxu0 }
 0xac6   :  { %v8018_v27 = vpack.c.bf16 %v7956_v50, %v7956_v50  ;;  %v7959_v54 = vadd.f32 %v8211_v39, %v7958_v13 }
 0xac7   :  { %8037 = vst.msk [vmem:[#allocation13 + $0x8] sm:$0xf] %vm8034_vm6, %v8020_v22  ;;  %v8021_v2 = vpack.c.bf16 %v7967_v26, %v7967_v26 }
 0xac8   :  { %8035 = vst.msk [vmem:[#allocation13] sm:$0xf] %vm8034_vm6, %v8018_v27  ;;  %v8019_v57 = vpack.c.bf16 %v7959_v54, %v7959_v54 }
 0xac9   :  { %8038 = vst.msk [vmem:[#allocation13 + $0xc] sm:$0xf] %vm8034_vm6, %v8021_v2 }
 0xaca   :  { %8036 = vst.msk [vmem:[#allocation13 + $0x4] sm:$0xf] %vm8034_vm6, %v8019_v57 }
 0xb2c   :  { %v9296_v3 = vpop.f32.mrb[4].mxu0 }
 0xb2d   :  { %v7980_v21 = vadd.f32 %v9296_v3, %v8211_v39  ;;  %v7971_v1 = vpop.f32.mrb[5].mxu0 }
 0xb2e   :  { %v7972_v15 = vadd.f32 %v8211_v39, %v7971_v1  ;;  %v9297_v61 = vpop.f32.mrb[6].mxu0 }
 0xb2f   :  { %v8024_v12 = vpack.c.bf16 %v7980_v21, %v7980_v21  ;;  %v7983_v20 = vadd.f32 %v9297_v61, %v8211_v39  ;;  %v7974_v8 = vpop.f32.mrb[7].mxu0 }
 0xb30   :  { %v8022_v25 = vpack.c.bf16 %v7972_v15, %v7972_v15  ;;  %v7975_v34 = vadd.f32 %v8211_v39, %v7974_v8 }
 0xb31   :  { %8041 = vst.msk [vmem:[#allocation13 + $0x18] sm:$0xf] %vm8034_vm6, %v8024_v12  ;;  %v8025_v16 = vpack.c.bf16 %v7983_v20, %v7983_v20 }
 0xb32   :  { %8039 = vst.msk [vmem:[#allocation13 + $0x10] sm:$0xf] %vm8034_vm6, %v8022_v25  ;;  %v8023_v53 = vpack.c.bf16 %v7975_v34, %v7975_v34 }
 0xb33   :  { %8042 = vst.msk [vmem:[#allocation13 + $0x1c] sm:$0xf] %vm8034_vm6, %v8025_v16 }
 0xb34   :  { %8040 = vst.msk [vmem:[#allocation13 + $0x14] sm:$0xf] %vm8034_vm6, %v8023_v53 }
 0xb69   :  { %v9300_v4 = vpop.f32.mrb[8].mxu0 }
 0xb6a   :  { %v7996_v56 = vadd.f32 %v9300_v4, %v8211_v39  ;;  %v7987_v47 = vpop.f32.mrb[9].mxu0 }
 0xb6b   :  { %v7988_v52 = vadd.f32 %v8211_v39, %v7987_v47  ;;  %v9301_v35 = vpop.f32.mrb[10].mxu0 }
 0xb6c   :  { %v8028_v29 = vpack.c.bf16 %v7996_v56, %v7996_v56  ;;  %v7999_v14 = vadd.f32 %v9301_v35, %v8211_v39  ;;  %v7990_v19 = vpop.f32.mrb[11].mxu0 }
 0xb6d   :  { %v8026_v31 = vpack.c.bf16 %v7988_v52, %v7988_v52  ;;  %v7991_v44 = vadd.f32 %v8211_v39, %v7990_v19 }
 0xb6e   :  { %8045 = vst.msk [vmem:[#allocation13 + $0x28] sm:$0xf] %vm8034_vm6, %v8028_v29  ;;  %v8029_v10 = vpack.c.bf16 %v7999_v14, %v7999_v14 }
 0xb6f   :  { %8043 = vst.msk [vmem:[#allocation13 + $0x20] sm:$0xf] %vm8034_vm6, %v8026_v31  ;;  %v8027_v5 = vpack.c.bf16 %v7991_v44, %v7991_v44 }
 0xb70   :  { %8046 = vst.msk [vmem:[#allocation13 + $0x2c] sm:$0xf] %vm8034_vm6, %v8029_v10 }
 0xb71   :  { %8044 = vst.msk [vmem:[#allocation13 + $0x24] sm:$0xf] %vm8034_vm6, %v8027_v5 }
 0xb79   :  { %v9304_v24 = vpop.f32.mrb[12].mxu0 }
 0xb7a   :  { %v8012_v51 = vadd.f32 %v9304_v24, %v8211_v39  ;;  %v8003_v6 = vpop.f32.mrb[13].mxu0 }
 0xb7b   :  { %v8004_v11 = vadd.f32 %v8211_v39, %v8003_v6  ;;  %v9305_v38 = vpop.f32.mrb[14].mxu0 }
 0xb7c   :  { %v8032_v60 = vpack.c.bf16 %v8012_v51, %v8012_v51  ;;  %v8015_v42 = vadd.f32 %v9305_v38, %v8211_v39  ;;  %v8006_v37 = vpop.f32.mrb[15].mxu0 }
 0xb7d   :  { %v8030_v41 = vpack.c.bf16 %v8004_v11, %v8004_v11  ;;  %v8007_v40 = vadd.f32 %v8211_v39, %v8006_v37 }
 0xb7e   :  { %8049 = vst.msk [vmem:[#allocation13 + $0x38] sm:$0xf] %vm8034_vm6, %v8032_v60  ;;  %v8033_v63 = vpack.c.bf16 %v8015_v42, %v8015_v42 }
 0xb7f   :  { %8047 = vst.msk [vmem:[#allocation13 + $0x30] sm:$0xf] %vm8034_vm6, %v8030_v41  ;;  %v8031_v17 = vpack.c.bf16 %v8007_v40, %v8007_v40 }
 0xb80   :  { %8050 = vst.msk [vmem:[#allocation13 + $0x3c] sm:$0xf] %vm8034_vm6, %v8033_v63 }
 0xb81   :  { %8048 = vst.msk [vmem:[#allocation13 + $0x34] sm:$0xf] %vm8034_vm6, %v8031_v17 }
 0xb82   :  { %9884 = shalt.err (!%p9881_p10)
}
 0xb83   :  { %s9885_s3 = scalar_lea.hbm %s12791_s6, 1024 }
 0xb84   :  { %p9886_p11 = scmp.ne.s32.totalorder %s12791_s6, %s9885_s3  ;;  %p9889_p12 = scmp.lt.u32.totalorder %s9885_s3, %s12791_s6 }
 0xb86   :  { %p9891_p13 = pnand %p9889_p12, %p9886_p11 }
 0xb88   :  { %9894 = shalt.err (!%p9891_p13)
}
 0xb89   :  { %8062 = dma.vmem_to_hbm [thread:$0]  %s8057_s30, 1024, %s12791_s6, [#allocation4], %s9907_s1, %s9907_s1, %s9908_s20  }
 0xb8a   :  { %9903 = dma.done.wait [#allocation4], 1024  }
 0xb8b   :  { %9904 = vsyncadd [#allocation4], 4294966272 }
 0xb8c   :  { %8066 = vsyncpa [#allocation3], 1 }
 0xb8d   :  { %8067 = vsyncpa [#allocation6], 1 }
 0xb8e   :  { %8068 = vsyncpa [#allocation9], 1 }
 0xb8f   :  { %8069 = vsyncpa [#allocation12], 1 }
 0xb90   :  { %8070 = vsyncpa [#allocation4], 1 }

</bundles_post_ra>
